<compile_context>
chip_gen: v7x
topology: tpu7x:2x2x1
jax: 0.10.0
libtpu: 0.0.40
codegen_flags: <defaults>
</compile_context>

<pallas_src>
import jax
import jax.numpy as jnp
from jax.experimental import pallas as pl
from jax.experimental.pallas import tpu as pltpu


# --------------------------------------------------------------------------- #
# Fused forward kernel (one grid step == one graph instance)
# --------------------------------------------------------------------------- #
def make_fused_kernel(N, E, hidden, H, D):
    k_med = (N - 1) // 2          # torch.median -> lower median of sorted values

    def kernel(x_ref, adjs_ref, w1_ref, b1_ref, w2_ref, b2_ref,
               wmh_ref, bmh_ref, res_ref, hres_ref):
        f32 = jnp.float32

        # ---------------- constants, built once per grid step ----------------
        ii = jax.lax.broadcasted_iota(jnp.int32, (N, N), 0)
        jj = jax.lax.broadcasted_iota(jnp.int32, (N, N), 1)
        shift_m = (jj == (ii - 1)).astype(f32)   # xp[i] = x[i-1], xp[0] = 0
        tri_l = (jj <= ii).astype(f32)           # inclusive lower-tri (cumsum)

        # adjacency slabs: [E*N, N] (etype-stacked) and [H*E*N, N] for MH layer
        adj_pair = jnp.concatenate([adjs_ref[e] for e in range(E)], axis=0)
        bias_pair = (adj_pair - 1.0) * 1e30      # 0 on edges, -1e30 elsewhere
        adj_mh = jnp.concatenate([adj_pair] * H, axis=0)
        bias_mh = (adj_mh - 1.0) * 1e30

        def gat_attention(h_in, w_ref, P, adj_slab, bias_slab):
            """Masked GAT attention for all (etype, head) pairs at once.

            w_ref column layout: [el_0..el_{P-1} | er_0..er_{P-1} | z_0 | ... ].
            Returns (zfull, alpha_slab[P*N, N]); alpha block p is the in-edge
            softmax for pair p (rows = dst, cols = src)."""
            zfull = jnp.dot(h_in, w_ref[...], preferred_element_type=f32)
            width = w_ref.shape[1]
            tw = max(P, min(32, width))           # square-ish window -> friendly XLU transpose
            att_t = jnp.transpose(zfull[:, :tw])  # [tw, N]; rows 0..P-1 are the el_p
            blocks = []
            for p in range(P):
                er_col = zfull[:, P + p:P + p + 1]     # dst score [N, 1]
                el_row = att_t[p:p + 1, :]             # src score [1, N]
                blocks.append(er_col + el_row)         # s[dst, src]
            s = jnp.concatenate(blocks, axis=0) if P > 1 else blocks[0]   # [P*N, N]
            s = jnp.where(s >= 0.0, s, 0.2 * s)        # LeakyReLU(0.2)
            s = s + bias_slab                          # additive -1e30 mask (hoisted)
            m = jnp.max(s, axis=-1, keepdims=True)
            p_exp = jnp.exp(s - m) * adj_slab          # zero-in-degree rows stay 0
            denom = jnp.sum(p_exp, axis=-1, keepdims=True)
            alpha = p_exp * pl.reciprocal(jnp.maximum(denom, 1e-30), approx=True)
            return zfull, alpha

        def lane_cat(alpha, ps):
            return jnp.concatenate([alpha[p * N:(p + 1) * N, :] for p in ps], axis=1)

        # ---------------- layer1 (fc1 folded into the projection) ----------------
        z1, a1 = gat_attention(x_ref[...], w1_ref, E, adj_pair, bias_pair)
        z1_stack = jnp.concatenate(
            [z1[:, 2 * E + e * hidden: 2 * E + (e + 1) * hidden] for e in range(E)],
            axis=0)                                                    # [E*N, hidden]
        h1 = jnp.dot(lane_cat(a1, range(E)), z1_stack,
                     preferred_element_type=f32) + b1_ref[...]

        # ---------------- layer2 (fc2 folded) ----------------
        z2, a2 = gat_attention(h1, w2_ref, E, adj_pair, bias_pair)
        z2_stack = jnp.concatenate(
            [z2[:, 2 * E + e * hidden: 2 * E + (e + 1) * hidden] for e in range(E)],
            axis=0)
        h2 = jnp.dot(lane_cat(a2, range(E)), z2_stack,
                     preferred_element_type=f32) + b2_ref[...]
        hres_ref[...] = h2

        # ---------------- layerMH (fcmh + mean folded; p = h*E + e, head-major) ----------------
        P = H * E
        zoff = 2 * P
        zmh, amh = gat_attention(h2, wmh_ref, P, adj_mh, bias_mh)
        head_outs = []
        for h in range(H):
            ps = [h * E + e for e in range(E)]
            zh_stack = jnp.concatenate(
                [zmh[:, zoff + p * D: zoff + (p + 1) * D] for p in ps], axis=0)
            head_outs.append(jnp.dot(lane_cat(amh, ps), zh_stack,
                                     preferred_element_type=f32))      # [N, D]
        comb = jnp.concatenate(head_outs, axis=1) + bmh_ref[...]        # [N, H*D]

        # ---------------- norm_ per head, batched along lanes ----------------
        xp = jnp.dot(shift_m, comb, preferred_element_type=f32)
        dx = comb - xp
        dx = jnp.where(dx != dx, 0.0, dx)              # nan_to_num(nan=0)
        sq = dx * dx
        # all head norms via one 0/1 selection matmul (columns padded to 32)
        NSEL = 32
        ri = jax.lax.broadcasted_iota(jnp.int32, (H * D, NSEL), 0)
        cj = jax.lax.broadcasted_iota(jnp.int32, (H * D, NSEL), 1)
        selm = jnp.logical_and(ri >= cj * D, ri < (cj + 1) * D).astype(f32)
        nrm = jnp.sqrt(jnp.dot(sq, selm, preferred_element_type=f32))   # [N, 32]
        nrm_t = jnp.transpose(nrm)                                      # [32, N] (bit-identical)
        inv_cols = []
        for h in range(H):
            col = nrm[:, h:h + 1]                      # [N, 1]
            row = nrm_t[h:h + 1, :]                    # [1, N]
            less = (row < col).astype(f32)
            eqc = (row == col).astype(f32)             # exact ties (same source values)
            c = jnp.sum(less, axis=-1, keepdims=True)
            t = jnp.sum(eqc, axis=-1, keepdims=True)
            sel = jnp.logical_and(c <= k_med, k_med < c + t).astype(f32)
            med = (jnp.sum(col * sel, axis=0, keepdims=True) /
                   jnp.sum(sel, axis=0, keepdims=True))                 # [1, 1] lower median
            inv_cols.append(jnp.broadcast_to(
                pl.reciprocal(med + 1e-4, approx=True), (1, D)))
        inv_full = jnp.concatenate(inv_cols, axis=1)                    # [1, H*D]
        scaled = dx * inv_full
        cum = jnp.dot(tri_l, scaled, preferred_element_type=f32)        # cumsum over rows
        y = jnp.where(cum != cum, 0.0, cum)                             # nan   -> 0
        y = jnp.where(cum == jnp.inf, 100.0, y)                         # +inf  -> 100
        y = jnp.where(cum == -jnp.inf, -100.0, y)                       # -inf  -> -100
        res_ref[...] = y

    return kernel


# --------------------------------------------------------------------------- #
# Parameter init (deterministic, synthetic — no checkpoint)
# --------------------------------------------------------------------------- #
def _glorot(key, shape, gain=1.0):
    fan_in, fan_out = shape
    lim = gain * (6.0 / (fan_in + fan_out)) ** 0.5
    return jax.random.uniform(key, shape, jnp.float32, -lim, lim)


def _init_gat(key, in_dim, out_dim, H):
    k1, k2, k3 = jax.random.split(key, 3)
    return dict(
        w=_glorot(k1, (in_dim, H * out_dim), gain=2 ** 0.5),
        al=jax.random.normal(k2, (H, out_dim), jnp.float32) * 0.1,
        ar=jax.random.normal(k3, (H, out_dim), jnp.float32) * 0.1,
        b=jnp.zeros((1, H * out_dim), jnp.float32),
    )


def init_params(key, in_dim, hidden_dim, out_dim, num_heads, n_etypes):
    keys = jax.random.split(key, 3 * n_etypes + 3)
    gain = (2.0 / (1.0 + 0.2 ** 2)) ** 0.5  # leaky_relu(0.2) gain
    return dict(
        l1=[_init_gat(keys[e], in_dim, hidden_dim, 1) for e in range(n_etypes)],
        l2=[_init_gat(keys[n_etypes + e], hidden_dim, hidden_dim, 1) for e in range(n_etypes)],
        lmh=[_init_gat(keys[2 * n_etypes + e], hidden_dim, out_dim, num_heads)
             for e in range(n_etypes)],
        fc1_w=_glorot(keys[-3], (n_etypes * hidden_dim, hidden_dim), gain=gain),
        fc1_b=jnp.zeros((1, hidden_dim), jnp.float32),
        fc2_w=_glorot(keys[-2], (n_etypes * hidden_dim, hidden_dim), gain=gain),
        fc2_b=jnp.zeros((1, hidden_dim), jnp.float32),
        fcmh_w=_glorot(keys[-1], (n_etypes, n_etypes), gain=gain),  # [out, in] (torch layout)
    )


# --------------------------------------------------------------------------- #
# Host-side weight folding
# --------------------------------------------------------------------------- #
def _fold_layer_fc(gat_params, fc_w, fc_b, feat):
    """layer1/layer2 (1-head GAT per etype) with the post-concat Linear folded in.

    W_ext columns: [el_e... | er_e... | w_e @ fc_w_e ...]; the etype combine
    becomes a plain sum, fc bias and GAT biases merge into one folded bias."""
    ael, aer, zc = [], [], []
    bias = fc_b
    for e, p in enumerate(gat_params):
        w, al, ar, b = p["w"], p["al"], p["ar"], p["b"]
        fce = fc_w[e * feat:(e + 1) * feat, :]
        ael.append(w @ al[0][:, None])     # attention uses the *unfolded* projection
        aer.append(w @ ar[0][:, None])
        zc.append(w @ fce)
        bias = bias + b @ fce
    return jnp.concatenate(ael + aer + zc, axis=1), bias


def _fold_layer_mh(gat_params, fcmh_w, H, D):
    """layerMH: Linear(E,E,no bias) + mean over outputs == weighted etype sum
    with wbar[e] = column means of fcmh weight; head-major (h outer) ordering."""
    E = len(gat_params)
    wbar = jnp.mean(fcmh_w, axis=0)
    ael, aer, zc = [], [], []
    for h in range(H):
        for e in range(E):
            w, al, ar = gat_params[e]["w"], gat_params[e]["al"], gat_params[e]["ar"]
            wh = w[:, h * D:(h + 1) * D]
            ael.append(wh @ al[h][:, None])   # unscaled: attention uses raw z
            aer.append(wh @ ar[h][:, None])
            zc.append(wbar[e] * wh)
    bias = sum(wbar[e] * gat_params[e]["b"] for e in range(E))
    return jnp.concatenate(ael + aer + zc, axis=1), bias


# --------------------------------------------------------------------------- #
# Forward pass: single fused pallas_call, grid over the batch of graphs
# --------------------------------------------------------------------------- #
def encoder_chain_forward(x, adjs, params, num_heads, hidden_dim, out_dim):
    B, N, in_dim = x.shape
    E = adjs.shape[1]
    H, D = num_heads, out_dim

    w1, b1 = _fold_layer_fc(params["l1"], params["fc1_w"], params["fc1_b"], hidden_dim)
    w2, b2 = _fold_layer_fc(params["l2"], params["fc2_w"], params["fc2_b"], hidden_dim)
    wmh, bmh = _fold_layer_mh(params["lmh"], params["fcmh_w"], H, D)

    def weight_spec(a):
        nd = a.ndim
        return pl.BlockSpec(a.shape, lambda b: (0,) * nd)   # resident across the grid

    res_flat, h_res = pl.pallas_call(
        make_fused_kernel(N, E, hidden_dim, H, D),
        out_shape=(jax.ShapeDtypeStruct((B, N, H * D), jnp.float32),
                   jax.ShapeDtypeStruct((B, N, hidden_dim), jnp.float32)),
        grid=(B,),
        in_specs=[
            pl.BlockSpec((None, N, in_dim), lambda b: (b, 0, 0)),
            pl.BlockSpec((None, E, N, N), lambda b: (b, 0, 0, 0)),
            weight_spec(w1), weight_spec(b1),
            weight_spec(w2), weight_spec(b2),
            weight_spec(wmh), weight_spec(bmh),
        ],
        out_specs=(pl.BlockSpec((None, N, H * D), lambda b: (b, 0, 0)),
                   pl.BlockSpec((None, N, hidden_dim), lambda b: (b, 0, 0))),
        compiler_params=pltpu.CompilerParams(dimension_semantics=("parallel",)),
    )(x, adjs, w1, b1, w2, b2, wmh, bmh)

    return res_flat.reshape(B, N, H, D), h_res


# --------------------------------------------------------------------------- #
if __name__ == "__main__":
    B, N = 2, 32
    in_dim, hidden_dim, out_dim, num_heads, n_etypes = 16, 32, 3, 4, 2
    # (out_dim must be 3: norm_ hard-codes a (1, 3) zero row, as in the PyTorch module)

    key = jax.random.PRNGKey(0)
    kx, kadj, kp = jax.random.split(key, 3)

    x = jax.random.normal(kx, (B, N, in_dim), jnp.float32)
    # TODO(synk): DGL edge_type_subgraph / sparse message passing is represented
    #             here as dense per-edge-type adjacency masks adj[b, e, dst, src].
    adjs = jax.random.bernoulli(kadj, 0.3, (B, n_etypes, N, N)).astype(jnp.float32)

    params = init_params(kp, in_dim, hidden_dim, out_dim, num_heads, n_etypes)

    fwd = jax.jit(encoder_chain_forward, static_argnums=(3, 4, 5))
    res, h_res = fwd(x, adjs, params, num_heads, hidden_dim, out_dim)
    jax.block_until_ready((res, h_res))

    assert res.shape == (B, N, num_heads, out_dim), res.shape
    assert h_res.shape == (B, N, hidden_dim), h_res.shape
    assert bool(jnp.all(jnp.isfinite(res))) and bool(jnp.all(jnp.isfinite(h_res)))
    print("KERNEL_OK")
</pallas_src>

<mosaic_0001>
module attributes {stable_mosaic.version = 11 : i64} {
  func.func @kernel(%arg0: i32, %arg1: memref<1x32x16xf32, #tpu.memory_space<vmem>>, %arg2: memref<1x2x32x32xf32, #tpu.memory_space<vmem>>, %arg3: memref<16x68xf32, #tpu.memory_space<vmem>>, %arg4: memref<1x32xf32, #tpu.memory_space<vmem>>, %arg5: memref<32x68xf32, #tpu.memory_space<vmem>>, %arg6: memref<1x32xf32, #tpu.memory_space<vmem>>, %arg7: memref<32x40xf32, #tpu.memory_space<vmem>>, %arg8: memref<1x12xf32, #tpu.memory_space<vmem>>, %arg9: memref<1x32x12xf32, #tpu.memory_space<vmem>>, %arg10: memref<1x32x32xf32, #tpu.memory_space<vmem>>) attributes {dimension_semantics = [#tpu.dimension_semantics<parallel>], iteration_bounds = array<i64: 2>, scalar_prefetch = 0 : i64, scratch_operands = 0 : i64, tpu.core_type = #tpu.core_type<tc>, window_params = [{transform_indices = @transform_0, window_bounds = array<i64: 1, 32, 16>}, {transform_indices = @transform_1, window_bounds = array<i64: 1, 2, 32, 32>}, {pipeline_mode = #tpu.pipeline_mode<synchronous>, transform_indices = @transform_2, window_bounds = array<i64: 16, 68>}, {pipeline_mode = #tpu.pipeline_mode<synchronous>, transform_indices = @transform_3, window_bounds = array<i64: 1, 32>}, {pipeline_mode = #tpu.pipeline_mode<synchronous>, transform_indices = @transform_4, window_bounds = array<i64: 32, 68>}, {pipeline_mode = #tpu.pipeline_mode<synchronous>, transform_indices = @transform_5, window_bounds = array<i64: 1, 32>}, {pipeline_mode = #tpu.pipeline_mode<synchronous>, transform_indices = @transform_6, window_bounds = array<i64: 32, 40>}, {pipeline_mode = #tpu.pipeline_mode<synchronous>, transform_indices = @transform_7, window_bounds = array<i64: 1, 12>}, {transform_indices = @transform_8, window_bounds = array<i64: 1, 32, 12>}, {transform_indices = @transform_9, window_bounds = array<i64: 1, 32, 32>}]} {
    %0 = tpu.iota {dimensions = array<i32: 0>} : vector<32x32xi32>
    %1 = tpu.iota {dimensions = array<i32: 1>} : vector<32x32xi32>
    %c1_i32 = arith.constant 1 : i32
    %2 = vector.broadcast %c1_i32 : i32 to vector<32x32xi32>
    %3 = arith.subi %0, %2 : vector<32x32xi32>
    %4 = arith.cmpi eq, %1, %3 : vector<32x32xi32>
    %5 = arith.extui %4 : vector<32x32xi1> to vector<32x32xi32>
    %6 = arith.sitofp %5 : vector<32x32xi32> to vector<32x32xf32>
    %7 = arith.cmpi sle, %1, %0 : vector<32x32xi32>
    %8 = arith.extui %7 : vector<32x32xi1> to vector<32x32xi32>
    %9 = arith.sitofp %8 : vector<32x32xi32> to vector<32x32xf32>
    %c0 = arith.constant 0 : index
    %c0_0 = arith.constant 0 : index
    %c0_1 = arith.constant 0 : index
    %c0_2 = arith.constant 0 : index
    %10 = vector.load %arg2[%c0, %c0_0, %c0_1, %c0_2] : memref<1x2x32x32xf32, #tpu.memory_space<vmem>>, vector<1x1x32x32xf32>
    %11 = vector.shape_cast %10 : vector<1x1x32x32xf32> to vector<32x32xf32>
    %c0_3 = arith.constant 0 : index
    %c1 = arith.constant 1 : index
    %c0_4 = arith.constant 0 : index
    %c0_5 = arith.constant 0 : index
    %12 = vector.load %arg2[%c0_3, %c1, %c0_4, %c0_5] : memref<1x2x32x32xf32, #tpu.memory_space<vmem>>, vector<1x1x32x32xf32>
    %13 = vector.shape_cast %12 : vector<1x1x32x32xf32> to vector<32x32xf32>
    %14 = tpu.concatenate %11, %13 in 0 : vector<32x32xf32>, vector<32x32xf32> -> vector<64x32xf32>
    %cst = arith.constant 1.000000e+00 : f32
    %15 = vector.broadcast %cst : f32 to vector<64x32xf32>
    %16 = arith.subf %14, %15 : vector<64x32xf32>
    %cst_6 = arith.constant 1.000000e+30 : f32
    %17 = vector.broadcast %cst_6 : f32 to vector<64x32xf32>
    %18 = arith.mulf %16, %17 : vector<64x32xf32>
    %19 = tpu.concatenate %14, %14, %14, %14 in 0 : vector<64x32xf32>, vector<64x32xf32>, vector<64x32xf32>, vector<64x32xf32> -> vector<256x32xf32>
    %cst_7 = arith.constant 1.000000e+00 : f32
    %20 = vector.broadcast %cst_7 : f32 to vector<256x32xf32>
    %21 = arith.subf %19, %20 : vector<256x32xf32>
    %cst_8 = arith.constant 1.000000e+30 : f32
    %22 = vector.broadcast %cst_8 : f32 to vector<256x32xf32>
    %23 = arith.mulf %21, %22 : vector<256x32xf32>
    %c0_9 = arith.constant 0 : index
    %c0_10 = arith.constant 0 : index
    %c0_11 = arith.constant 0 : index
    %24 = vector.load %arg1[%c0_9, %c0_10, %c0_11] : memref<1x32x16xf32, #tpu.memory_space<vmem>>, vector<1x32x16xf32>
    %25 = vector.shape_cast %24 : vector<1x32x16xf32> to vector<32x16xf32>
    %c0_12 = arith.constant 0 : index
    %c0_13 = arith.constant 0 : index
    %26 = vector.load %arg3[%c0_12, %c0_13] : memref<16x68xf32, #tpu.memory_space<vmem>>, vector<16x68xf32>
    %cst_14 = arith.constant dense<0.000000e+00> : vector<32x68xf32>
    %27 = tpu.matmul %25, %26, %cst_14 {dimension_numbers = #tpu.dot_dimension_numbers<[1], [0], [0], [1], [0, 0, 1, 1], [], []>} : vector<32x16xf32>, vector<16x68xf32>, vector<32x68xf32> -> vector<32x68xf32>
    %28 = vector.extract_strided_slice %27 {offsets = [0, 0], sizes = [32, 32], strides = [1, 1]} : vector<32x68xf32> to vector<32x32xf32>
    %29 = tpu.transpose %28, [1, 0] : vector<32x32xf32> -> vector<32x32xf32>
    %30 = vector.extract_strided_slice %27 {offsets = [0, 2], sizes = [32, 1], strides = [1, 1]} : vector<32x68xf32> to vector<32x1xf32>
    %31 = vector.extract_strided_slice %29 {offsets = [0, 0], sizes = [1, 32], strides = [1, 1]} : vector<32x32xf32> to vector<1x32xf32>
    %32 = vector.broadcast %30 : vector<32x1xf32> to vector<32x32xf32>
    %33 = vector.broadcast %31 : vector<1x32xf32> to vector<32x32xf32>
    %34 = arith.addf %32, %33 : vector<32x32xf32>
    %35 = vector.extract_strided_slice %27 {offsets = [0, 3], sizes = [32, 1], strides = [1, 1]} : vector<32x68xf32> to vector<32x1xf32>
    %36 = vector.extract_strided_slice %29 {offsets = [1, 0], sizes = [1, 32], strides = [1, 1]} : vector<32x32xf32> to vector<1x32xf32>
    %37 = vector.broadcast %35 : vector<32x1xf32> to vector<32x32xf32>
    %38 = vector.broadcast %36 : vector<1x32xf32> to vector<32x32xf32>
    %39 = arith.addf %37, %38 : vector<32x32xf32>
    %40 = tpu.concatenate %34, %39 in 0 : vector<32x32xf32>, vector<32x32xf32> -> vector<64x32xf32>
    %cst_15 = arith.constant 0.000000e+00 : f32
    %41 = vector.broadcast %cst_15 : f32 to vector<64x32xf32>
    %42 = arith.cmpf oge, %40, %41 : vector<64x32xf32>
    %cst_16 = arith.constant 2.000000e-01 : f32
    %43 = vector.broadcast %cst_16 : f32 to vector<64x32xf32>
    %44 = arith.mulf %43, %40 : vector<64x32xf32>
    %45 = arith.select %42, %40, %44 : vector<64x32xi1>, vector<64x32xf32>
    %46 = arith.addf %45, %18 : vector<64x32xf32>
    %cst_17 = arith.constant dense<0xFF800000> : vector<64xf32>
    %47 = vector.multi_reduction <maximumf>, %46, %cst_17 [1] : vector<64x32xf32> to vector<64xf32>
    %48 = vector.shape_cast %47 : vector<64xf32> to vector<64x1xf32>
    %49 = vector.broadcast %48 : vector<64x1xf32> to vector<64x32xf32>
    %50 = arith.subf %46, %49 : vector<64x32xf32>
    %51 = math.exp %50 : vector<64x32xf32>
    %52 = arith.mulf %51, %14 : vector<64x32xf32>
    %cst_18 = arith.constant dense<0.000000e+00> : vector<64xf32>
    %53 = vector.multi_reduction <add>, %52, %cst_18 [1] : vector<64x32xf32> to vector<64xf32>
    %54 = vector.shape_cast %53 : vector<64xf32> to vector<64x1xf32>
    %cst_19 = arith.constant 1.000000e-30 : f32
    %55 = vector.broadcast %cst_19 : f32 to vector<64x1xf32>
    %56 = arith.maximumf %54, %55 : vector<64x1xf32>
    %57 = tpu.reciprocal %56 {approx = true} : vector<64x1xf32> -> vector<64x1xf32>
    %58 = vector.broadcast %57 : vector<64x1xf32> to vector<64x32xf32>
    %59 = arith.mulf %52, %58 : vector<64x32xf32>
    %60 = vector.extract_strided_slice %27 {offsets = [0, 4], sizes = [32, 32], strides = [1, 1]} : vector<32x68xf32> to vector<32x32xf32>
    %61 = vector.extract_strided_slice %27 {offsets = [0, 36], sizes = [32, 32], strides = [1, 1]} : vector<32x68xf32> to vector<32x32xf32>
    %62 = tpu.concatenate %60, %61 in 0 : vector<32x32xf32>, vector<32x32xf32> -> vector<64x32xf32>
    %63 = vector.extract_strided_slice %59 {offsets = [0, 0], sizes = [32, 32], strides = [1, 1]} : vector<64x32xf32> to vector<32x32xf32>
    %64 = vector.extract_strided_slice %59 {offsets = [32, 0], sizes = [32, 32], strides = [1, 1]} : vector<64x32xf32> to vector<32x32xf32>
    %65 = tpu.concatenate %63, %64 in 1 : vector<32x32xf32>, vector<32x32xf32> -> vector<32x64xf32>
    %cst_20 = arith.constant dense<0.000000e+00> : vector<32x32xf32>
    %66 = tpu.matmul %65, %62, %cst_20 {dimension_numbers = #tpu.dot_dimension_numbers<[1], [0], [0], [1], [0, 0, 1, 1], [], []>} : vector<32x64xf32>, vector<64x32xf32>, vector<32x32xf32> -> vector<32x32xf32>
    %c0_21 = arith.constant 0 : index
    %c0_22 = arith.constant 0 : index
    %67 = vector.load %arg4[%c0_21, %c0_22] : memref<1x32xf32, #tpu.memory_space<vmem>>, vector<1x32xf32>
    %68 = vector.broadcast %67 : vector<1x32xf32> to vector<32x32xf32>
    %69 = arith.addf %66, %68 : vector<32x32xf32>
    %c0_23 = arith.constant 0 : index
    %c0_24 = arith.constant 0 : index
    %70 = vector.load %arg5[%c0_23, %c0_24] : memref<32x68xf32, #tpu.memory_space<vmem>>, vector<32x68xf32>
    %cst_25 = arith.constant dense<0.000000e+00> : vector<32x68xf32>
    %71 = tpu.matmul %69, %70, %cst_25 {dimension_numbers = #tpu.dot_dimension_numbers<[1], [0], [0], [1], [0, 0, 1, 1], [], []>} : vector<32x32xf32>, vector<32x68xf32>, vector<32x68xf32> -> vector<32x68xf32>
    %72 = vector.extract_strided_slice %71 {offsets = [0, 0], sizes = [32, 32], strides = [1, 1]} : vector<32x68xf32> to vector<32x32xf32>
    %73 = tpu.transpose %72, [1, 0] : vector<32x32xf32> -> vector<32x32xf32>
    %74 = vector.extract_strided_slice %71 {offsets = [0, 2], sizes = [32, 1], strides = [1, 1]} : vector<32x68xf32> to vector<32x1xf32>
    %75 = vector.extract_strided_slice %73 {offsets = [0, 0], sizes = [1, 32], strides = [1, 1]} : vector<32x32xf32> to vector<1x32xf32>
    %76 = vector.broadcast %74 : vector<32x1xf32> to vector<32x32xf32>
    %77 = vector.broadcast %75 : vector<1x32xf32> to vector<32x32xf32>
    %78 = arith.addf %76, %77 : vector<32x32xf32>
    %79 = vector.extract_strided_slice %71 {offsets = [0, 3], sizes = [32, 1], strides = [1, 1]} : vector<32x68xf32> to vector<32x1xf32>
    %80 = vector.extract_strided_slice %73 {offsets = [1, 0], sizes = [1, 32], strides = [1, 1]} : vector<32x32xf32> to vector<1x32xf32>
    %81 = vector.broadcast %79 : vector<32x1xf32> to vector<32x32xf32>
    %82 = vector.broadcast %80 : vector<1x32xf32> to vector<32x32xf32>
    %83 = arith.addf %81, %82 : vector<32x32xf32>
    %84 = tpu.concatenate %78, %83 in 0 : vector<32x32xf32>, vector<32x32xf32> -> vector<64x32xf32>
    %cst_26 = arith.constant 0.000000e+00 : f32
    %85 = vector.broadcast %cst_26 : f32 to vector<64x32xf32>
    %86 = arith.cmpf oge, %84, %85 : vector<64x32xf32>
    %cst_27 = arith.constant 2.000000e-01 : f32
    %87 = vector.broadcast %cst_27 : f32 to vector<64x32xf32>
    %88 = arith.mulf %87, %84 : vector<64x32xf32>
    %89 = arith.select %86, %84, %88 : vector<64x32xi1>, vector<64x32xf32>
    %90 = arith.addf %89, %18 : vector<64x32xf32>
    %cst_28 = arith.constant dense<0xFF800000> : vector<64xf32>
    %91 = vector.multi_reduction <maximumf>, %90, %cst_28 [1] : vector<64x32xf32> to vector<64xf32>
    %92 = vector.shape_cast %91 : vector<64xf32> to vector<64x1xf32>
    %93 = vector.broadcast %92 : vector<64x1xf32> to vector<64x32xf32>
    %94 = arith.subf %90, %93 : vector<64x32xf32>
    %95 = math.exp %94 : vector<64x32xf32>
    %96 = arith.mulf %95, %14 : vector<64x32xf32>
    %cst_29 = arith.constant dense<0.000000e+00> : vector<64xf32>
    %97 = vector.multi_reduction <add>, %96, %cst_29 [1] : vector<64x32xf32> to vector<64xf32>
    %98 = vector.shape_cast %97 : vector<64xf32> to vector<64x1xf32>
    %cst_30 = arith.constant 1.000000e-30 : f32
    %99 = vector.broadcast %cst_30 : f32 to vector<64x1xf32>
    %100 = arith.maximumf %98, %99 : vector<64x1xf32>
    %101 = tpu.reciprocal %100 {approx = true} : vector<64x1xf32> -> vector<64x1xf32>
    %102 = vector.broadcast %101 : vector<64x1xf32> to vector<64x32xf32>
    %103 = arith.mulf %96, %102 : vector<64x32xf32>
    %104 = vector.extract_strided_slice %71 {offsets = [0, 4], sizes = [32, 32], strides = [1, 1]} : vector<32x68xf32> to vector<32x32xf32>
    %105 = vector.extract_strided_slice %71 {offsets = [0, 36], sizes = [32, 32], strides = [1, 1]} : vector<32x68xf32> to vector<32x32xf32>
    %106 = tpu.concatenate %104, %105 in 0 : vector<32x32xf32>, vector<32x32xf32> -> vector<64x32xf32>
    %107 = vector.extract_strided_slice %103 {offsets = [0, 0], sizes = [32, 32], strides = [1, 1]} : vector<64x32xf32> to vector<32x32xf32>
    %108 = vector.extract_strided_slice %103 {offsets = [32, 0], sizes = [32, 32], strides = [1, 1]} : vector<64x32xf32> to vector<32x32xf32>
    %109 = tpu.concatenate %107, %108 in 1 : vector<32x32xf32>, vector<32x32xf32> -> vector<32x64xf32>
    %cst_31 = arith.constant dense<0.000000e+00> : vector<32x32xf32>
    %110 = tpu.matmul %109, %106, %cst_31 {dimension_numbers = #tpu.dot_dimension_numbers<[1], [0], [0], [1], [0, 0, 1, 1], [], []>} : vector<32x64xf32>, vector<64x32xf32>, vector<32x32xf32> -> vector<32x32xf32>
    %c0_32 = arith.constant 0 : index
    %c0_33 = arith.constant 0 : index
    %111 = vector.load %arg6[%c0_32, %c0_33] : memref<1x32xf32, #tpu.memory_space<vmem>>, vector<1x32xf32>
    %112 = vector.broadcast %111 : vector<1x32xf32> to vector<32x32xf32>
    %113 = arith.addf %110, %112 : vector<32x32xf32>
    %c0_34 = arith.constant 0 : index
    %c0_35 = arith.constant 0 : index
    %c0_36 = arith.constant 0 : index
    %114 = vector.load %arg10[%c0_34, %c0_35, %c0_36] : memref<1x32x32xf32, #tpu.memory_space<vmem>>, vector<1x32x32xf32>
    %115 = vector.shape_cast %114 : vector<1x32x32xf32> to vector<32x32xf32>
    %116 = vector.shape_cast %113 : vector<32x32xf32> to vector<1x32x32xf32>
    tpu.vector_store %arg10[%c0_34, %c0_35, %c0_36], %116 {strides = array<i32>} : memref<1x32x32xf32, #tpu.memory_space<vmem>>, vector<1x32x32xf32>,
    %c0_37 = arith.constant 0 : index
    %c0_38 = arith.constant 0 : index
    %117 = vector.load %arg7[%c0_37, %c0_38] : memref<32x40xf32, #tpu.memory_space<vmem>>, vector<32x40xf32>
    %cst_39 = arith.constant dense<0.000000e+00> : vector<32x40xf32>
    %118 = tpu.matmul %113, %117, %cst_39 {dimension_numbers = #tpu.dot_dimension_numbers<[1], [0], [0], [1], [0, 0, 1, 1], [], []>} : vector<32x32xf32>, vector<32x40xf32>, vector<32x40xf32> -> vector<32x40xf32>
    %119 = vector.extract_strided_slice %118 {offsets = [0, 0], sizes = [32, 32], strides = [1, 1]} : vector<32x40xf32> to vector<32x32xf32>
    %120 = tpu.transpose %119, [1, 0] : vector<32x32xf32> -> vector<32x32xf32>
    %121 = vector.extract_strided_slice %118 {offsets = [0, 8], sizes = [32, 1], strides = [1, 1]} : vector<32x40xf32> to vector<32x1xf32>
    %122 = vector.extract_strided_slice %120 {offsets = [0, 0], sizes = [1, 32], strides = [1, 1]} : vector<32x32xf32> to vector<1x32xf32>
    %123 = vector.broadcast %121 : vector<32x1xf32> to vector<32x32xf32>
    %124 = vector.broadcast %122 : vector<1x32xf32> to vector<32x32xf32>
    %125 = arith.addf %123, %124 : vector<32x32xf32>
    %126 = vector.extract_strided_slice %118 {offsets = [0, 9], sizes = [32, 1], strides = [1, 1]} : vector<32x40xf32> to vector<32x1xf32>
    %127 = vector.extract_strided_slice %120 {offsets = [1, 0], sizes = [1, 32], strides = [1, 1]} : vector<32x32xf32> to vector<1x32xf32>
    %128 = vector.broadcast %126 : vector<32x1xf32> to vector<32x32xf32>
    %129 = vector.broadcast %127 : vector<1x32xf32> to vector<32x32xf32>
    %130 = arith.addf %128, %129 : vector<32x32xf32>
    %131 = vector.extract_strided_slice %118 {offsets = [0, 10], sizes = [32, 1], strides = [1, 1]} : vector<32x40xf32> to vector<32x1xf32>
    %132 = vector.extract_strided_slice %120 {offsets = [2, 0], sizes = [1, 32], strides = [1, 1]} : vector<32x32xf32> to vector<1x32xf32>
    %133 = vector.broadcast %131 : vector<32x1xf32> to vector<32x32xf32>
    %134 = vector.broadcast %132 : vector<1x32xf32> to vector<32x32xf32>
    %135 = arith.addf %133, %134 : vector<32x32xf32>
    %136 = vector.extract_strided_slice %118 {offsets = [0, 11], sizes = [32, 1], strides = [1, 1]} : vector<32x40xf32> to vector<32x1xf32>
    %137 = vector.extract_strided_slice %120 {offsets = [3, 0], sizes = [1, 32], strides = [1, 1]} : vector<32x32xf32> to vector<1x32xf32>
    %138 = vector.broadcast %136 : vector<32x1xf32> to vector<32x32xf32>
    %139 = vector.broadcast %137 : vector<1x32xf32> to vector<32x32xf32>
    %140 = arith.addf %138, %139 : vector<32x32xf32>
    %141 = vector.extract_strided_slice %118 {offsets = [0, 12], sizes = [32, 1], strides = [1, 1]} : vector<32x40xf32> to vector<32x1xf32>
    %142 = vector.extract_strided_slice %120 {offsets = [4, 0], sizes = [1, 32], strides = [1, 1]} : vector<32x32xf32> to vector<1x32xf32>
    %143 = vector.broadcast %141 : vector<32x1xf32> to vector<32x32xf32>
    %144 = vector.broadcast %142 : vector<1x32xf32> to vector<32x32xf32>
    %145 = arith.addf %143, %144 : vector<32x32xf32>
    %146 = vector.extract_strided_slice %118 {offsets = [0, 13], sizes = [32, 1], strides = [1, 1]} : vector<32x40xf32> to vector<32x1xf32>
    %147 = vector.extract_strided_slice %120 {offsets = [5, 0], sizes = [1, 32], strides = [1, 1]} : vector<32x32xf32> to vector<1x32xf32>
    %148 = vector.broadcast %146 : vector<32x1xf32> to vector<32x32xf32>
    %149 = vector.broadcast %147 : vector<1x32xf32> to vector<32x32xf32>
    %150 = arith.addf %148, %149 : vector<32x32xf32>
    %151 = vector.extract_strided_slice %118 {offsets = [0, 14], sizes = [32, 1], strides = [1, 1]} : vector<32x40xf32> to vector<32x1xf32>
    %152 = vector.extract_strided_slice %120 {offsets = [6, 0], sizes = [1, 32], strides = [1, 1]} : vector<32x32xf32> to vector<1x32xf32>
    %153 = vector.broadcast %151 : vector<32x1xf32> to vector<32x32xf32>
    %154 = vector.broadcast %152 : vector<1x32xf32> to vector<32x32xf32>
    %155 = arith.addf %153, %154 : vector<32x32xf32>
    %156 = vector.extract_strided_slice %118 {offsets = [0, 15], sizes = [32, 1], strides = [1, 1]} : vector<32x40xf32> to vector<32x1xf32>
    %157 = vector.extract_strided_slice %120 {offsets = [7, 0], sizes = [1, 32], strides = [1, 1]} : vector<32x32xf32> to vector<1x32xf32>
    %158 = vector.broadcast %156 : vector<32x1xf32> to vector<32x32xf32>
    %159 = vector.broadcast %157 : vector<1x32xf32> to vector<32x32xf32>
    %160 = arith.addf %158, %159 : vector<32x32xf32>
    %161 = tpu.concatenate %125, %130, %135, %140, %145, %150, %155, %160 in 0 : vector<32x32xf32>, vector<32x32xf32>, vector<32x32xf32>, vector<32x32xf32>, vector<32x32xf32>, vector<32x32xf32>, vector<32x32xf32>, vector<32x32xf32> -> vector<256x32xf32>
    %cst_40 = arith.constant 0.000000e+00 : f32
    %162 = vector.broadcast %cst_40 : f32 to vector<256x32xf32>
    %163 = arith.cmpf oge, %161, %162 : vector<256x32xf32>
    %cst_41 = arith.constant 2.000000e-01 : f32
    %164 = vector.broadcast %cst_41 : f32 to vector<256x32xf32>
    %165 = arith.mulf %164, %161 : vector<256x32xf32>
    %166 = arith.select %163, %161, %165 : vector<256x32xi1>, vector<256x32xf32>
    %167 = arith.addf %166, %23 : vector<256x32xf32>
    %cst_42 = arith.constant dense<0xFF800000> : vector<256xf32>
    %168 = vector.multi_reduction <maximumf>, %167, %cst_42 [1] : vector<256x32xf32> to vector<256xf32>
    %169 = vector.shape_cast %168 : vector<256xf32> to vector<256x1xf32>
    %170 = vector.broadcast %169 : vector<256x1xf32> to vector<256x32xf32>
    %171 = arith.subf %167, %170 : vector<256x32xf32>
    %172 = math.exp %171 : vector<256x32xf32>
    %173 = arith.mulf %172, %19 : vector<256x32xf32>
    %cst_43 = arith.constant dense<0.000000e+00> : vector<256xf32>
    %174 = vector.multi_reduction <add>, %173, %cst_43 [1] : vector<256x32xf32> to vector<256xf32>
    %175 = vector.shape_cast %174 : vector<256xf32> to vector<256x1xf32>
    %cst_44 = arith.constant 1.000000e-30 : f32
    %176 = vector.broadcast %cst_44 : f32 to vector<256x1xf32>
    %177 = arith.maximumf %175, %176 : vector<256x1xf32>
    %178 = tpu.reciprocal %177 {approx = true} : vector<256x1xf32> -> vector<256x1xf32>
    %179 = vector.broadcast %178 : vector<256x1xf32> to vector<256x32xf32>
    %180 = arith.mulf %173, %179 : vector<256x32xf32>
    %181 = vector.extract_strided_slice %118 {offsets = [0, 16], sizes = [32, 3], strides = [1, 1]} : vector<32x40xf32> to vector<32x3xf32>
    %182 = vector.extract_strided_slice %118 {offsets = [0, 19], sizes = [32, 3], strides = [1, 1]} : vector<32x40xf32> to vector<32x3xf32>
    %183 = tpu.concatenate %181, %182 in 0 : vector<32x3xf32>, vector<32x3xf32> -> vector<64x3xf32>
    %184 = vector.extract_strided_slice %180 {offsets = [0, 0], sizes = [32, 32], strides = [1, 1]} : vector<256x32xf32> to vector<32x32xf32>
    %185 = vector.extract_strided_slice %180 {offsets = [32, 0], sizes = [32, 32], strides = [1, 1]} : vector<256x32xf32> to vector<32x32xf32>
    %186 = tpu.concatenate %184, %185 in 1 : vector<32x32xf32>, vector<32x32xf32> -> vector<32x64xf32>
    %cst_45 = arith.constant dense<0.000000e+00> : vector<32x3xf32>
    %187 = tpu.matmul %186, %183, %cst_45 {dimension_numbers = #tpu.dot_dimension_numbers<[1], [0], [0], [1], [0, 0, 1, 1], [], []>} : vector<32x64xf32>, vector<64x3xf32>, vector<32x3xf32> -> vector<32x3xf32>
    %188 = vector.extract_strided_slice %118 {offsets = [0, 22], sizes = [32, 3], strides = [1, 1]} : vector<32x40xf32> to vector<32x3xf32>
    %189 = vector.extract_strided_slice %118 {offsets = [0, 25], sizes = [32, 3], strides = [1, 1]} : vector<32x40xf32> to vector<32x3xf32>
    %190 = tpu.concatenate %188, %189 in 0 : vector<32x3xf32>, vector<32x3xf32> -> vector<64x3xf32>
    %191 = vector.extract_strided_slice %180 {offsets = [64, 0], sizes = [32, 32], strides = [1, 1]} : vector<256x32xf32> to vector<32x32xf32>
    %192 = vector.extract_strided_slice %180 {offsets = [96, 0], sizes = [32, 32], strides = [1, 1]} : vector<256x32xf32> to vector<32x32xf32>
    %193 = tpu.concatenate %191, %192 in 1 : vector<32x32xf32>, vector<32x32xf32> -> vector<32x64xf32>
    %cst_46 = arith.constant dense<0.000000e+00> : vector<32x3xf32>
    %194 = tpu.matmul %193, %190, %cst_46 {dimension_numbers = #tpu.dot_dimension_numbers<[1], [0], [0], [1], [0, 0, 1, 1], [], []>} : vector<32x64xf32>, vector<64x3xf32>, vector<32x3xf32> -> vector<32x3xf32>
    %195 = vector.extract_strided_slice %118 {offsets = [0, 28], sizes = [32, 3], strides = [1, 1]} : vector<32x40xf32> to vector<32x3xf32>
    %196 = vector.extract_strided_slice %118 {offsets = [0, 31], sizes = [32, 3], strides = [1, 1]} : vector<32x40xf32> to vector<32x3xf32>
    %197 = tpu.concatenate %195, %196 in 0 : vector<32x3xf32>, vector<32x3xf32> -> vector<64x3xf32>
    %198 = vector.extract_strided_slice %180 {offsets = [128, 0], sizes = [32, 32], strides = [1, 1]} : vector<256x32xf32> to vector<32x32xf32>
    %199 = vector.extract_strided_slice %180 {offsets = [160, 0], sizes = [32, 32], strides = [1, 1]} : vector<256x32xf32> to vector<32x32xf32>
    %200 = tpu.concatenate %198, %199 in 1 : vector<32x32xf32>, vector<32x32xf32> -> vector<32x64xf32>
    %cst_47 = arith.constant dense<0.000000e+00> : vector<32x3xf32>
    %201 = tpu.matmul %200, %197, %cst_47 {dimension_numbers = #tpu.dot_dimension_numbers<[1], [0], [0], [1], [0, 0, 1, 1], [], []>} : vector<32x64xf32>, vector<64x3xf32>, vector<32x3xf32> -> vector<32x3xf32>
    %202 = vector.extract_strided_slice %118 {offsets = [0, 34], sizes = [32, 3], strides = [1, 1]} : vector<32x40xf32> to vector<32x3xf32>
    %203 = vector.extract_strided_slice %118 {offsets = [0, 37], sizes = [32, 3], strides = [1, 1]} : vector<32x40xf32> to vector<32x3xf32>
    %204 = tpu.concatenate %202, %203 in 0 : vector<32x3xf32>, vector<32x3xf32> -> vector<64x3xf32>
    %205 = vector.extract_strided_slice %180 {offsets = [192, 0], sizes = [32, 32], strides = [1, 1]} : vector<256x32xf32> to vector<32x32xf32>
    %206 = vector.extract_strided_slice %180 {offsets = [224, 0], sizes = [32, 32], strides = [1, 1]} : vector<256x32xf32> to vector<32x32xf32>
    %207 = tpu.concatenate %205, %206 in 1 : vector<32x32xf32>, vector<32x32xf32> -> vector<32x64xf32>
    %cst_48 = arith.constant dense<0.000000e+00> : vector<32x3xf32>
    %208 = tpu.matmul %207, %204, %cst_48 {dimension_numbers = #tpu.dot_dimension_numbers<[1], [0], [0], [1], [0, 0, 1, 1], [], []>} : vector<32x64xf32>, vector<64x3xf32>, vector<32x3xf32> -> vector<32x3xf32>
    %209 = tpu.concatenate %187, %194, %201, %208 in 1 : vector<32x3xf32>, vector<32x3xf32>, vector<32x3xf32>, vector<32x3xf32> -> vector<32x12xf32>
    %c0_49 = arith.constant 0 : index
    %c0_50 = arith.constant 0 : index
    %210 = vector.load %arg8[%c0_49, %c0_50] : memref<1x12xf32, #tpu.memory_space<vmem>>, vector<1x12xf32>
    %211 = vector.broadcast %210 : vector<1x12xf32> to vector<32x12xf32>
    %212 = arith.addf %209, %211 : vector<32x12xf32>
    %cst_51 = arith.constant dense<0.000000e+00> : vector<32x12xf32>
    %213 = tpu.matmul %6, %212, %cst_51 {dimension_numbers = #tpu.dot_dimension_numbers<[1], [0], [0], [1], [0, 0, 1, 1], [], []>} : vector<32x32xf32>, vector<32x12xf32>, vector<32x12xf32> -> vector<32x12xf32>
    %214 = arith.subf %212, %213 : vector<32x12xf32>
    %215 = arith.cmpf one, %214, %214 : vector<32x12xf32>
    %cst_52 = arith.constant 0.000000e+00 : f32
    %216 = vector.broadcast %cst_52 : f32 to vector<32x12xf32>
    %217 = arith.select %215, %216, %214 : vector<32x12xi1>, vector<32x12xf32>
    %218 = arith.mulf %217, %217 : vector<32x12xf32>
    %219 = tpu.iota {dimensions = array<i32: 0>} : vector<12x32xi32>
    %220 = tpu.iota {dimensions = array<i32: 1>} : vector<12x32xi32>
    %c3_i32 = arith.constant 3 : i32
    %221 = vector.broadcast %c3_i32 : i32 to vector<12x32xi32>
    %222 = arith.muli %220, %221 : vector<12x32xi32>
    %223 = arith.cmpi sge, %219, %222 : vector<12x32xi32>
    %c1_i32_53 = arith.constant 1 : i32
    %224 = vector.broadcast %c1_i32_53 : i32 to vector<12x32xi32>
    %225 = arith.addi %220, %224 : vector<12x32xi32>
    %c3_i32_54 = arith.constant 3 : i32
    %226 = vector.broadcast %c3_i32_54 : i32 to vector<12x32xi32>
    %227 = arith.muli %225, %226 : vector<12x32xi32>
    %228 = arith.cmpi slt, %219, %227 : vector<12x32xi32>
    %229 = arith.andi %223, %228 : vector<12x32xi1>
    %230 = arith.extui %229 : vector<12x32xi1> to vector<12x32xi32>
    %231 = arith.sitofp %230 : vector<12x32xi32> to vector<12x32xf32>
    %cst_55 = arith.constant dense<0.000000e+00> : vector<32x32xf32>
    %232 = tpu.matmul %218, %231, %cst_55 {dimension_numbers = #tpu.dot_dimension_numbers<[1], [0], [0], [1], [0, 0, 1, 1], [], []>} : vector<32x12xf32>, vector<12x32xf32>, vector<32x32xf32> -> vector<32x32xf32>
    %233 = math.sqrt %232 : vector<32x32xf32>
    %234 = tpu.transpose %233, [1, 0] : vector<32x32xf32> -> vector<32x32xf32>
    %235 = vector.extract_strided_slice %233 {offsets = [0, 0], sizes = [32, 1], strides = [1, 1]} : vector<32x32xf32> to vector<32x1xf32>
    %236 = vector.extract_strided_slice %234 {offsets = [0, 0], sizes = [1, 32], strides = [1, 1]} : vector<32x32xf32> to vector<1x32xf32>
    %237 = vector.broadcast %236 : vector<1x32xf32> to vector<32x32xf32>
    %238 = vector.broadcast %235 : vector<32x1xf32> to vector<32x32xf32>
    %239 = arith.cmpf olt, %237, %238 : vector<32x32xf32>
    %240 = arith.extui %239 : vector<32x32xi1> to vector<32x32xi32>
    %241 = arith.sitofp %240 : vector<32x32xi32> to vector<32x32xf32>
    %242 = vector.broadcast %236 : vector<1x32xf32> to vector<32x32xf32>
    %243 = vector.broadcast %235 : vector<32x1xf32> to vector<32x32xf32>
    %244 = arith.cmpf oeq, %242, %243 : vector<32x32xf32>
    %245 = arith.extui %244 : vector<32x32xi1> to vector<32x32xi32>
    %246 = arith.sitofp %245 : vector<32x32xi32> to vector<32x32xf32>
    %cst_56 = arith.constant dense<0.000000e+00> : vector<32xf32>
    %247 = vector.multi_reduction <add>, %241, %cst_56 [1] : vector<32x32xf32> to vector<32xf32>
    %248 = vector.shape_cast %247 : vector<32xf32> to vector<32x1xf32>
    %cst_57 = arith.constant dense<0.000000e+00> : vector<32xf32>
    %249 = vector.multi_reduction <add>, %246, %cst_57 [1] : vector<32x32xf32> to vector<32xf32>
    %250 = vector.shape_cast %249 : vector<32xf32> to vector<32x1xf32>
    %cst_58 = arith.constant 1.500000e+01 : f32
    %251 = vector.broadcast %cst_58 : f32 to vector<32x1xf32>
    %252 = arith.cmpf ole, %248, %251 : vector<32x1xf32>
    %253 = arith.addf %248, %250 : vector<32x1xf32>
    %cst_59 = arith.constant 1.500000e+01 : f32
    %254 = vector.broadcast %cst_59 : f32 to vector<32x1xf32>
    %255 = arith.cmpf ogt, %253, %254 : vector<32x1xf32>
    %256 = arith.andi %252, %255 : vector<32x1xi1>
    %257 = arith.extui %256 : vector<32x1xi1> to vector<32x1xi32>
    %258 = arith.sitofp %257 : vector<32x1xi32> to vector<32x1xf32>
    %259 = arith.mulf %235, %258 : vector<32x1xf32>
    %cst_60 = arith.constant dense<0.000000e+00> : vector<1xf32>
    %260 = vector.multi_reduction <add>, %259, %cst_60 [0] : vector<32x1xf32> to vector<1xf32>
    %261 = vector.shape_cast %260 : vector<1xf32> to vector<1x1xf32>
    %cst_61 = arith.constant dense<0.000000e+00> : vector<1xf32>
    %262 = vector.multi_reduction <add>, %258, %cst_61 [0] : vector<32x1xf32> to vector<1xf32>
    %263 = vector.shape_cast %262 : vector<1xf32> to vector<1x1xf32>
    %264 = arith.divf %261, %263 : vector<1x1xf32>
    %cst_62 = arith.constant 9.99999974E-5 : f32
    %265 = vector.broadcast %cst_62 : f32 to vector<1x1xf32>
    %266 = arith.addf %264, %265 : vector<1x1xf32>
    %267 = tpu.reciprocal %266 {approx = true} : vector<1x1xf32> -> vector<1x1xf32>
    %268 = vector.shape_cast %267 : vector<1x1xf32> to vector<1x1xf32>
    %269 = vector.broadcast %268 : vector<1x1xf32> to vector<1x3xf32>
    %270 = vector.extract_strided_slice %233 {offsets = [0, 1], sizes = [32, 1], strides = [1, 1]} : vector<32x32xf32> to vector<32x1xf32>
    %271 = vector.extract_strided_slice %234 {offsets = [1, 0], sizes = [1, 32], strides = [1, 1]} : vector<32x32xf32> to vector<1x32xf32>
    %272 = vector.broadcast %271 : vector<1x32xf32> to vector<32x32xf32>
    %273 = vector.broadcast %270 : vector<32x1xf32> to vector<32x32xf32>
    %274 = arith.cmpf olt, %272, %273 : vector<32x32xf32>
    %275 = arith.extui %274 : vector<32x32xi1> to vector<32x32xi32>
    %276 = arith.sitofp %275 : vector<32x32xi32> to vector<32x32xf32>
    %277 = vector.broadcast %271 : vector<1x32xf32> to vector<32x32xf32>
    %278 = vector.broadcast %270 : vector<32x1xf32> to vector<32x32xf32>
    %279 = arith.cmpf oeq, %277, %278 : vector<32x32xf32>
    %280 = arith.extui %279 : vector<32x32xi1> to vector<32x32xi32>
    %281 = arith.sitofp %280 : vector<32x32xi32> to vector<32x32xf32>
    %cst_63 = arith.constant dense<0.000000e+00> : vector<32xf32>
    %282 = vector.multi_reduction <add>, %276, %cst_63 [1] : vector<32x32xf32> to vector<32xf32>
    %283 = vector.shape_cast %282 : vector<32xf32> to vector<32x1xf32>
    %cst_64 = arith.constant dense<0.000000e+00> : vector<32xf32>
    %284 = vector.multi_reduction <add>, %281, %cst_64 [1] : vector<32x32xf32> to vector<32xf32>
    %285 = vector.shape_cast %284 : vector<32xf32> to vector<32x1xf32>
    %cst_65 = arith.constant 1.500000e+01 : f32
    %286 = vector.broadcast %cst_65 : f32 to vector<32x1xf32>
    %287 = arith.cmpf ole, %283, %286 : vector<32x1xf32>
    %288 = arith.addf %283, %285 : vector<32x1xf32>
    %cst_66 = arith.constant 1.500000e+01 : f32
    %289 = vector.broadcast %cst_66 : f32 to vector<32x1xf32>
    %290 = arith.cmpf ogt, %288, %289 : vector<32x1xf32>
    %291 = arith.andi %287, %290 : vector<32x1xi1>
    %292 = arith.extui %291 : vector<32x1xi1> to vector<32x1xi32>
    %293 = arith.sitofp %292 : vector<32x1xi32> to vector<32x1xf32>
    %294 = arith.mulf %270, %293 : vector<32x1xf32>
    %cst_67 = arith.constant dense<0.000000e+00> : vector<1xf32>
    %295 = vector.multi_reduction <add>, %294, %cst_67 [0] : vector<32x1xf32> to vector<1xf32>
    %296 = vector.shape_cast %295 : vector<1xf32> to vector<1x1xf32>
    %cst_68 = arith.constant dense<0.000000e+00> : vector<1xf32>
    %297 = vector.multi_reduction <add>, %293, %cst_68 [0] : vector<32x1xf32> to vector<1xf32>
    %298 = vector.shape_cast %297 : vector<1xf32> to vector<1x1xf32>
    %299 = arith.divf %296, %298 : vector<1x1xf32>
    %cst_69 = arith.constant 9.99999974E-5 : f32
    %300 = vector.broadcast %cst_69 : f32 to vector<1x1xf32>
    %301 = arith.addf %299, %300 : vector<1x1xf32>
    %302 = tpu.reciprocal %301 {approx = true} : vector<1x1xf32> -> vector<1x1xf32>
    %303 = vector.shape_cast %302 : vector<1x1xf32> to vector<1x1xf32>
    %304 = vector.broadcast %303 : vector<1x1xf32> to vector<1x3xf32>
    %305 = vector.extract_strided_slice %233 {offsets = [0, 2], sizes = [32, 1], strides = [1, 1]} : vector<32x32xf32> to vector<32x1xf32>
    %306 = vector.extract_strided_slice %234 {offsets = [2, 0], sizes = [1, 32], strides = [1, 1]} : vector<32x32xf32> to vector<1x32xf32>
    %307 = vector.broadcast %306 : vector<1x32xf32> to vector<32x32xf32>
    %308 = vector.broadcast %305 : vector<32x1xf32> to vector<32x32xf32>
    %309 = arith.cmpf olt, %307, %308 : vector<32x32xf32>
    %310 = arith.extui %309 : vector<32x32xi1> to vector<32x32xi32>
    %311 = arith.sitofp %310 : vector<32x32xi32> to vector<32x32xf32>
    %312 = vector.broadcast %306 : vector<1x32xf32> to vector<32x32xf32>
    %313 = vector.broadcast %305 : vector<32x1xf32> to vector<32x32xf32>
    %314 = arith.cmpf oeq, %312, %313 : vector<32x32xf32>
    %315 = arith.extui %314 : vector<32x32xi1> to vector<32x32xi32>
    %316 = arith.sitofp %315 : vector<32x32xi32> to vector<32x32xf32>
    %cst_70 = arith.constant dense<0.000000e+00> : vector<32xf32>
    %317 = vector.multi_reduction <add>, %311, %cst_70 [1] : vector<32x32xf32> to vector<32xf32>
    %318 = vector.shape_cast %317 : vector<32xf32> to vector<32x1xf32>
    %cst_71 = arith.constant dense<0.000000e+00> : vector<32xf32>
    %319 = vector.multi_reduction <add>, %316, %cst_71 [1] : vector<32x32xf32> to vector<32xf32>
    %320 = vector.shape_cast %319 : vector<32xf32> to vector<32x1xf32>
    %cst_72 = arith.constant 1.500000e+01 : f32
    %321 = vector.broadcast %cst_72 : f32 to vector<32x1xf32>
    %322 = arith.cmpf ole, %318, %321 : vector<32x1xf32>
    %323 = arith.addf %318, %320 : vector<32x1xf32>
    %cst_73 = arith.constant 1.500000e+01 : f32
    %324 = vector.broadcast %cst_73 : f32 to vector<32x1xf32>
    %325 = arith.cmpf ogt, %323, %324 : vector<32x1xf32>
    %326 = arith.andi %322, %325 : vector<32x1xi1>
    %327 = arith.extui %326 : vector<32x1xi1> to vector<32x1xi32>
    %328 = arith.sitofp %327 : vector<32x1xi32> to vector<32x1xf32>
    %329 = arith.mulf %305, %328 : vector<32x1xf32>
    %cst_74 = arith.constant dense<0.000000e+00> : vector<1xf32>
    %330 = vector.multi_reduction <add>, %329, %cst_74 [0] : vector<32x1xf32> to vector<1xf32>
    %331 = vector.shape_cast %330 : vector<1xf32> to vector<1x1xf32>
    %cst_75 = arith.constant dense<0.000000e+00> : vector<1xf32>
    %332 = vector.multi_reduction <add>, %328, %cst_75 [0] : vector<32x1xf32> to vector<1xf32>
    %333 = vector.shape_cast %332 : vector<1xf32> to vector<1x1xf32>
    %334 = arith.divf %331, %333 : vector<1x1xf32>
    %cst_76 = arith.constant 9.99999974E-5 : f32
    %335 = vector.broadcast %cst_76 : f32 to vector<1x1xf32>
    %336 = arith.addf %334, %335 : vector<1x1xf32>
    %337 = tpu.reciprocal %336 {approx = true} : vector<1x1xf32> -> vector<1x1xf32>
    %338 = vector.shape_cast %337 : vector<1x1xf32> to vector<1x1xf32>
    %339 = vector.broadcast %338 : vector<1x1xf32> to vector<1x3xf32>
    %340 = vector.extract_strided_slice %233 {offsets = [0, 3], sizes = [32, 1], strides = [1, 1]} : vector<32x32xf32> to vector<32x1xf32>
    %341 = vector.extract_strided_slice %234 {offsets = [3, 0], sizes = [1, 32], strides = [1, 1]} : vector<32x32xf32> to vector<1x32xf32>
    %342 = vector.broadcast %341 : vector<1x32xf32> to vector<32x32xf32>
    %343 = vector.broadcast %340 : vector<32x1xf32> to vector<32x32xf32>
    %344 = arith.cmpf olt, %342, %343 : vector<32x32xf32>
    %345 = arith.extui %344 : vector<32x32xi1> to vector<32x32xi32>
    %346 = arith.sitofp %345 : vector<32x32xi32> to vector<32x32xf32>
    %347 = vector.broadcast %341 : vector<1x32xf32> to vector<32x32xf32>
    %348 = vector.broadcast %340 : vector<32x1xf32> to vector<32x32xf32>
    %349 = arith.cmpf oeq, %347, %348 : vector<32x32xf32>
    %350 = arith.extui %349 : vector<32x32xi1> to vector<32x32xi32>
    %351 = arith.sitofp %350 : vector<32x32xi32> to vector<32x32xf32>
    %cst_77 = arith.constant dense<0.000000e+00> : vector<32xf32>
    %352 = vector.multi_reduction <add>, %346, %cst_77 [1] : vector<32x32xf32> to vector<32xf32>
    %353 = vector.shape_cast %352 : vector<32xf32> to vector<32x1xf32>
    %cst_78 = arith.constant dense<0.000000e+00> : vector<32xf32>
    %354 = vector.multi_reduction <add>, %351, %cst_78 [1] : vector<32x32xf32> to vector<32xf32>
    %355 = vector.shape_cast %354 : vector<32xf32> to vector<32x1xf32>
    %cst_79 = arith.constant 1.500000e+01 : f32
    %356 = vector.broadcast %cst_79 : f32 to vector<32x1xf32>
    %357 = arith.cmpf ole, %353, %356 : vector<32x1xf32>
    %358 = arith.addf %353, %355 : vector<32x1xf32>
    %cst_80 = arith.constant 1.500000e+01 : f32
    %359 = vector.broadcast %cst_80 : f32 to vector<32x1xf32>
    %360 = arith.cmpf ogt, %358, %359 : vector<32x1xf32>
    %361 = arith.andi %357, %360 : vector<32x1xi1>
    %362 = arith.extui %361 : vector<32x1xi1> to vector<32x1xi32>
    %363 = arith.sitofp %362 : vector<32x1xi32> to vector<32x1xf32>
    %364 = arith.mulf %340, %363 : vector<32x1xf32>
    %cst_81 = arith.constant dense<0.000000e+00> : vector<1xf32>
    %365 = vector.multi_reduction <add>, %364, %cst_81 [0] : vector<32x1xf32> to vector<1xf32>
    %366 = vector.shape_cast %365 : vector<1xf32> to vector<1x1xf32>
    %cst_82 = arith.constant dense<0.000000e+00> : vector<1xf32>
    %367 = vector.multi_reduction <add>, %363, %cst_82 [0] : vector<32x1xf32> to vector<1xf32>
    %368 = vector.shape_cast %367 : vector<1xf32> to vector<1x1xf32>
    %369 = arith.divf %366, %368 : vector<1x1xf32>
    %cst_83 = arith.constant 9.99999974E-5 : f32
    %370 = vector.broadcast %cst_83 : f32 to vector<1x1xf32>
    %371 = arith.addf %369, %370 : vector<1x1xf32>
    %372 = tpu.reciprocal %371 {approx = true} : vector<1x1xf32> -> vector<1x1xf32>
    %373 = vector.shape_cast %372 : vector<1x1xf32> to vector<1x1xf32>
    %374 = vector.broadcast %373 : vector<1x1xf32> to vector<1x3xf32>
    %375 = tpu.concatenate %269, %304, %339, %374 in 1 : vector<1x3xf32>, vector<1x3xf32>, vector<1x3xf32>, vector<1x3xf32> -> vector<1x12xf32>
    %376 = vector.broadcast %375 : vector<1x12xf32> to vector<32x12xf32>
    %377 = arith.mulf %217, %376 : vector<32x12xf32>
    %cst_84 = arith.constant dense<0.000000e+00> : vector<32x12xf32>
    %378 = tpu.matmul %9, %377, %cst_84 {dimension_numbers = #tpu.dot_dimension_numbers<[1], [0], [0], [1], [0, 0, 1, 1], [], []>} : vector<32x32xf32>, vector<32x12xf32>, vector<32x12xf32> -> vector<32x12xf32>
    %379 = arith.cmpf one, %378, %378 : vector<32x12xf32>
    %cst_85 = arith.constant 0.000000e+00 : f32
    %380 = vector.broadcast %cst_85 : f32 to vector<32x12xf32>
    %381 = arith.select %379, %380, %378 : vector<32x12xi1>, vector<32x12xf32>
    %cst_86 = arith.constant 0x7F800000 : f32
    %382 = vector.broadcast %cst_86 : f32 to vector<32x12xf32>
    %383 = arith.cmpf oeq, %378, %382 : vector<32x12xf32>
    %cst_87 = arith.constant 1.000000e+02 : f32
    %384 = vector.broadcast %cst_87 : f32 to vector<32x12xf32>
    %385 = arith.select %383, %384, %381 : vector<32x12xi1>, vector<32x12xf32>
    %cst_88 = arith.constant 0xFF800000 : f32
    %386 = vector.broadcast %cst_88 : f32 to vector<32x12xf32>
    %387 = arith.cmpf oeq, %378, %386 : vector<32x12xf32>
    %cst_89 = arith.constant -1.000000e+02 : f32
    %388 = vector.broadcast %cst_89 : f32 to vector<32x12xf32>
    %389 = arith.select %387, %388, %385 : vector<32x12xi1>, vector<32x12xf32>
    %c0_90 = arith.constant 0 : index
    %c0_91 = arith.constant 0 : index
    %c0_92 = arith.constant 0 : index
    %390 = vector.load %arg9[%c0_90, %c0_91, %c0_92] : memref<1x32x12xf32, #tpu.memory_space<vmem>>, vector<1x32x12xf32>
    %391 = vector.shape_cast %390 : vector<1x32x12xf32> to vector<32x12xf32>
    %392 = vector.shape_cast %389 : vector<32x12xf32> to vector<1x32x12xf32>
    tpu.vector_store %arg9[%c0_90, %c0_91, %c0_92], %392 {strides = array<i32>} : memref<1x32x12xf32, #tpu.memory_space<vmem>>, vector<1x32x12xf32>,
    return
  }
  func.func @transform_0(%arg0: i32) -> (i32, i32, i32) {
    %c0_i32 = arith.constant 0 : i32
    %c0_i32_0 = arith.constant 0 : i32
    %c0_i32_1 = arith.constant 0 : i32
    return %arg0, %c0_i32, %c0_i32_0 : i32, i32, i32
  }
  func.func @transform_1(%arg0: i32) -> (i32, i32, i32, i32) {
    %c0_i32 = arith.constant 0 : i32
    %c0_i32_0 = arith.constant 0 : i32
    %c0_i32_1 = arith.constant 0 : i32
    %c0_i32_2 = arith.constant 0 : i32
    return %arg0, %c0_i32, %c0_i32_0, %c0_i32_1 : i32, i32, i32, i32
  }
  func.func @transform_2(%arg0: i32) -> (i32, i32) {
    %c0_i32 = arith.constant 0 : i32
    %c0_i32_0 = arith.constant 0 : i32
    %c0_i32_1 = arith.constant 0 : i32
    return %c0_i32, %c0_i32_0 : i32, i32
  }
  func.func @transform_3(%arg0: i32) -> (i32, i32) {
    %c0_i32 = arith.constant 0 : i32
    %c0_i32_0 = arith.constant 0 : i32
    %c0_i32_1 = arith.constant 0 : i32
    return %c0_i32, %c0_i32_0 : i32, i32
  }
  func.func @transform_4(%arg0: i32) -> (i32, i32) {
    %c0_i32 = arith.constant 0 : i32
    %c0_i32_0 = arith.constant 0 : i32
    %c0_i32_1 = arith.constant 0 : i32
    return %c0_i32, %c0_i32_0 : i32, i32
  }
  func.func @transform_5(%arg0: i32) -> (i32, i32) {
    %c0_i32 = arith.constant 0 : i32
    %c0_i32_0 = arith.constant 0 : i32
    %c0_i32_1 = arith.constant 0 : i32
    return %c0_i32, %c0_i32_0 : i32, i32
  }
  func.func @transform_6(%arg0: i32) -> (i32, i32) {
    %c0_i32 = arith.constant 0 : i32
    %c0_i32_0 = arith.constant 0 : i32
    %c0_i32_1 = arith.constant 0 : i32
    return %c0_i32, %c0_i32_0 : i32, i32
  }
  func.func @transform_7(%arg0: i32) -> (i32, i32) {
    %c0_i32 = arith.constant 0 : i32
    %c0_i32_0 = arith.constant 0 : i32
    %c0_i32_1 = arith.constant 0 : i32
    return %c0_i32, %c0_i32_0 : i32, i32
  }
  func.func @transform_8(%arg0: i32) -> (i32, i32, i32) {
    %c0_i32 = arith.constant 0 : i32
    %c0_i32_0 = arith.constant 0 : i32
    %c0_i32_1 = arith.constant 0 : i32
    return %arg0, %c0_i32, %c0_i32_0 : i32, i32, i32
  }
  func.func @transform_9(%arg0: i32) -> (i32, i32, i32) {
    %c0_i32 = arith.constant 0 : i32
    %c0_i32_0 = arith.constant 0 : i32
    %c0_i32_1 = arith.constant 0 : i32
    return %arg0, %c0_i32, %c0_i32_0 : i32, i32, i32
  }
}

</mosaic_0001>

<bundles_post_ra>
// kernel: encoder_chain_forward.1
= control target key start
LH: loop header
LB: loop body
LE: loop exit
PB: predicated region body
PF: predicated region fallthrough
CT: control target
= control target key end

     0   :  { %15 = vsyncpa [#allocation3], 0  ;;  %s6798_s0 = inlined_call_operand.vmem [shape: f32[2,32,16], index: 0, kind: input, shape index: {}]   ;;  %s6799_s1 = inlined_call_operand.vmem [shape: f32[2,2,32,32], index: 1, kind: input, shape index: {}]   ;;  %s6800_s2 = inlined_call_operand.vmem [shape: f32[16,68], index: 2, kind: input, shape index: {}]   ;;  %s6801_s3 = inlined_call_operand.vmem [shape: f32[1,32], index: 3, kind: input, shape index: {}]   ;;  %s6802_s4 = inlined_call_operand.vmem [shape: f32[32,68], index: 4, kind: input, shape index: {}]   ;;  %s6803_s5 = inlined_call_operand.vmem [shape: f32[1,32], index: 5, kind: input, shape index: {}]   ;;  %s6804_s6 = inlined_call_operand.vmem [shape: f32[32,40], index: 6, kind: input, shape index: {}]   ;;  %s6805_s7 = inlined_call_operand.vmem [shape: f32[1,12], index: 7, kind: input, shape index: {}]   ;;  %s6806_s8 = inlined_call_operand.vmem [shape: f32[2,32,12], index: 8, kind: output, shape index: {0}]   ;;  %s6807_s9 = inlined_call_operand.hbm [shape: f32[2,32,32], index: 9, kind: output, shape index: {1}]  }
   0x1   :  { %17 = vsyncpa [#allocation3 + $0x1], 0  ;;  %s5216_s30 = smov 0   ;;  %s5218_s10 = smov 0  }
   0x2   :  { %s5220_s11 = smov 0   ;;  %s5222_s12 = smov 0  }
   0x3 LB: > { %s5237_s13 = sadd.s32 4294967295, %s5136_s12   ;;  %s3967_s14 = sadd.s32 4294967294, %s5136_s12   ;;  %s5136_s12 = sphi %s5222_s12, %s6861_s12   ;;  %s5132_s11 = sphi %s5220_s11, %s6860_s11   ;;  %s5128_s10 = sphi %s5218_s10, %s6859_s10   ;;  %s5124_s30 = sphi %s5216_s30, %s6858_s30  }
   0x4   : > { %s5241_s15 = sadd.s32 1, %s5136_s12   ;;  %s234_s16 = sadd.s32 1, %s5132_s11 }
   0x5   : > { %s231_s17 = ssub.s32 %s5136_s12, %s5241_s15  ;;  %p244_p0 = scmp.ne.s32.totalorder %s5132_s11, %s5128_s10 }
   0x6   : > { %p232_p1 = scmp.eq.s32.totalorder %s231_s17, 0  ;;  %p245_p2 = scmp.eq.s32.totalorder %s5237_s13, 1 }
   0x7   : > { %p250_p3 = scmp.ne.s32.totalorder %s5128_s10, %s5124_s30  ;;  %p251_p4 = scmp.eq.s32.totalorder %s3967_s14, 1 }
   0x8   : > { %s5252_s18 = scalar_select %p232_p1, %s5132_s11, %s234_s16  }
   0x9   : > { %p5254_p5 = por %p245_p2, %p244_p0  ;;  %p5258_p6 = por %p251_p4, %p250_p3 }
   0xa   : > { %p3970_p7 = scmp.ge.s32.totalorder %s5136_s12, 1  ;;  %p303_p8 = scmp.lt.s32.totalorder %s5136_s12, 3 }
   0xc   : > { %p304_p9 = pnand %p3970_p7, %p303_p8 }
   0xe   : > { %307 = sbr.rel (%p304_p9) target bundleno = 4835 (0x12e3), region = 52 }
  0x15   : > { %v428_v0 = vld [vmem:[%s6800_s2] sm:$0xff]  ;;  %v429_v1 = vld [vmem:[%s6800_s2 + $0x8] sm:$0xff]  ;;  %p349_p10 = scmp.lt.s32.totalorder %s5237_s13, 1  ;;  %v6810_v3 = vmov 3   ;;  %vm430_vm0 = vcmask 130048   ;;  %v6808_v14 = vmov 2   ;;  %v6812_v17 = vlaneseq }
  0x16   : > { %v4438_v2 = vpack.c.bf16 %v429_v1, %v428_v0  ;;  %4642 = vset.pattern.permute.xlu0 %v6810_v3  ;;  %4643 = vset.pattern.permute.xlu1 %v6810_v3  ;;  %s5140_s14 = smov 96   ;;  %vm644_vm3 = vcmask 261120   ;;  %s5141_s23 = smov 124   ;;  %vm808_vm10 = vcmask 523264  }
  0x17   : > { %s5274_s25 = scalar_select %p349_p10, %s5237_s13, 1  ;;  %v5294_v20 = vshrl.u32 %v6812_v17, 7 }
  0x18   : > { %4439 = vmatprep.subr.bf16.mxu0 %v4438_v2  ;;  %s5142_s24 = smov 32   ;;  %s5151_s28 = smov 125  }
  0x19   : > { %4441 = vmatpush3.bf16.msra.mxu0 %v4438_v2  ;;  %s6826_s26 = sshll.u32 %s5274_s25, 5  ;;  %s4111_s16 = sshll.u32 %s5274_s25, 6  ;;  %v5308_v24 = vsub.s32 0, %v5294_v20  ;;  %v5311_v25 = vsub.s32 1, %v5294_v20 }
  0x1a   : > { %s353_s29 = scalar_lea.vmem %s6798_s0, %s6826_s26  ;;  %s5299_s22 = scalar_lea.vmem %s6799_s1, %s4111_s16 }
  0x1b   : > { %v424_v4 = vld [vmem:[%s353_s29] sm:$0xff]  ;;  %v425_v5 = vld [vmem:[%s353_s29 + $0x8] sm:$0xff]  ;;  %v426_v6 = vld [vmem:[%s353_s29 + $0x10] sm:$0xff]  ;;  %6829 = vst [vmem:[#allocation5_spill] sm:$0xff] %v5308_v24  ;;  %s5153_s16 = smov 100   ;;  %s5155_s17 = smov 106  }
  0x1c   : > { %4234 = vmatprep.mubr.msk.f32.mxu0 %vm430_vm0, %v424_v4  ;;  %v427_v7 = vld [vmem:[%s353_s29 + $0x18] sm:$0xff]  ;;  %v5302_v22 = vld [vmem:[%s5299_s22 + $0x8] sm:$0xff]  ;;  %6830 = vst [vmem:[#allocation6_spill] sm:$0xff] %v5311_v25  ;;  %v5314_v27 = vld [vmem:[%s5299_s22 + $0x20] sm:$0xff]  ;;  %s5152_s29 = smov 112   ;;  %s5158_s21 = smov 9  }
  0x1d   : > { %4235 = vmatmul.mubr.msk.f32.vlgmr.msra.gmra.mrb[0].mxu0 %vm430_vm0, %v425_v5  ;;  %v5305_v23 = vld [vmem:[%s5299_s22 + $0x28] sm:$0xff]  ;;  %v3995_v30 = vadd.f32 -1.0, %v5302_v22  ;;  %v5319_v31 = vld [vmem:[%s5299_s22] sm:$0xff]  ;;  %v3998_v34 = vadd.f32 -1.0, %v5314_v27  ;;  %v5329_v39 = vld [vmem:[%s5299_s22 + $0x38] sm:$0xff] }
  0x1e   : > { %4237 = vmatprep.mubr.msk.f32.mxu0 %vm430_vm0, %v426_v6  ;;  %v3999_v29 = vadd.f32 -1.0, %v5305_v23  ;;  %v3994_v43 = vadd.f32 -1.0, %v5319_v31  ;;  %v4001_v55 = vadd.f32 -1.0, %v5329_v39  ;;  %v5355_v61 = vld [vmem:[%s5299_s22 + $0x18] sm:$0xff]  ;;  %v5364_v6 = vld [vmem:[%s5299_s22 + $0x30] sm:$0xff] }
  0x1f   : > { %v5335_v42 = vmul.f32 1e+30, %v3995_v30  ;;  %v5338_v46 = vmul.f32 1e+30, %v3998_v34  ;;  %v3997_v5 = vadd.f32 -1.0, %v5355_v61 }
  0x20   : > { %v5333_v41 = vmul.f32 1e+30, %v3999_v29  ;;  %v5352_v60 = vmul.f32 1e+30, %v3994_v43  ;;  %v5360_v4 = vmul.f32 1e+30, %v4001_v55 }
  0x21   : > { %4238 = vmatmul.mubr.msk.f32.gmra.mrb[2].mxu0 %vm430_vm0, %v427_v7 }
  0xf0   : > { %v4236_v8 = vpop.f32.mrb[0].mxu0 }
  0xf1   : > { %593 = vperm.xlu0 %4642, %v4236_v8   ;;  %v509_v9 = vpop.f32.mrb[1].mxu0 }
  0xf2   : > { %v5282_v10 = vpack.i.bf16 %v4236_v8, %v509_v9 }
  0xf4   : > { %v4239_v11 = vpop.f32.mrb[2].mxu0 }
  0xf5   : > { %589 = vperm.xlu0 %4642, %v509_v9   ;;  %601 = vperm.xlu1 %4643, %v4239_v11   ;;  %v519_v12 = vpop.f32.mrb[3].mxu0 }
  0xf6   : > { %v5284_v13 = vpack.i.bf16 %v4239_v11, %v519_v12 }
  0xf9   : > { %597 = vperm.xlu1 %4643, %v519_v12  }
  0xfd   : > { %4644 = vset.pattern.permute.xlu1 %v6808_v14 }
  0xfe   : > { %562 = vperm.xlu1 %4644, %v509_v9  }
 0x102   : > { %567 = vperm.xlu1 %4644, %v4236_v8  }
 0x106   : > { %572 = vperm.xlu1 %4644, %v519_v12  }
 0x10a   : > { %577 = vperm.xlu1 %4644, %v4239_v11  }
 0x10e   : > { %4646 = vrot.lane.b32.xlu1 %v5282_v10, %s5140_s14 }
 0x10f   : > { %4675 = vset.pattern.permute.xlu1 %v6810_v3 }
 0x113   : > { %528 = vxpose.xlu0.b32.start [1/4] (short) (narrow) %v509_v9, 8 }
 0x117   : > { %529 = vxpose.xlu0.b32.cont [2/4] (short) (narrow) %v4236_v8, 8 }
 0x11b   : > { %530 = vxpose.xlu0.b32.cont [3/4] (short) (narrow) %v519_v12, 8 }
 0x11f   : > { %531 = vxpose.xlu0.b32.end [4/4] (short) (narrow) %v4239_v11, 8 }
 0x170   : > { %v594_v18 = vpop.permute.xlu0 %593 }
 0x174   : > { %v602_v15 = vpop.permute.xlu1 %601  ;;  %v590_v21 = vpop.permute.xlu0 %589 }
 0x178   : > { %v5290_v16 = vpop.permute.xlu1 %597 }
 0x17d   : > { %v563_v19 = vpop.permute.xlu1 %562 }
 0x181   : > { %v568_v26 = vpop.permute.xlu1 %567 }
 0x185   : > { %v5331_v40 = vpop.permute.xlu1 %572 }
 0x189   : > { %v578_v56 = vpop.permute.xlu1 %577 }
 0x193   : > { %v544_v28 = vpop.trf.xlu0 }
 0x194   : > { %v5322_v32 = vrot.slane %v544_v28, %v5308_v24  ;;  %v607_v33 = vrot.slane %v544_v28, %v5311_v25 }
 0x196   : > { %v609_v35 = vadd.f32 %v607_v33, %v594_v18  ;;  %v585_v36 = vadd.f32 %v5322_v32, %v568_v26  ;;  %v608_v37 = vadd.f32 %v607_v33, %v590_v21  ;;  %v584_v38 = vadd.f32 %v5322_v32, %v563_v19 }
 0x197   : > { %v611_v51 = vadd.f32 %v607_v33, %v602_v15  ;;  %v587_v0 = vadd.f32 %v5322_v32, %v578_v56  ;;  %v610_v9 = vadd.f32 %v607_v33, %v5290_v16  ;;  %v5369_v15 = vmul.f32 1e+30, %v3997_v5 }
 0x198   : > { %vm617_vm1 = vcmp.ge.f32.partialorder %v609_v35, 0.0  ;;  %v625_v44 = vmul.f32 0.2, %v609_v35  ;;  %vm613_vm2 = vcmp.ge.f32.partialorder %v585_v36, 0.0  ;;  %v621_v45 = vmul.f32 0.2, %v585_v36 }
 0x199   : > { %vm616_vm4 = vcmp.ge.f32.partialorder %v608_v37, 0.0  ;;  %v624_v47 = vmul.f32 0.2, %v608_v37  ;;  %v620_v50 = vmul.f32 0.2, %v584_v38  ;;  %vm612_vm5 = vcmp.ge.f32.partialorder %v584_v38, 0.0 }
 0x19a   : > { %v633_v48 = vsel %vm617_vm1, %v609_v35, %v625_v44  ;;  %v629_v49 = vsel %vm613_vm2, %v585_v36, %v621_v45  ;;  %v627_v63 = vmul.f32 0.2, %v611_v51  ;;  %vm619_vm6 = vcmp.ge.f32.partialorder %v611_v51, 0.0  ;;  %v5390_v35 = vld [vmem:[%s5299_s22 + $0x10] sm:$0xff] }
 0x19b   : > { %v5341_v52 = vadd.f32 %v633_v48, %v5333_v41  ;;  %v5344_v53 = vadd.f32 %v629_v49, %v5335_v42  ;;  %v632_v54 = vsel %vm616_vm4, %v608_v37, %v624_v47  ;;  %v628_v62 = vsel %vm612_vm5, %v584_v38, %v620_v50 }
 0x19c   : > { %v640_v59 = vadd.f32 %v632_v54, %v5338_v46  ;;  %v636_v2 = vadd.f32 %v628_v62, %v5352_v60  ;;  %v635_v7 = vsel %vm619_vm6, %v611_v51, %v627_v63  ;;  %v623_v8 = vmul.f32 0.2, %v587_v0 }
 0x19d   : > { %v660_v57 = vsel %vm644_vm3, %v5341_v52, -inf  ;;  %v648_v58 = vsel %vm644_vm3, %v5344_v53, -inf  ;;  %vm615_vm7 = vcmp.ge.f32.partialorder %v587_v0, 0.0  ;;  %v643_v12 = vadd.f32 %v635_v7, %v5360_v4 }
 0x19e   : > { %661 = vmax.xlane.f32.xlu0 %v660_v57  ;;  %649 = vmax.xlane.f32.xlu1 %v648_v58  ;;  %v657_v1 = vsel %vm644_vm3, %v640_v59, -inf  ;;  %v645_v11 = vsel %vm644_vm3, %v636_v2, -inf  ;;  %v4000_v18 = vadd.f32 -1.0, %v5364_v6  ;;  %v631_v19 = vsel %vm615_vm7, %v587_v0, %v623_v8 }
 0x19f   : > { %v626_v21 = vmul.f32 0.2, %v610_v9  ;;  %vm618_vm8 = vcmp.ge.f32.partialorder %v610_v9, 0.0  ;;  %v666_v26 = vsel %vm644_vm3, %v643_v12, -inf  ;;  %v5374_v28 = vadd.f32 %v631_v19, %v5369_v15 }
 0x1a0   : > { %v5376_v16 = vmul.f32 1e+30, %v4000_v18  ;;  %v586_v36 = vadd.f32 %v5322_v32, %v5331_v40  ;;  %v3996_v37 = vadd.f32 -1.0, %v5390_v35 }
 0x1a1   : > { %v634_v29 = vsel %vm618_vm8, %v610_v9, %v626_v21  ;;  %v654_v30 = vsel %vm644_vm3, %v5374_v28, -inf }
 0x1a2   : > { %658 = vmax.xlane.f32.xlu1 %v657_v1  ;;  %v5381_v33 = vadd.f32 %v634_v29, %v5376_v16  ;;  %v622_v38 = vmul.f32 0.2, %v586_v36  ;;  %vm614_vm9 = vcmp.ge.f32.partialorder %v586_v36, 0.0  ;;  %v5395_v43 = vmul.f32 1e+30, %v3996_v37 }
 0x1a4   : > { %v663_v34 = vsel %vm644_vm3, %v5381_v33, -inf  ;;  %v630_v44 = vsel %vm614_vm9, %v586_v36, %v622_v38 }
 0x1a5   : > { %v5398_v45 = vadd.f32 %v630_v44, %v5395_v43 }
 0x1a6   : > { %646 = vmax.xlane.f32.xlu1 %v645_v11 }
 0x1a7   : > { %v651_v47 = vsel %vm644_vm3, %v5398_v45, -inf }
 0x1aa   : > { %667 = vmax.xlane.f32.xlu1 %v666_v26 }
 0x1ae   : > { %655 = vmax.xlane.f32.xlu1 %v654_v30 }
 0x1b2   : > { %664 = vmax.xlane.f32.xlu1 %v663_v34 }
 0x1b4   : > { %4651 = vrot.lane.b32.xlu0 %v5284_v13, %s5140_s14 }
 0x1c3   : > { %4656 = vrot.lane.b32.xlu1 %v5282_v10, %s5141_s23  ;;  %v4647_v10 = vpop.permute.xlu1 %4646 }
 0x1e7   : > { %652 = vmax.xlane.f32.xlu1 %v651_v47 }
 0x22b   : > { %v662_v48 = vpop.xlane.xlu0 %661  ;;  %v650_v49 = vpop.xlane.xlu1 %649 }
 0x22c   : > { %v674_v50 = vsub.f32 %v5341_v52, %v662_v48  ;;  %v670_v32 = vsub.f32 %v5344_v53, %v650_v49 }
 0x22e   : > { %v687_v40 = vmul.f32 1.442695, %v674_v50  ;;  %v679_v51 = vmul.f32 1.442695, %v670_v32 }
 0x22f   : > { %v659_v54 = vpop.xlane.xlu1 %658 }
 0x230   : > { %4850 = vpow2.f32 %v687_v40  ;;  %v673_v55 = vsub.f32 %v640_v59, %v659_v54 }
 0x231   : > { %4852 = vpow2.f32 %v679_v51 }
 0x232   : > { %v685_v56 = vmul.f32 1.442695, %v673_v55 }
 0x233   : > { %v647_v57 = vpop.xlane.xlu1 %646 }
 0x234   : > { %4854 = vpow2.f32 %v685_v56  ;;  %v669_v58 = vsub.f32 %v636_v2, %v647_v57 }
 0x236   : > { %v677_v62 = vmul.f32 1.442695, %v669_v58 }
 0x237   : > { %v668_v63 = vpop.xlane.xlu1 %667 }
 0x238   : > { %4856 = vpow2.f32 %v677_v62  ;;  %v676_v0 = vsub.f32 %v643_v12, %v668_v63 }
 0x23a   : > { %v4851_v1 = vpop.eup %4850  ;;  %v691_v5 = vmul.f32 1.442695, %v676_v0 }
 0x23b   : > { %v4853_v7 = vpop.eup %4852  ;;  %v656_v52 = vpop.xlane.xlu1 %655  ;;  %v5405_v53 = vmul.f32 %v4851_v1, %v5305_v23 }
 0x23c   : > { %4858 = vpow2.f32 %v691_v5  ;;  %v5408_v8 = vmul.f32 %v4853_v7, %v5302_v22  ;;  %v672_v48 = vsub.f32 %v5374_v28, %v656_v52  ;;  %v4652_v28 = vpop.permute.xlu0 %4651 }
 0x23d   : > { %v716_v59 = vsel %vm644_vm3, %v5405_v53, 0.0 }
 0x23e   : > { %v4855_v9 = vpop.eup %4854  ;;  %717 = vadd.xlane.f32.xlu1 %v716_v59  ;;  %v704_v2 = vsel %vm644_vm3, %v5408_v8, 0.0  ;;  %v683_v50 = vmul.f32 1.442695, %v672_v48 }
 0x23f   : > { %705 = vadd.xlane.f32.xlu0 %v704_v2  ;;  %v665_v11 = vpop.xlane.xlu1 %664  ;;  %v5415_v12 = vmul.f32 %v4855_v9, %v5314_v27 }
 0x240   : > { %v675_v47 = vsub.f32 %v5381_v33, %v665_v11 }
 0x241   : > { %v713_v18 = vsel %vm644_vm3, %v5415_v12, 0.0 }
 0x242   : > { %v4857_v19 = vpop.eup %4856  ;;  %714 = vadd.xlane.f32.xlu1 %v713_v18  ;;  %v689_v49 = vmul.f32 1.442695, %v675_v47 }
 0x243   : > { %v4657_v21 = vpop.permute.xlu1 %4656  ;;  %v5420_v26 = vmul.f32 %v4857_v19, %v5319_v31 }
 0x244   : > { %v4659_v29 = vunpack.i.h.bf16 %v4657_v21  ;;  %v4658_v30 = vunpack.i.l.bf16 %v4657_v21  ;;  %4860 = vpow2.f32 %v689_v49 }
 0x245   : > { %v701_v34 = vsel %vm644_vm3, %v5420_v26, 0.0  ;;  %4862 = vpow2.f32 %v683_v50 }
 0x246   : > { %v4859_v36 = vpop.eup %4858  ;;  %702 = vadd.xlane.f32.xlu1 %v701_v34  ;;  %v4442_v37 = vpack.c.bf16 %v4659_v29, %v4658_v30 }
 0x247   : > { %v700_v38 = vmul.f32 %v4859_v36, %v5329_v39 }
 0x248   : > { %4443 = vmatprep.subr.bf16.mxu1 %v4442_v37 }
 0x249   : > { %4445 = vmatpush3.bf16.msra.mxu1 %v4442_v37  ;;  %v722_v44 = vsel %vm644_vm3, %v700_v38, 0.0 }
 0x24a   : > { %723 = vadd.xlane.f32.xlu0 %v722_v44 }
 0x24e   : > { %v4861_v32 = vpop.eup %4860 }
 0x24f   : > { %v5432_v40 = vmul.f32 %v4861_v32, %v5364_v6  ;;  %v4863_v51 = vpop.eup %4862 }
 0x251   : > { %v719_v54 = vsel %vm644_vm3, %v5432_v40, 0.0 }
 0x257   : > { %4666 = vrot.lane.b32.xlu1 %v4647_v10, %s5141_s23  ;;  %v5437_v10 = vmul.f32 %v4863_v51, %v5355_v61 }
 0x260   : > { %4661 = vrot.lane.b32.xlu0 %v5284_v13, %s5141_s23  ;;  %v710_v13 = vsel %vm644_vm3, %v5437_v10, 0.0 }
 0x274   : > { %v653_v33 = vpop.xlane.xlu1 %652 }
 0x275   : > { %v671_v55 = vsub.f32 %v5398_v45, %v653_v33 }
 0x277   : > { %v681_v56 = vmul.f32 1.442695, %v671_v55 }
 0x279   : > { %4864 = vpow2.f32 %v681_v56 }
 0x27b   : > { %720 = vadd.xlane.f32.xlu1 %v719_v54  ;;  %v907_v54 = vld [vmem:[%s6802_s4 + $0x8] sm:$0xff] }
 0x27f   : > { %711 = vadd.xlane.f32.xlu0 %v710_v13 }
 0x283   : > { %v4865_v57 = vpop.eup %4864 }
 0x284   : > { %v5444_v58 = vmul.f32 %v4865_v57, %v5390_v35 }
 0x286   : > { %v707_v62 = vsel %vm644_vm3, %v5444_v58, 0.0 }
 0x28c   : > { %4671 = vrot.lane.b32.xlu1 %v4652_v28, %s5141_s23 }
 0x2b0   : > { %708 = vadd.xlane.f32.xlu1 %v707_v62 }
 0x2cb   : > { %v718_v63 = vpop.xlane.xlu1 %717 }
 0x2cc   : > { %v730_v0 = vmax.f32 %v718_v63, 1e-30  ;;  %v706_v7 = vpop.xlane.xlu0 %705 }
 0x2cd   : > { %v726_v56 = vmax.f32 %v706_v7, 1e-30 }
 0x2ce   : > { %4866 = vrcp.f32 %v730_v0 }
 0x2cf   : > { %v715_v1 = vpop.xlane.xlu1 %714 }
 0x2d0   : > { %v729_v5 = vmax.f32 %v715_v1, 1e-30 }
 0x2d2   : > { %4868 = vrcp.f32 %v729_v5 }
 0x2d3   : > { %v703_v52 = vpop.xlane.xlu1 %702 }
 0x2d4   : > { %v725_v55 = vmax.f32 %v703_v52, 1e-30 }
 0x2d7   : > { %v724_v59 = vpop.xlane.xlu0 %723  ;;  %v4667_v2 = vpop.permute.xlu1 %4666 }
 0x2d8   : > { %v4867_v45 = vpop.eup %4866  ;;  %v732_v9 = vmax.f32 %v724_v59, 1e-30  ;;  %v4669_v21 = vunpack.i.h.bf16 %v4667_v2  ;;  %v4668_v29 = vunpack.i.l.bf16 %v4667_v2 }
 0x2d9   : > { %v746_v11 = vmul.f32 %v4867_v45, %v5405_v53 }
 0x2da   : > { %4870 = vrcp.f32 %v732_v9  ;;  %v4450_v44 = vpack.c.bf16 %v4669_v21, %v4668_v29 }
 0x2db   : > { %v4662_v18 = vpop.permute.xlu0 %4661  ;;  %763 = vrot.lane.b32.xlu1 %v746_v11, %s5142_s24 }
 0x2dc   : > { %v4869_v19 = vpop.eup %4868  ;;  %v4664_v30 = vunpack.i.h.bf16 %v4662_v18  ;;  %v4663_v34 = vunpack.i.l.bf16 %v4662_v18 }
 0x2dd   : > { %v745_v36 = vmul.f32 %v4869_v19, %v5415_v12  ;;  %v906_v12 = vld [vmem:[%s6802_s4] sm:$0xff] }
 0x2de   : > { %v4446_v37 = vpack.c.bf16 %v4664_v30, %v4663_v34  ;;  %v4458_v13 = vpack.c.bf16 %v907_v54, %v906_v12  ;;  %v908_v30 = vld [vmem:[%s6802_s4 + $0x10] sm:$0xff]  ;;  %v909_v34 = vld [vmem:[%s6802_s4 + $0x18] sm:$0xff] }
 0x2df   : > { %761 = vrot.lane.b32.xlu0 %v745_v36, %s5142_s24 }
 0x2e0   : > { %4447 = vmatprep.subr.bf16.mxu1 %v4446_v37  ;;  %4459 = vmatprep.subr.bf16.mxu0 %v4458_v13 }
 0x2e1   : > { %4449 = vmatpush3.bf16.msra.mxu1 %v4446_v37  ;;  %4461 = vmatpush3.bf16.msra.mxu0 %v4458_v13 }
 0x2e2   : > { %4451 = vmatprep.subr.bf16.mxu1 %v4450_v44 }
 0x2e4   : > { %v4871_v53 = vpop.eup %4870 }
 0x2e5   : > { %4453 = vmatpush3.bf16.msra.mxu1 %v4450_v44  ;;  %v748_v47 = vmul.f32 %v4871_v53, %v700_v38 }
 0x2e7   : > { %767 = vrot.lane.b32.xlu1 %v748_v47, %s5142_s24 }
 0x308   : > { %v721_v48 = vpop.xlane.xlu1 %720 }
 0x309   : > { %v731_v49 = vmax.f32 %v721_v48, 1e-30 }
 0x30b   : > { %4872 = vrcp.f32 %v731_v49 }
 0x30c   : > { %v4672_v50 = vpop.permute.xlu1 %4671  ;;  %4874 = vrcp.f32 %v725_v55  ;;  %v712_v63 = vpop.xlane.xlu0 %711 }
 0x30d   : > { %v4674_v32 = vunpack.i.h.bf16 %v4672_v50  ;;  %v4673_v51 = vunpack.i.l.bf16 %v4672_v50  ;;  %4876 = vrcp.f32 %v726_v56  ;;  %v728_v52 = vmax.f32 %v712_v63, 1e-30 }
 0x30f   : > { %v4454_v28 = vpack.c.bf16 %v4674_v32, %v4673_v51 }
 0x311   : > { %4455 = vmatprep.subr.bf16.mxu1 %v4454_v28 }
 0x312   : > { %4457 = vmatpush3.bf16.msra.mxu1 %v4454_v28 }
 0x315   : > { %v4873_v38 = vpop.eup %4872 }
 0x316   : > { %v747_v33 = vmul.f32 %v4873_v38, %v5432_v40  ;;  %v4875_v62 = vpop.eup %4874 }
 0x317   : > { %v4877_v0 = vpop.eup %4876  ;;  %v741_v5 = vmul.f32 %v4875_v62, %v5420_v26 }
 0x318   : > { %765 = vrot.lane.b32.xlu0 %v747_v33, %s5142_s24  ;;  %v742_v59 = vmul.f32 %v4877_v0, %v5408_v8 }
 0x33d   : > { %v709_v57 = vpop.xlane.xlu1 %708 }
 0x33e   : > { %v727_v7 = vmax.f32 %v709_v57, 1e-30 }
 0x340   : > { %4878 = vrcp.f32 %v727_v7 }
 0x341   : > { %4880 = vrcp.f32 %v728_v52 }
 0x34a   : > { %v4879_v2 = vpop.eup %4878 }
 0x34b   : > { %v4881_v11 = vpop.eup %4880  ;;  %v743_v26 = vmul.f32 %v4879_v2, %v5444_v58  ;;  %v4462_v58 = vpack.c.bf16 %v909_v34, %v908_v30 }
 0x34c   : > { %v744_v8 = vmul.f32 %v4881_v11, %v5437_v10  ;;  %v4006_v10 = vld [vmem:[%s6801_s3] ss:$0 sm:$0xff] }
 0x34d   : > { %v764_v1 = vpop.permute.xlu1 %763  ;;  %4463 = vmatprep.subr.bf16.mxu0 %v4462_v58 }
 0x34e   : > { %v774_v40 = vsel %vm644_vm3, %v742_v59, %v764_v1  ;;  %4465 = vmatpush3.bf16.msra.mxu0 %v4462_v58 }
 0x351   : > { %v762_v45 = vpop.permute.xlu0 %761 }
 0x352   : > { %v773_v9 = vsel %vm644_vm3, %v741_v5, %v762_v45 }
 0x353   : > { %4256 = vmatprep.mubr.msk.f32.mxu1 %vm808_vm10, %v773_v9 }
 0x354   : > { %4257 = vmatmul.mubr.msk.f32.vlgmr.msra.gmra.mrb[0].mxu1 %vm808_vm10, %v774_v40 }
 0x359   : > { %v768_v18 = vpop.permute.xlu1 %767 }
 0x35a   : > { %v776_v29 = vsel %vm644_vm3, %v744_v8, %v768_v18 }
 0x38a   : > { %v766_v19 = vpop.permute.xlu0 %765 }
 0x38b   : > { %v775_v21 = vsel %vm644_vm3, %v743_v26, %v766_v19 }
 0x38c   : > { %4259 = vmatprep.mubr.msk.f32.mxu1 %vm808_vm10, %v775_v21 }
 0x38d   : > { %4260 = vmatmul.mubr.msk.f32.gmra.mrb[2].mxu1 %vm808_vm10, %v776_v29 }
 0x427   : > { %v4258_v36 = vpop.f32.mrb[0].mxu1 }
 0x428   : > { %v887_v37 = vpop.f32.mrb[1].mxu1  ;;  %v893_v53 = vadd.f32 %v4258_v36, %v4006_v10 }
 0x429   : > { %v888_v44 = vadd.f32 %v4006_v10, %v887_v37 }
 0x42b   : > { %4270 = vmatprep.mubr.msk.f32.mxu0 %vm644_vm3, %v888_v44 }
 0x42c   : > { %4271 = vmatmul.mubr.msk.f32.vlgmr.msra.gmra.mrb[4].mxu0 %vm644_vm3, %v893_v53 }
 0x460   : > { %v4261_v47 = vpop.f32.mrb[2].mxu1 }
 0x461   : > { %v897_v48 = vpop.f32.mrb[3].mxu1  ;;  %v903_v50 = vadd.f32 %v4261_v47, %v4006_v10 }
 0x462   : > { %v898_v49 = vadd.f32 %v4006_v10, %v897_v48 }
 0x464   : > { %4273 = vmatprep.mubr.msk.f32.mxu0 %vm644_vm3, %v898_v49 }
 0x465   : > { %4274 = vmatmul.mubr.msk.f32.gmra.mrb[6].mxu0 %vm644_vm3, %v903_v50 }
 0x4ff   : > { %v4272_v32 = vpop.f32.mrb[4].mxu0 }
 0x500   : > { %1072 = vperm.xlu1 %4675, %v4272_v32   ;;  %v988_v51 = vpop.f32.mrb[5].mxu0 }
 0x501   : > { %1068 = vperm.xlu0 %4642, %v988_v51   ;;  %v5486_v12 = vpack.i.bf16 %v4272_v32, %v988_v51 }
 0x538   : > { %v4275_v54 = vpop.f32.mrb[6].mxu0 }
 0x539   : > { %1080 = vperm.xlu1 %4675, %v4275_v54   ;;  %v998_v13 = vpop.f32.mrb[7].mxu0 }
 0x53a   : > { %1076 = vperm.xlu0 %4642, %v998_v13   ;;  %v5488_v28 = vpack.i.bf16 %v4275_v54, %v998_v13 }
 0x53d   : > { %4676 = vset.pattern.permute.xlu1 %v6808_v14 }
 0x53e   : > { %1041 = vperm.xlu1 %4676, %v988_v51  }
 0x542   : > { %1046 = vperm.xlu1 %4676, %v4272_v32  }
 0x546   : > { %1051 = vperm.xlu1 %4676, %v998_v13  }
 0x54a   : > { %1056 = vperm.xlu1 %4676, %v4275_v54  }
 0x54e   : > { %4678 = vrot.lane.b32.xlu1 %v5486_v12, %s5140_s14 }
 0x558   : > { %1007 = vxpose.xlu0.b32.start [1/4] (short) (narrow) %v988_v51, 8 }
 0x55c   : > { %1008 = vxpose.xlu0.b32.cont [2/4] (short) (narrow) %v4272_v32, 8 }
 0x560   : > { %1009 = vxpose.xlu0.b32.cont [3/4] (short) (narrow) %v998_v13, 8 }
 0x564   : > { %1010 = vxpose.xlu0.b32.end [4/4] (short) (narrow) %v4275_v54, 8 }
 0x57f   : > { %v1073_v38 = vpop.permute.xlu1 %1072 }
 0x580   : > { %v1069_v55 = vpop.permute.xlu0 %1068 }
 0x5b8   : > { %v1081_v33 = vpop.permute.xlu1 %1080 }
 0x5b9   : > { %v1077_v57 = vpop.permute.xlu0 %1076 }
 0x5bd   : > { %v1042_v56 = vpop.permute.xlu1 %1041 }
 0x5c1   : > { %v1047_v62 = vpop.permute.xlu1 %1046 }
 0x5c5   : > { %v1052_v40 = vpop.permute.xlu1 %1051 }
 0x5c9   : > { %v1057_v30 = vpop.permute.xlu1 %1056 }
 0x5d8   : > { %v1023_v63 = vpop.trf.xlu0 }
 0x5d9   : > { %v1062_v0 = vrot.slane %v1023_v63, %v5308_v24  ;;  %v1086_v1 = vrot.slane %v1023_v63, %v5311_v25 }
 0x5db   : > { %v1088_v5 = vadd.f32 %v1086_v1, %v1073_v38  ;;  %v1064_v59 = vadd.f32 %v1062_v0, %v1047_v62  ;;  %v1087_v45 = vadd.f32 %v1086_v1, %v1069_v55  ;;  %v1063_v9 = vadd.f32 %v1062_v0, %v1042_v56 }
 0x5dc   : > { %v1090_v8 = vadd.f32 %v1086_v1, %v1081_v33  ;;  %v1066_v44 = vadd.f32 %v1062_v0, %v1057_v30  ;;  %v1089_v50 = vadd.f32 %v1086_v1, %v1077_v57  ;;  %v1065_v63 = vadd.f32 %v1062_v0, %v1052_v40 }
 0x5dd   : > { %vm1096_vm11 = vcmp.ge.f32.partialorder %v1088_v5, 0.0  ;;  %v1104_v7 = vmul.f32 0.2, %v1088_v5  ;;  %vm1092_vm12 = vcmp.ge.f32.partialorder %v1064_v59, 0.0  ;;  %v1100_v52 = vmul.f32 0.2, %v1064_v59 }
 0x5de   : > { %vm1095_vm13 = vcmp.ge.f32.partialorder %v1087_v45, 0.0  ;;  %v1103_v2 = vmul.f32 0.2, %v1087_v45  ;;  %v1099_v26 = vmul.f32 0.2, %v1063_v9  ;;  %vm1091_vm14 = vcmp.ge.f32.partialorder %v1063_v9, 0.0 }
 0x5df   : > { %v1112_v11 = vsel %vm1096_vm11, %v1088_v5, %v1104_v7  ;;  %v1108_v18 = vsel %vm1092_vm12, %v1064_v59, %v1100_v52  ;;  %v1106_v37 = vmul.f32 0.2, %v1090_v8  ;;  %vm1098_vm15 = vcmp.ge.f32.partialorder %v1090_v8, 0.0 }
 0x5e0   : > { %v1120_v19 = vadd.f32 %v1112_v11, %v5333_v41  ;;  %v1116_v21 = vadd.f32 %v1108_v18, %v5335_v42  ;;  %v1111_v29 = vsel %vm1095_vm13, %v1087_v45, %v1103_v2  ;;  %v1107_v36 = vsel %vm1091_vm14, %v1063_v9, %v1099_v26  ;;  %v4679_v9 = vpop.permute.xlu1 %4678 }
 0x5e1   : > { %v1119_v10 = vadd.f32 %v1111_v29, %v5338_v46  ;;  %v1115_v47 = vadd.f32 %v1107_v36, %v5352_v60  ;;  %v1114_v48 = vsel %vm1098_vm15, %v1090_v8, %v1106_v37  ;;  %v1102_v49 = vmul.f32 0.2, %v1066_v44 }
 0x5e2   : > { %v1138_v34 = vsel %vm644_vm3, %v1120_v19, -inf  ;;  %v1126_v58 = vsel %vm644_vm3, %v1116_v21, -inf  ;;  %vm1094_vm0 = vcmp.ge.f32.partialorder %v1066_v44, 0.0  ;;  %v1122_v51 = vadd.f32 %v1114_v48, %v5360_v4 }
 0x5e3   : > { %1139 = vmax.xlane.f32.xlu0 %v1138_v34  ;;  %1127 = vmax.xlane.f32.xlu1 %v1126_v58  ;;  %v1135_v53 = vsel %vm644_vm3, %v1119_v10, -inf  ;;  %v1123_v32 = vsel %vm644_vm3, %v1115_v47, -inf  ;;  %v1110_v54 = vsel %vm1094_vm0, %v1066_v44, %v1102_v49  ;;  %v1105_v13 = vmul.f32 0.2, %v1089_v50 }
 0x5e4   : > { %vm1097_vm1 = vcmp.ge.f32.partialorder %v1089_v50, 0.0  ;;  %v1144_v38 = vsel %vm644_vm3, %v1122_v51, -inf  ;;  %v5506_v33 = vadd.f32 %v1110_v54, %v5369_v15  ;;  %v1101_v1 = vmul.f32 0.2, %v1065_v63 }
 0x5e5   : > { %v1113_v55 = vsel %vm1097_vm1, %v1089_v50, %v1105_v13  ;;  %vm1093_vm2 = vcmp.ge.f32.partialorder %v1065_v63, 0.0 }
 0x5e6   : > { %v1132_v56 = vsel %vm644_vm3, %v5506_v33, -inf  ;;  %v5511_v57 = vadd.f32 %v1113_v55, %v5376_v16  ;;  %v1109_v5 = vsel %vm1093_vm2, %v1065_v63, %v1101_v1 }
 0x5e7   : > { %1136 = vmax.xlane.f32.xlu1 %v1135_v53  ;;  %v5520_v59 = vadd.f32 %v1109_v5, %v5395_v43 }
 0x5e8   : > { %v1141_v62 = vsel %vm644_vm3, %v5511_v57, -inf }
 0x5e9   : > { %v1129_v45 = vsel %vm644_vm3, %v5520_v59, -inf }
 0x5eb   : > { %1124 = vmax.xlane.f32.xlu1 %v1123_v32 }
 0x5ef   : > { %1145 = vmax.xlane.f32.xlu1 %v1144_v38 }
 0x5f3   : > { %1133 = vmax.xlane.f32.xlu1 %v1132_v56 }
 0x5f7   : > { %1142 = vmax.xlane.f32.xlu1 %v1141_v62 }
 0x5f9   : > { %4683 = vrot.lane.b32.xlu0 %v5488_v28, %s5140_s14  ;;  %s346_s14 = sand.u32 1, %s5128_s10  }
 0x608   : > { %4688 = vrot.lane.b32.xlu1 %v5486_v12, %s5141_s23 }
 0x62c   : > { %1130 = vmax.xlane.f32.xlu1 %v1129_v45 }
 0x670   : > { %v1140_v7 = vpop.xlane.xlu0 %1139  ;;  %v1128_v52 = vpop.xlane.xlu1 %1127 }
 0x671   : > { %v1152_v2 = vsub.f32 %v1120_v19, %v1140_v7  ;;  %v1148_v11 = vsub.f32 %v1116_v21, %v1128_v52 }
 0x673   : > { %v1165_v18 = vmul.f32 1.442695, %v1152_v2  ;;  %v1157_v26 = vmul.f32 1.442695, %v1148_v11 }
 0x674   : > { %v1137_v8 = vpop.xlane.xlu1 %1136 }
 0x675   : > { %4882 = vpow2.f32 %v1165_v18  ;;  %v1151_v12 = vsub.f32 %v1119_v10, %v1137_v8 }
 0x676   : > { %4884 = vpow2.f32 %v1157_v26 }
 0x677   : > { %v1163_v0 = vmul.f32 1.442695, %v1151_v12 }
 0x678   : > { %v1125_v40 = vpop.xlane.xlu1 %1124 }
 0x679   : > { %4886 = vpow2.f32 %v1163_v0  ;;  %v1147_v29 = vsub.f32 %v1115_v47, %v1125_v40 }
 0x67b   : > { %v1155_v30 = vmul.f32 1.442695, %v1147_v29 }
 0x67c   : > { %v1146_v34 = vpop.xlane.xlu1 %1145 }
 0x67d   : > { %4888 = vpow2.f32 %v1155_v30  ;;  %v1154_v58 = vsub.f32 %v1122_v51, %v1146_v34 }
 0x67f   : > { %v4883_v36 = vpop.eup %4882  ;;  %v1169_v37 = vmul.f32 1.442695, %v1154_v58 }
 0x680   : > { %v4885_v44 = vpop.eup %4884  ;;  %v1134_v53 = vpop.xlane.xlu1 %1133  ;;  %v5525_v19 = vmul.f32 %v4883_v36, %v5305_v23 }
 0x681   : > { %4890 = vpow2.f32 %v1169_v37  ;;  %v5528_v21 = vmul.f32 %v4885_v44, %v5302_v22  ;;  %v1150_v63 = vsub.f32 %v5506_v33, %v1134_v53  ;;  %v4684_v33 = vpop.permute.xlu0 %4683 }
 0x682   : > { %v1194_v10 = vsel %vm644_vm3, %v5525_v19, 0.0 }
 0x683   : > { %v4887_v48 = vpop.eup %4886  ;;  %v1182_v47 = vsel %vm644_vm3, %v5528_v21, 0.0  ;;  %1195 = vadd.xlane.f32.xlu1 %v1194_v10  ;;  %v1161_v5 = vmul.f32 1.442695, %v1150_v63 }
 0x684   : > { %1183 = vadd.xlane.f32.xlu0 %v1182_v47  ;;  %v1143_v49 = vpop.xlane.xlu1 %1142  ;;  %v5535_v50 = vmul.f32 %v4887_v48, %v5314_v27 }
 0x686   : > { %v1191_v23 = vsel %vm644_vm3, %v5535_v50, 0.0 }
 0x687   : > { %v4889_v32 = vpop.eup %4888  ;;  %1192 = vadd.xlane.f32.xlu1 %v1191_v23 }
 0x688   : > { %v4689_v22 = vpop.permute.xlu1 %4688  ;;  %v5540_v51 = vmul.f32 %v4889_v32, %v5319_v31  ;;  %v1153_v31 = vsub.f32 %v5511_v57, %v1143_v49 }
 0x689   : > { %v4691_v54 = vunpack.i.h.bf16 %v4689_v22  ;;  %v4690_v13 = vunpack.i.l.bf16 %v4689_v22 }
 0x68a   : > { %v1179_v38 = vsel %vm644_vm3, %v5540_v51, 0.0  ;;  %v1167_v1 = vmul.f32 1.442695, %v1153_v31 }
 0x68b   : > { %v4891_v55 = vpop.eup %4890  ;;  %1180 = vadd.xlane.f32.xlu1 %v1179_v38  ;;  %v4466_v56 = vpack.c.bf16 %v4691_v54, %v4690_v13 }
 0x68c   : > { %v1178_v27 = vmul.f32 %v4891_v55, %v5329_v39  ;;  %4892 = vpow2.f32 %v1167_v1 }
 0x68d   : > { %4467 = vmatprep.subr.bf16.mxu0 %v4466_v56  ;;  %4894 = vpow2.f32 %v1161_v5 }
 0x68e   : > { %4469 = vmatpush3.bf16.msra.mxu0 %v4466_v56  ;;  %v1200_v62 = vsel %vm644_vm3, %v1178_v27, 0.0  ;;  %v1388_v56 = vld [vmem:[%s6804_s6 + $0x8] sm:$0xff] }
 0x68f   : > { %1201 = vadd.xlane.f32.xlu0 %v1200_v62 }
 0x696   : > { %v4893_v45 = vpop.eup %4892 }
 0x697   : > { %v5552_v39 = vmul.f32 %v4893_v45, %v5364_v6  ;;  %v4895_v7 = vpop.eup %4894 }
 0x699   : > { %v1197_v52 = vsel %vm644_vm3, %v5552_v39, 0.0 }
 0x69c   : > { %4698 = vrot.lane.b32.xlu1 %v4679_v9, %s5141_s23  ;;  %v5557_v9 = vmul.f32 %v4895_v7, %v5355_v61 }
 0x6a5   : > { %4693 = vrot.lane.b32.xlu0 %v5488_v28, %s5141_s23  ;;  %v1188_v28 = vsel %vm644_vm3, %v5557_v9, 0.0 }
 0x6b9   : > { %v1131_v57 = vpop.xlane.xlu1 %1130 }
 0x6ba   : > { %v1149_v2 = vsub.f32 %v5520_v59, %v1131_v57 }
 0x6bc   : > { %v1159_v6 = vmul.f32 1.442695, %v1149_v2 }
 0x6be   : > { %4896 = vpow2.f32 %v1159_v6 }
 0x6c0   : > { %1198 = vadd.xlane.f32.xlu1 %v1197_v52 }
 0x6c4   : > { %1189 = vadd.xlane.f32.xlu0 %v1188_v28 }
 0x6c8   : > { %v4897_v11 = vpop.eup %4896 }
 0x6c9   : > { %v5564_v18 = vmul.f32 %v4897_v11, %v5390_v35 }
 0x6cb   : > { %v1185_v61 = vsel %vm644_vm3, %v5564_v18, 0.0 }
 0x6d1   : > { %4703 = vrot.lane.b32.xlu1 %v4684_v33, %s5141_s23  ;;  %s3971_s23 = sshll.u32 %s346_s14, 5 }
 0x6d2   : > { %s5607_s27 = scalar_lea.vmem [#allocation2], %s3971_s23  ;;  %s5154_s23 = smov 94  }
 0x6f5   : > { %1186 = vadd.xlane.f32.xlu1 %v1185_v61 }
 0x710   : > { %v1196_v26 = vpop.xlane.xlu1 %1195 }
 0x711   : > { %v1208_v8 = vmax.f32 %v1196_v26, 1e-30  ;;  %v1184_v40 = vpop.xlane.xlu0 %1183 }
 0x712   : > { %v1204_v5 = vmax.f32 %v1184_v40, 1e-30 }
 0x713   : > { %4898 = vrcp.f32 %v1208_v8 }
 0x714   : > { %v1193_v12 = vpop.xlane.xlu1 %1192 }
 0x715   : > { %v1207_v0 = vmax.f32 %v1193_v12, 1e-30 }
 0x717   : > { %4900 = vrcp.f32 %v1207_v0 }
 0x718   : > { %v1181_v29 = vpop.xlane.xlu1 %1180 }
 0x719   : > { %v1203_v1 = vmax.f32 %v1181_v29, 1e-30 }
 0x71c   : > { %v1202_v30 = vpop.xlane.xlu0 %1201  ;;  %v4699_v58 = vpop.permute.xlu1 %4698 }
 0x71d   : > { %v4899_v59 = vpop.eup %4898  ;;  %v1210_v34 = vmax.f32 %v1202_v30, 1e-30  ;;  %v4701_v44 = vunpack.i.h.bf16 %v4699_v58  ;;  %v4700_v53 = vunpack.i.l.bf16 %v4699_v58  ;;  %v5144_v58 = vmov 11  }
 0x71e   : > { %v1224_v36 = vmul.f32 %v4899_v59, %v5525_v19  ;;  %v1389_v59 = vld [vmem:[%s6804_s6 + $0x10] sm:$0xff]  ;;  %4708 = vset.pattern.permute.xlu0 %v5144_v58 }
 0x71f   : > { %4902 = vrcp.f32 %v1210_v34  ;;  %v4474_v23 = vpack.c.bf16 %v4701_v44, %v4700_v53 }
 0x720   : > { %v4694_v35 = vpop.permute.xlu0 %4693  ;;  %1241 = vrot.lane.b32.xlu1 %v1224_v36, %s5142_s24  ;;  %v4015_v36 = vld [vmem:[%s6803_s5] ss:$0 sm:$0xff] }
 0x721   : > { %v4901_v37 = vpop.eup %4900  ;;  %v4696_v10 = vunpack.i.h.bf16 %v4694_v35  ;;  %v4695_v48 = vunpack.i.l.bf16 %v4694_v35 }
 0x722   : > { %v1223_v47 = vmul.f32 %v4901_v37, %v5535_v50  ;;  %v1387_v50 = vld [vmem:[%s6804_s6] sm:$0xff] }
 0x723   : > { %v4470_v49 = vpack.c.bf16 %v4696_v10, %v4695_v48  ;;  %v4482_v62 = vpack.c.bf16 %v1388_v56, %v1387_v50  ;;  %v5150_v50 = vmov 10  }
 0x724   : > { %1239 = vrot.lane.b32.xlu0 %v1223_v47, %s5142_s24 }
 0x725   : > { %4471 = vmatprep.subr.bf16.mxu0 %v4470_v49  ;;  %4483 = vmatprep.subr.bf16.mxu1 %v4482_v62 }
 0x726   : > { %4473 = vmatpush3.bf16.msra.mxu0 %v4470_v49  ;;  %4485 = vmatpush3.bf16.msra.mxu1 %v4482_v62 }
 0x727   : > { %4475 = vmatprep.subr.bf16.mxu0 %v4474_v23 }
 0x729   : > { %v4903_v32 = vpop.eup %4902 }
 0x72a   : > { %4477 = vmatpush3.bf16.msra.mxu0 %v4474_v23  ;;  %v1226_v19 = vmul.f32 %v4903_v32, %v1178_v27 }
 0x72c   : > { %1245 = vrot.lane.b32.xlu1 %v1226_v19, %s5142_s24 }
 0x74d   : > { %v1199_v22 = vpop.xlane.xlu1 %1198 }
 0x74e   : > { %v1209_v54 = vmax.f32 %v1199_v22, 1e-30  ;;  %v5145_v22 = vmov 15  }
 0x750   : > { %4904 = vrcp.f32 %v1209_v54  ;;  %v5146_v54 = vmov 13  }
 0x751   : > { %v4704_v13 = vpop.permute.xlu1 %4703  ;;  %4906 = vrcp.f32 %v1203_v1  ;;  %v1190_v52 = vpop.xlane.xlu0 %1189 }
 0x752   : > { %v4706_v38 = vunpack.i.h.bf16 %v4704_v13  ;;  %v4705_v55 = vunpack.i.l.bf16 %v4704_v13  ;;  %4908 = vrcp.f32 %v1204_v5  ;;  %v1206_v26 = vmax.f32 %v1190_v52, 1e-30 }
 0x753   : > { %v5147_v13 = vmov 12  }
 0x754   : > { %v4478_v31 = vpack.c.bf16 %v4706_v38, %v4705_v55  ;;  %v5148_v38 = vmov 8   ;;  %v5149_v55 = vmov 14  }
 0x756   : > { %4479 = vmatprep.subr.bf16.mxu0 %v4478_v31 }
 0x757   : > { %4481 = vmatpush3.bf16.msra.mxu0 %v4478_v31 }
 0x75a   : > { %v4905_v27 = vpop.eup %4904 }
 0x75b   : > { %v1225_v63 = vmul.f32 %v4905_v27, %v5552_v39  ;;  %v4907_v7 = vpop.eup %4906 }
 0x75c   : > { %v4909_v28 = vpop.eup %4908  ;;  %v1219_v57 = vmul.f32 %v4907_v7, %v5540_v51 }
 0x75d   : > { %1243 = vrot.lane.b32.xlu0 %v1225_v63, %s5142_s24  ;;  %v1220_v2 = vmul.f32 %v4909_v28, %v5528_v21 }
 0x782   : > { %v1187_v45 = vpop.xlane.xlu1 %1186 }
 0x783   : > { %v1205_v61 = vmax.f32 %v1187_v45, 1e-30 }
 0x785   : > { %4910 = vrcp.f32 %v1205_v61 }
 0x786   : > { %4912 = vrcp.f32 %v1206_v26 }
 0x78f   : > { %v4911_v8 = vpop.eup %4910 }
 0x790   : > { %v4913_v12 = vpop.eup %4912  ;;  %v1221_v51 = vmul.f32 %v4911_v8, %v5564_v18  ;;  %v1390_v18 = vld [vmem:[%s6804_s6 + $0x18] sm:$0xff] }
 0x791   : > { %v1222_v21 = vmul.f32 %v4913_v12, %v5557_v9  ;;  %v4486_v34 = vpack.c.bf16 %v1390_v18, %v1389_v59  ;;  %v5143_v9 = vmov 9  }
 0x792   : > { %v1242_v33 = vpop.permute.xlu1 %1241  ;;  %4707 = vset.pattern.permute.xlu1 %v5143_v9 }
 0x793   : > { %v1252_v39 = vsel %vm644_vm3, %v1220_v2, %v1242_v33  ;;  %4487 = vmatprep.subr.bf16.mxu1 %v4486_v34 }
 0x794   : > { %4489 = vmatpush3.bf16.msra.mxu1 %v4486_v34 }
 0x796   : > { %v1240_v6 = vpop.permute.xlu0 %1239 }
 0x797   : > { %v1251_v11 = vsel %vm644_vm3, %v1219_v57, %v1240_v6 }
 0x798   : > { %4292 = vmatprep.mubr.msk.f32.mxu0 %vm808_vm10, %v1251_v11 }
 0x799   : > { %4293 = vmatmul.mubr.msk.f32.vlgmr.msra.gmra.mrb[8].mxu0 %vm808_vm10, %v1252_v39 }
 0x79e   : > { %v1246_v0 = vpop.permute.xlu1 %1245 }
 0x79f   : > { %v1254_v30 = vsel %vm644_vm3, %v1222_v21, %v1246_v0 }
 0x7cf   : > { %v1244_v40 = vpop.permute.xlu0 %1243 }
 0x7d0   : > { %v1253_v29 = vsel %vm644_vm3, %v1221_v51, %v1244_v40 }
 0x7d1   : > { %4295 = vmatprep.mubr.msk.f32.mxu0 %vm808_vm10, %v1253_v29 }
 0x7d2   : > { %4296 = vmatmul.mubr.msk.f32.gmra.mrb[10].mxu0 %vm808_vm10, %v1254_v30 }
 0x86c   : > { %v4294_v35 = vpop.f32.mrb[8].mxu0 }
 0x86d   : > { %v1370_v37 = vadd.f32 %v4294_v35, %v4015_v36  ;;  %v1364_v44 = vpop.f32.mrb[9].mxu0 }
 0x86e   : > { %v1365_v53 = vadd.f32 %v4015_v36, %v1364_v44 }
 0x86f   : > { %1384 = vst.msk [vmem:[%s5607_s27 + $0x8] sm:$0xff] %vm644_vm3, %v1370_v37 }
 0x870   : > { %1383 = vst.msk [vmem:[%s5607_s27] sm:$0xff] %vm644_vm3, %v1365_v53  ;;  %4306 = vmatprep.mubr.msk.f32.mxu1 %vm644_vm3, %v1365_v53 }
 0x871   : > { %4307 = vmatmul.mubr.msk.f32.vlgmr.msra.gmra.mrb[4].mxu1 %vm644_vm3, %v1370_v37 }
 0x8a5   : > { %v4297_v10 = vpop.f32.mrb[10].mxu0 }
 0x8a6   : > { %v1380_v48 = vadd.f32 %v4297_v10, %v4015_v36  ;;  %v1374_v47 = vpop.f32.mrb[11].mxu0 }
 0x8a7   : > { %v1375_v49 = vadd.f32 %v4015_v36, %v1374_v47 }
 0x8a8   : > { %1386 = vst.msk [vmem:[%s5607_s27 + $0x18] sm:$0xff] %vm644_vm3, %v1380_v48 }
 0x8a9   : > { %1385 = vst.msk [vmem:[%s5607_s27 + $0x10] sm:$0xff] %vm644_vm3, %v1375_v49  ;;  %4309 = vmatprep.mubr.msk.f32.mxu1 %vm644_vm3, %v1375_v49 }
 0x8aa   : > { %4310 = vmatmul.mubr.msk.f32.gmra.mrb[6].mxu1 %vm644_vm3, %v1380_v48 }
 0x944   : > { %v5621_v23 = vpop.f32.mrb[4].mxu1 }
 0x945   : > { %1601 = vperm.xlu0 %4708, %v5621_v23   ;;  %1553 = vperm.xlu1 %4707, %v5621_v23   ;;  %v5625_v32 = vpop.f32.mrb[5].mxu1 }
 0x946   : > { %v4723_v19 = vpack.i.bf16 %v5621_v23, %v5625_v32 }
 0x949   : > { %4710 = vset.pattern.permute.xlu0 %v5145_v22  ;;  %4709 = vset.pattern.permute.xlu1 %v5146_v54 }
 0x94a   : > { %1697 = vperm.xlu0 %4710, %v5621_v23   ;;  %1649 = vperm.xlu1 %4709, %v5621_v23  }
 0x94e   : > { %4713 = vset.pattern.permute.xlu0 %v5147_v13  ;;  %4711 = vset.pattern.permute.xlu1 %v5148_v38 }
 0x94f   : > { %1625 = vperm.xlu0 %4713, %v5621_v23   ;;  %1527 = vperm.xlu1 %4711, %v5621_v23  }
 0x953   : > { %4714 = vset.pattern.permute.xlu0 %v5149_v55  ;;  %4712 = vset.pattern.permute.xlu1 %v5150_v50 }
 0x954   : > { %1673 = vperm.xlu0 %4714, %v5621_v23   ;;  %1577 = vperm.xlu1 %4712, %v5621_v23  }
 0x958   : > { %4715 = vset.pattern.permute.xlu0 %v5143_v9  ;;  %4716 = vset.pattern.permute.xlu1 %v5144_v58 }
 0x959   : > { %1597 = vperm.xlu1 %4716, %v5625_v32   ;;  %1549 = vperm.xlu0 %4715, %v5625_v32  }
 0x95d   : > { %4718 = vset.pattern.permute.xlu1 %v5145_v22  ;;  %4717 = vset.pattern.permute.xlu0 %v5146_v54 }
 0x95e   : > { %1693 = vperm.xlu1 %4718, %v5625_v32   ;;  %1645 = vperm.xlu0 %4717, %v5625_v32  }
 0x962   : > { %4719 = vset.pattern.permute.xlu1 %v5148_v38  ;;  %4724 = vrot.lane.b32.xlu0 %v4723_v19, %s5151_s28 }
 0x963   : > { %1522 = vperm.xlu1 %4719, %v5625_v32   ;;  %4757 = vset.pattern.permute.xlu0 %v5144_v58 }
 0x966   : > { %4729 = vrot.lane.b32.xlu0 %v4723_v19, %s5152_s29 }
 0x967   : > { %4720 = vset.pattern.permute.xlu1 %v5150_v50 }
 0x968   : > { %1573 = vperm.xlu1 %4720, %v5625_v32  }
 0x96a   : > { %4739 = vrot.lane.b32.xlu0 %v4723_v19, %s5153_s16 }
 0x96c   : > { %4721 = vset.pattern.permute.xlu1 %v5147_v13 }
 0x96d   : > { %1621 = vperm.xlu1 %4721, %v5625_v32  }
 0x96e   : > { %4744 = vrot.lane.b32.xlu0 %v4723_v19, %s5154_s23 }
 0x971   : > { %4722 = vset.pattern.permute.xlu1 %v5149_v55 }
 0x972   : > { %1669 = vperm.xlu1 %4722, %v5625_v32  }
 0x976   : > { %4734 = vrot.lane.b32.xlu1 %v4723_v19, %s5155_s17 }
 0x977   : > { %4748 = vset.pattern.permute.xlu1 %v5143_v9 }
 0x97d   : > { %v4311_v56 = vpop.f32.mrb[6].mxu1 }
 0x97e   : > { %1561 = vperm.xlu1 %4748, %v4311_v56   ;;  %v1479_v62 = vpop.f32.mrb[7].mxu1 }
 0x97f   : > { %1605 = vperm.xlu0 %4757, %v1479_v62   ;;  %v4769_v31 = vpack.i.bf16 %v4311_v56, %v1479_v62 }
 0x982   : > { %4749 = vset.pattern.permute.xlu1 %v5144_v58 }
 0x983   : > { %1609 = vperm.xlu1 %4749, %v4311_v56   ;;  %4759 = vset.pattern.permute.xlu0 %v5145_v22 }
 0x984   : > { %1701 = vperm.xlu0 %4759, %v1479_v62  }
 0x987   : > { %4750 = vset.pattern.permute.xlu1 %v5146_v54 }
 0x988   : > { %1657 = vperm.xlu1 %4750, %v4311_v56   ;;  %4770 = vrot.lane.b32.xlu0 %v4769_v31, %s5152_s29 }
 0x98c   : > { %4751 = vset.pattern.permute.xlu1 %v5145_v22  ;;  %4780 = vrot.lane.b32.xlu0 %v4769_v31, %s5153_s16 }
 0x98d   : > { %1705 = vperm.xlu1 %4751, %v4311_v56  }
 0x991   : > { %4752 = vset.pattern.permute.xlu1 %v5148_v38 }
 0x992   : > { %1537 = vperm.xlu1 %4752, %v4311_v56  }
 0x996   : > { %4753 = vset.pattern.permute.xlu1 %v5150_v50 }
 0x997   : > { %1585 = vperm.xlu1 %4753, %v4311_v56  }
 0x99b   : > { %4754 = vset.pattern.permute.xlu1 %v5147_v13 }
 0x99c   : > { %1633 = vperm.xlu1 %4754, %v4311_v56  }
 0x9a0   : > { %4755 = vset.pattern.permute.xlu1 %v5149_v55 }
 0x9a1   : > { %1681 = vperm.xlu1 %4755, %v4311_v56  }
 0x9a5   : > { %4756 = vset.pattern.permute.xlu1 %v5143_v9 }
 0x9a6   : > { %1557 = vperm.xlu1 %4756, %v1479_v62  }
 0x9aa   : > { %1488 = vxpose.xlu0.b32.start [1/4] (short) (narrow) %v5625_v32, 8  ;;  %4758 = vset.pattern.permute.xlu1 %v5146_v54 }
 0x9ab   : > { %1653 = vperm.xlu1 %4758, %v1479_v62  }
 0x9ae   : > { %1489 = vxpose.xlu0.b32.cont [2/4] (short) (narrow) %v5621_v23, 8 }
 0x9af   : > { %4760 = vset.pattern.permute.xlu1 %v5148_v38 }
 0x9b0   : > { %1532 = vperm.xlu1 %4760, %v1479_v62  }
 0x9b2   : > { %1490 = vxpose.xlu0.b32.cont [3/4] (short) (narrow) %v1479_v62, 8 }
 0x9b4   : > { %4761 = vset.pattern.permute.xlu1 %v5150_v50 }
 0x9b5   : > { %1581 = vperm.xlu1 %4761, %v1479_v62  }
 0x9b6   : > { %1491 = vxpose.xlu0.b32.end [4/4] (short) (narrow) %v4311_v56, 8 }
 0x9b9   : > { %4762 = vset.pattern.permute.xlu1 %v5147_v13 }
 0x9ba   : > { %1629 = vperm.xlu1 %4762, %v1479_v62  }
 0x9be   : > { %4763 = vset.pattern.permute.xlu1 %v5149_v55 }
 0x9bf   : > { %1677 = vperm.xlu1 %4763, %v1479_v62  }
 0x9c3   : > { %4765 = vrot.lane.b32.xlu1 %v4769_v31, %s5151_s28 }
 0x9c4   : > { %v5679_v27 = vpop.permute.xlu0 %1601  ;;  %v5681_v63 = vpop.permute.xlu1 %1553 }
 0x9c7   : > { %4775 = vrot.lane.b32.xlu1 %v4769_v31, %s5155_s17 }
 0x9c9   : > { %v5684_v1 = vpop.permute.xlu0 %1697  ;;  %v5686_v5 = vpop.permute.xlu1 %1649 }
 0x9cb   : > { %4785 = vrot.lane.b32.xlu1 %v4769_v31, %s5154_s23 }
 0x9ce   : > { %v5689_v45 = vpop.permute.xlu0 %1625  ;;  %v5691_v7 = vpop.permute.xlu1 %1527 }
 0x9d3   : > { %v5693_v52 = vpop.permute.xlu0 %1673  ;;  %v5695_v28 = vpop.permute.xlu1 %1577 }
 0x9d8   : > { %v5697_v33 = vpop.permute.xlu1 %1597  ;;  %v5699_v57 = vpop.permute.xlu0 %1549 }
 0x9dd   : > { %v5701_v2 = vpop.permute.xlu1 %1693  ;;  %v5703_v6 = vpop.permute.xlu0 %1645 }
 0x9e1   : > { %v5705_v11 = vpop.permute.xlu0 %4724 }
 0x9e2   : > { %v5707_v39 = vpop.permute.xlu1 %1522  ;;  %4790 = vrot.lane.b32.xlu0 %v5705_v11, %s5152_s29  ;;  %4795 = vrot.lane.b32.xlu1 %v5705_v11, %s5155_s17 }
 0x9e5   : > { %v4730_v61 = vpop.permute.xlu0 %4729 }
 0x9e6   : > { %v4732_v26 = vunpack.i.h.bf16 %v4730_v61  ;;  %v4731_v8 = vunpack.i.l.bf16 %v4730_v61 }
 0x9e7   : > { %v5713_v12 = vpop.permute.xlu1 %1573 }
 0x9e8   : > { %v4490_v0 = vpack.c.bf16 %v4732_v26, %v4731_v8 }
 0x9e9   : > { %v5719_v40 = vpop.permute.xlu0 %4739 }
 0x9ea   : > { %4491 = vmatprep.subr.bf16.mxu1 %v4490_v0 }
 0x9eb   : > { %4493 = vmatpush3.bf16.msra.mxu1 %v4490_v0 }
 0x9ec   : > { %v5715_v51 = vpop.permute.xlu1 %1621 }
 0x9ed   : > { %v5721_v34 = vpop.permute.xlu0 %4744 }
 0x9f1   : > { %v5717_v21 = vpop.permute.xlu1 %1669 }
 0x9f5   : > { %v4735_v29 = vpop.permute.xlu1 %4734 }
 0x9f6   : > { %v4737_v30 = vunpack.i.h.bf16 %v4735_v29  ;;  %v4736_v59 = vunpack.i.l.bf16 %v4735_v29  ;;  %v1662_v29 = vsub.s32 5, %v5294_v20 }
 0x9f8   : > { %v4506_v18 = vpack.c.bf16 %v4737_v30, %v4736_v59  ;;  %v6816_v59 = vsub.s32 3, %v5294_v20 }
 0x9fa   : > { %4507 = vmatprep.subr.bf16.mxu0 %v4506_v18 }
 0x9fb   : > { %4509 = vmatpush3.bf16.msra.mxu0 %v4506_v18 }
 0x9fd   : > { %v5723_v9 = vpop.permute.xlu1 %1561 }
 0x9fe   : > { %v5725_v58 = vpop.permute.xlu0 %1605 }
 0xa02   : > { %v5727_v36 = vpop.permute.xlu1 %1609 }
 0xa03   : > { %v5729_v35 = vpop.permute.xlu0 %1701 }
 0xa07   : > { %v5731_v37 = vpop.permute.xlu1 %1657  ;;  %v4771_v44 = vpop.permute.xlu0 %4770 }
 0xa08   : > { %v4773_v53 = vunpack.i.h.bf16 %v4771_v44  ;;  %v4772_v10 = vunpack.i.l.bf16 %v4771_v44 }
 0xa0a   : > { %v4494_v48 = vpack.c.bf16 %v4773_v53, %v4772_v10  ;;  %v1710_v53 = vsub.s32 7, %v5294_v20 }
 0xa0b   : > { %v5761_v8 = vpop.permute.xlu0 %4780 }
 0xa0c   : > { %v5733_v47 = vpop.permute.xlu1 %1705  ;;  %4495 = vmatprep.subr.bf16.mxu1 %v4494_v48  ;;  %6833 = vst [vmem:[#allocation9_spill] sm:$0xff] %v5761_v8 }
 0xa0d   : > { %4497 = vmatpush3.bf16.msra.mxu1 %v4494_v48 }
 0xa11   : > { %v5735_v49 = vpop.permute.xlu1 %1537 }
 0xa16   : > { %v5737_v23 = vpop.permute.xlu1 %1585 }
 0xa1b   : > { %v5739_v32 = vpop.permute.xlu1 %1633 }
 0xa20   : > { %v5741_v19 = vpop.permute.xlu1 %1681 }
 0xa25   : > { %v5743_v22 = vpop.permute.xlu1 %1557 }
 0xa2a   : > { %v5745_v54 = vpop.permute.xlu1 %1653  ;;  %v1504_v0 = vpop.trf.xlu0 }
 0xa2b   : > { %v5765_v30 = vrot.slane %v1504_v0, %v5311_v25  ;;  %v5768_v18 = vrot.slane %v1504_v0, %v1662_v29  ;;  %v5777_v48 = vrot.slane %v1504_v0, %v6816_v59  ;;  %v6819_v59 = vsub.s32 2, %v5294_v20 }
 0xa2d   : > { %v1569_v10 = vadd.f32 %v5765_v30, %v5681_v63  ;;  %v1617_v63 = vadd.f32 %v5777_v48, %v5679_v27  ;;  %v1568_v27 = vadd.f32 %v5765_v30, %v5699_v57 }
 0xa2f   : > { %v5747_v13 = vpop.permute.xlu1 %1532  ;;  %v1753_v25 = vmul.f32 0.2, %v1569_v10  ;;  %vm1721_vm4 = vcmp.ge.f32.partialorder %v1569_v10, 0.0  ;;  %vm1729_vm6 = vcmp.ge.f32.partialorder %v1617_v63, 0.0  ;;  %vm1720_vm8 = vcmp.ge.f32.partialorder %v1568_v27, 0.0 }
 0xa34   : > { %v5749_v38 = vpop.permute.xlu1 %1581 }
 0xa39   : > { %v5751_v55 = vpop.permute.xlu1 %1629 }
 0xa3e   : > { %v5753_v50 = vpop.permute.xlu1 %1677 }
 0xa3f   : > { %6831 = vst [vmem:[#allocation7_spill] sm:$0xff] %v5753_v50  ;;  %v5787_v50 = vrot.slane %v1504_v0, %v5308_v24 }
 0xa42   : > { %v5755_v56 = vpop.permute.xlu1 %4765 }
 0xa43   : > { %6832 = vst [vmem:[#allocation8_spill] sm:$0xff] %v5755_v56  ;;  %4805 = vrot.lane.b32.xlu1 %v5755_v56, %s5155_s17  ;;  %4800 = vrot.lane.b32.xlu0 %v5755_v56, %s5152_s29 }
 0xa46   : > { %v4776_v62 = vpop.permute.xlu1 %4775 }
 0xa47   : > { %v4778_v31 = vunpack.i.h.bf16 %v4776_v62  ;;  %v4777_v61 = vunpack.i.l.bf16 %v4776_v62 }
 0xa49   : > { %v4510_v26 = vpack.c.bf16 %v4778_v31, %v4777_v61  ;;  %v1665_v61 = vadd.f32 %v5768_v18, %v5686_v5 }
 0xa4a   : > { %v5770_v44 = vpop.permute.xlu1 %4785 }
 0xa4b   : > { %4511 = vmatprep.subr.bf16.mxu0 %v4510_v26  ;;  %6834 = vst [vmem:[#allocation10_spill] sm:$0xff] %v5770_v44  ;;  %v1769_v56 = vmul.f32 0.2, %v1665_v61  ;;  %vm1737_vm5 = vcmp.ge.f32.partialorder %v1665_v61, 0.0 }
 0xa4c   : > { %4513 = vmatpush3.bf16.msra.mxu0 %v4510_v26  ;;  %v5781_v26 = vrot.slane %v1504_v0, %v1710_v53  ;;  %v5796_v53 = vrot.slane %v1504_v0, %v6819_v59 }
 0xa4e   : > { %v1713_v5 = vadd.f32 %v5781_v26, %v5684_v1  ;;  %v1545_v1 = vadd.f32 %v5787_v50, %v5691_v7 }
 0xa50   : > { %vm1745_vm7 = vcmp.ge.f32.partialorder %v1713_v5, 0.0  ;;  %v1749_v59 = vmul.f32 0.2, %v1545_v1  ;;  %vm1717_vm9 = vcmp.ge.f32.partialorder %v1545_v1, 0.0 }
 0xa54   : > { %v4791_v62 = vpop.permute.xlu0 %4790  ;;  %v4796_v31 = vpop.permute.xlu1 %4795 }
 0xa55   : > { %v4793_v29 = vunpack.i.h.bf16 %v4791_v62  ;;  %v4792_v14 = vunpack.i.l.bf16 %v4791_v62  ;;  %v4798_v3 = vunpack.i.h.bf16 %v4796_v31  ;;  %v4797_v17 = vunpack.i.l.bf16 %v4796_v31 }
 0xa56   : > { %v1801_v62 = vsel %vm1737_vm5, %v1665_v61, %v1769_v56  ;;  %v1593_v61 = vadd.f32 %v5796_v53, %v5695_v28 }
 0xa57   : > { %v4498_v8 = vpack.c.bf16 %v4793_v29, %v4792_v14  ;;  %v4514_v44 = vpack.c.bf16 %v4798_v3, %v4797_v17  ;;  %v1785_v14 = vsel %vm1721_vm4, %v1569_v10, %v1753_v25  ;;  %v1638_v3 = vsub.s32 4, %v5294_v20 }
 0xa58   : > { %v1761_v17 = vmul.f32 0.2, %v1617_v63  ;;  %v5799_v31 = vadd.f32 %v1785_v14, %v5333_v41  ;;  %v1777_v29 = vmul.f32 0.2, %v1713_v5  ;;  %v1686_v25 = vsub.s32 6, %v5294_v20 }
 0xa59   : > { %4499 = vmatprep.subr.bf16.mxu1 %v4498_v8  ;;  %4515 = vmatprep.subr.bf16.mxu0 %v4514_v44  ;;  %v1616_v10 = vadd.f32 %v5777_v48, %v5697_v33  ;;  %v5809_v56 = vrot.slane %v1504_v0, %v1638_v3  ;;  %vm1725_vm12 = vcmp.ge.f32.partialorder %v1593_v61, 0.0 }
 0xa5a   : > { %4501 = vmatpush3.bf16.msra.mxu1 %v4498_v8  ;;  %4517 = vmatpush3.bf16.msra.mxu0 %v4514_v44  ;;  %v5805_v8 = vadd.f32 %v1801_v62, %v5333_v41  ;;  %v1793_v57 = vsel %vm1729_vm6, %v1617_v63, %v1761_v17  ;;  %v1752_v44 = vmul.f32 0.2, %v1568_v27  ;;  %v1859_v7 = vsel %vm644_vm3, %v5799_v31, -inf }
 0xa5b   : > { %v1809_v14 = vsel %vm1745_vm7, %v1713_v5, %v1777_v29  ;;  %v1664_v62 = vadd.f32 %v5768_v18, %v5703_v6  ;;  %v5818_v63 = vadd.f32 %v1793_v57, %v5333_v41  ;;  %v5820_v33 = vrot.slane %v1504_v0, %v1686_v25 }
 0xa5c   : > { %v1907_v3 = vsel %vm644_vm3, %v5805_v8, -inf  ;;  %v1784_v17 = vsel %vm1720_vm8, %v1568_v27, %v1752_v44  ;;  %v1760_v28 = vmul.f32 0.2, %v1616_v10  ;;  %v5825_v24 = vadd.f32 %v1809_v14, %v5333_v41 }
 0xa5d   : > { %vm1728_vm11 = vcmp.ge.f32.partialorder %v1616_v10, 0.0  ;;  %v1757_v5 = vmul.f32 0.2, %v1593_v61  ;;  %v1641_v6 = vadd.f32 %v5809_v56, %v5689_v45  ;;  %v1781_v29 = vsel %vm1717_vm9, %v1545_v1, %v1749_v59 }
 0xa5e   : > { %v1768_v57 = vmul.f32 0.2, %v1664_v62  ;;  %v1712_v0 = vadd.f32 %v5781_v26, %v5701_v2  ;;  %v1883_v25 = vsel %vm644_vm3, %v5818_v63, -inf  ;;  %v5834_v27 = vadd.f32 %v1784_v17, %v5338_v46 }
 0xa5f   : > { %vm1736_vm13 = vcmp.ge.f32.partialorder %v1664_v62, 0.0  ;;  %v1792_v41 = vsel %vm1728_vm11, %v1616_v10, %v1760_v28  ;;  %v1931_v44 = vsel %vm644_vm3, %v5825_v24, -inf  ;;  %v5839_v45 = vadd.f32 %v1781_v29, %v5335_v42 }
 0xa60   : > { %v1789_v59 = vsel %vm1725_vm12, %v1593_v61, %v1757_v5  ;;  %v1765_v1 = vmul.f32 0.2, %v1641_v6  ;;  %vm1733_vm14 = vcmp.ge.f32.partialorder %v1641_v6, 0.0  ;;  %v1776_v2 = vmul.f32 0.2, %v1712_v0 }
 0xa61   : > { %v1689_v14 = vadd.f32 %v5820_v33, %v5693_v52  ;;  %v5846_v10 = vadd.f32 %v1792_v41, %v5338_v46  ;;  %vm1744_vm15 = vcmp.ge.f32.partialorder %v1712_v0, 0.0  ;;  %v1544_v17 = vadd.f32 %v5787_v50, %v5707_v39 }
 0xa62   : > { %1860 = vmax.xlane.f32.xlu0 %v1859_v7  ;;  %v1800_v7 = vsel %vm1736_vm13, %v1664_v62, %v1768_v57  ;;  %v1847_v61 = vsel %vm644_vm3, %v5839_v45, -inf  ;;  %v5853_v62 = vadd.f32 %v1789_v59, %v5335_v42  ;;  %v1797_v28 = vsel %vm1733_vm14, %v1641_v6, %v1765_v1 }
 0xa63   : > { %v5856_v52 = vadd.f32 %v1800_v7, %v5338_v46  ;;  %v1808_v5 = vsel %vm1744_vm15, %v1712_v0, %v1776_v2  ;;  %v1773_v29 = vmul.f32 0.2, %v1689_v14  ;;  %v1619_v57 = vadd.f32 %v5777_v48, %v5727_v36 }
 0xa64   : > { %v1880_v39 = vsel %vm644_vm3, %v5846_v10, -inf  ;;  %vm1741_vm0 = vcmp.ge.f32.partialorder %v1689_v14, 0.0  ;;  %v1748_v41 = vmul.f32 0.2, %v1544_v17  ;;  %vm1716_vm1 = vcmp.ge.f32.partialorder %v1544_v17, 0.0 }
 0xa65   : > { %v1904_v6 = vsel %vm644_vm3, %v5856_v52, -inf  ;;  %v5869_v0 = vadd.f32 %v1797_v28, %v5335_v42  ;;  %v5872_v36 = vadd.f32 %v1808_v5, %v5338_v46  ;;  %v1763_v59 = vmul.f32 0.2, %v1619_v57 }
 0xa66   : > { %1908 = vmax.xlane.f32.xlu0 %v1907_v3  ;;  %v1856_v3 = vsel %vm644_vm3, %v5834_v27, -inf  ;;  %v1667_v7 = vadd.f32 %v5768_v18, %v5731_v37  ;;  %v1780_v2 = vsel %vm1716_vm1, %v1544_v17, %v1748_v41  ;;  %vm1731_vm2 = vcmp.ge.f32.partialorder %v1619_v57, 0.0 }
 0xa67   : > { %1884 = vmax.xlane.f32.xlu1 %v1883_v25  ;;  %v1592_v25 = vadd.f32 %v5796_v53, %v5713_v12  ;;  %v1805_v12 = vsel %vm1741_vm0, %v1689_v14, %v1773_v29  ;;  %v1928_v46 = vsel %vm644_vm3, %v5872_v36, -inf  ;;  %v5886_v28 = vadd.f32 %v1780_v2, %v5352_v60 }
 0xa68   : > { %v5883_v14 = vadd.f32 %v1805_v12, %v5335_v42  ;;  %v1795_v37 = vsel %vm1731_vm2, %v1619_v57, %v1763_v59  ;;  %v1771_v5 = vmul.f32 0.2, %v1667_v7  ;;  %vm1739_vm5 = vcmp.ge.f32.partialorder %v1667_v7, 0.0 }
 0xa69   : > { %v1756_v1 = vmul.f32 0.2, %v1592_v25  ;;  %vm1724_vm4 = vcmp.ge.f32.partialorder %v1592_v25, 0.0  ;;  %v1844_v41 = vsel %vm644_vm3, %v5886_v28, -inf  ;;  %v5897_v57 = vadd.f32 %v1795_v37, %v5360_v4 }
 0xa6a   : > { %1932 = vmax.xlane.f32.xlu0 %v1931_v44  ;;  %v1871_v44 = vsel %vm644_vm3, %v5853_v62, -inf  ;;  %v1919_v42 = vsel %vm644_vm3, %v5883_v14, -inf  ;;  %v1571_v59 = vadd.f32 %v5765_v30, %v5723_v9  ;;  %v1595_v37 = vadd.f32 %v5796_v53, %v5737_v23 }
 0xa6b   : > { %1857 = vmax.xlane.f32.xlu1 %v1856_v3  ;;  %v1640_v3 = vadd.f32 %v5809_v56, %v5715_v51  ;;  %v1788_v17 = vsel %vm1724_vm4, %v1592_v25, %v1756_v1  ;;  %v1715_v51 = vadd.f32 %v5781_v26, %v5733_v47  ;;  %v1889_v1 = vsel %vm644_vm3, %v5897_v57, -inf }
 0xa6c   : > { %v5900_v25 = vadd.f32 %v1788_v17, %v5352_v60  ;;  %v1755_v9 = vmul.f32 0.2, %v1571_v59  ;;  %vm1723_vm11 = vcmp.ge.f32.partialorder %v1571_v59, 0.0  ;;  %v1643_v23 = vadd.f32 %v5809_v56, %v5739_v32 }
 0xa6d   : > { %v1764_v29 = vmul.f32 0.2, %v1640_v3  ;;  %vm1732_vm6 = vcmp.ge.f32.partialorder %v1640_v3, 0.0  ;;  %vm1747_vm7 = vcmp.ge.f32.partialorder %v1715_v51, 0.0  ;;  %vm1727_vm12 = vcmp.ge.f32.partialorder %v1595_v37, 0.0 }
 0xa6e   : > { %1848 = vmax.xlane.f32.xlu0 %v1847_v61  ;;  %v1895_v61 = vsel %vm644_vm3, %v5869_v0, -inf  ;;  %v1868_v2 = vsel %vm644_vm3, %v5900_v25, -inf  ;;  %v1691_v32 = vadd.f32 %v5820_v33, %v5741_v19  ;;  %vm1735_vm13 = vcmp.ge.f32.partialorder %v1643_v23, 0.0 }
 0xa6f   : > { %1881 = vmax.xlane.f32.xlu1 %v1880_v39  ;;  %v1688_v39 = vadd.f32 %v5820_v33, %v5717_v21  ;;  %v1796_v47 = vsel %vm1732_vm6, %v1640_v3, %v1764_v29  ;;  %v1547_v21 = vadd.f32 %v5787_v50, %v5735_v49 }
 0xa70   : > { %v5914_v3 = vadd.f32 %v1796_v47, %v5352_v60  ;;  %vm1743_vm14 = vcmp.ge.f32.partialorder %v1691_v32, 0.0 }
 0xa71   : > { %v1772_v12 = vmul.f32 0.2, %v1688_v39  ;;  %vm1740_vm8 = vcmp.ge.f32.partialorder %v1688_v39, 0.0  ;;  %vm1719_vm9 = vcmp.ge.f32.partialorder %v1547_v21, 0.0 }
 0xa72   : > { %1872 = vmax.xlane.f32.xlu0 %v1871_v44  ;;  %v1803_v44 = vsel %vm1739_vm5, %v1667_v7, %v1771_v5 }
 0xa73   : > { %1905 = vmax.xlane.f32.xlu1 %v1904_v6  ;;  %v1779_v6 = vmul.f32 0.2, %v1715_v51  ;;  %v5911_v7 = vadd.f32 %v1803_v44, %v5360_v4 }
 0xa75   : > { %v1811_v49 = vsel %vm1747_vm7, %v1715_v51, %v1779_v6  ;;  %v1913_v17 = vsel %vm644_vm3, %v5911_v7, -inf  ;;  %v1892_v51 = vsel %vm644_vm3, %v5914_v3, -inf }
 0xa76   : > { %1896 = vmax.xlane.f32.xlu0 %v1895_v61  ;;  %v1804_v61 = vsel %vm1740_vm8, %v1688_v39, %v1772_v12  ;;  %v5921_v5 = vadd.f32 %v1811_v49, %v5360_v4  ;;  %vm6825_vm8 = vcmask 23552  }
 0xa77   : > { %1929 = vmax.xlane.f32.xlu1 %v1928_v46  ;;  %v1751_v46 = vmul.f32 0.2, %v1547_v21  ;;  %v5924_v29 = vadd.f32 %v1804_v61, %v5352_v60  ;;  %v1570_v61 = vadd.f32 %v5765_v30, %v5743_v22 }
 0xa78   : > { %v1937_v44 = vsel %vm644_vm3, %v5921_v5, -inf }
 0xa79   : > { %v1783_v39 = vsel %vm1719_vm9, %v1547_v21, %v1751_v46  ;;  %v1916_v47 = vsel %vm644_vm3, %v5924_v29, -inf  ;;  %v1767_v21 = vmul.f32 0.2, %v1643_v23  ;;  %vm1722_vm15 = vcmp.ge.f32.partialorder %v1570_v61, 0.0 }
 0xa7a   : > { %1920 = vmax.xlane.f32.xlu0 %v1919_v42  ;;  %v1759_v42 = vmul.f32 0.2, %v1595_v37  ;;  %v5935_v60 = vadd.f32 %v1783_v39, %v5369_v15  ;;  %vm6824_vm9 = vcmask 48128  }
 0xa7b   : > { %1845 = vmax.xlane.f32.xlu1 %v1844_v41  ;;  %v1787_v41 = vsel %vm1723_vm11, %v1571_v59, %v1755_v9  ;;  %v1799_v49 = vsel %vm1735_vm13, %v1643_v23, %v1767_v21  ;;  %v1754_v9 = vmul.f32 0.2, %v1570_v61  ;;  %v1714_v21 = vadd.f32 %v5781_v26, %v5729_v35 }
 0xa7c   : > { %v5938_v6 = vadd.f32 %v1787_v41, %v5360_v4  ;;  %v1791_v12 = vsel %vm1727_vm12, %v1595_v37, %v1759_v42  ;;  %v1853_v59 = vsel %vm644_vm3, %v5935_v60, -inf  ;;  %v1775_v4 = vmul.f32 0.2, %v1691_v32 }
 0xa7d   : > { %v5954_v46 = vadd.f32 %v1799_v49, %v5369_v15  ;;  %v1786_v30 = vsel %vm1722_vm15, %v1570_v61, %v1754_v9  ;;  %v1778_v35 = vmul.f32 0.2, %v1714_v21  ;;  %vm1746_vm2 = vcmp.ge.f32.partialorder %v1714_v21, 0.0 }
 0xa7e   : > { %1890 = vmax.xlane.f32.xlu0 %v1889_v1  ;;  %v5945_v1 = vadd.f32 %v1791_v12, %v5369_v15  ;;  %v1807_v37 = vsel %vm1743_vm14, %v1691_v32, %v1775_v4  ;;  %v5966_v23 = vadd.f32 %v1786_v30, %v5376_v16  ;;  %v4741_v32 = vunpack.i.l.bf16 %v5719_v40 }
 0xa7f   : > { %1869 = vmax.xlane.f32.xlu1 %v1868_v2  ;;  %v1865_v2 = vsel %vm644_vm3, %v5938_v6, -inf  ;;  %v5961_v22 = vadd.f32 %v1807_v37, %v5369_v15  ;;  %v1546_v37 = vadd.f32 %v5787_v50, %v5747_v13  ;;  %v1594_v13 = vadd.f32 %v5796_v53, %v5749_v38 }
 0xa80   : > { %v1877_v19 = vsel %vm644_vm3, %v5945_v1, -inf  ;;  %v1810_v50 = vsel %vm1746_vm2, %v1714_v21, %v1778_v35  ;;  %vm6823_vm11 = vcmask 72704  }
 0xa81   : > { %v1925_v42 = vsel %vm644_vm3, %v5961_v22, -inf  ;;  %vm1718_vm4 = vcmp.ge.f32.partialorder %v1546_v37, 0.0  ;;  %vm1726_vm5 = vcmp.ge.f32.partialorder %v1594_v13, 0.0 }
 0xa82   : > { %1914 = vmax.xlane.f32.xlu0 %v1913_v17  ;;  %v1618_v17 = vadd.f32 %v5777_v48, %v5725_v58  ;;  %v1862_v58 = vsel %vm644_vm3, %v5966_v23, -inf }
 0xa83   : > { %1893 = vmax.xlane.f32.xlu1 %v1892_v51  ;;  %v1901_v51 = vsel %vm644_vm3, %v5954_v46, -inf }
 0xa84   : > { %v1762_v39 = vmul.f32 0.2, %v1618_v17  ;;  %vm1730_vm0 = vcmp.ge.f32.partialorder %v1618_v17, 0.0 }
 0xa86   : > { %1938 = vmax.xlane.f32.xlu0 %v1937_v44  ;;  %v1794_v41 = vsel %vm1730_vm0, %v1618_v17, %v1762_v39  ;;  %v1666_v44 = vadd.f32 %v5768_v18, %v5745_v54  ;;  %v6003_v39 = vadd.f32 %v1810_v50, %v5376_v16 }
 0xa87   : > { %1917 = vmax.xlane.f32.xlu1 %v1916_v47  ;;  %v5971_v48 = vadd.f32 %v1794_v41, %v5376_v16  ;;  %v4742_v47 = vunpack.i.h.bf16 %v5719_v40  ;;  %v1642_v41 = vadd.f32 %v5809_v56, %v5751_v55 }
 0xa88   : > { %v1770_v12 = vmul.f32 0.2, %v1666_v44  ;;  %vm1738_vm1 = vcmp.ge.f32.partialorder %v1666_v44, 0.0  ;;  %v1934_v38 = vsel %vm644_vm3, %v6003_v39, -inf }
 0xa89   : > { %v1886_v15 = vsel %vm644_vm3, %v5971_v48, -inf  ;;  %v5989_v40 = vpack.c.bf16 %v4742_v47, %v4741_v32  ;;  %vm1734_vm6 = vcmp.ge.f32.partialorder %v1642_v41, 0.0 }
 0xa8a   : > { %1854 = vmax.xlane.f32.xlu0 %v1853_v59  ;;  %v4747_v59 = vunpack.i.h.bf16 %v5721_v34  ;;  %v1802_v17 = vsel %vm1738_vm1, %v1666_v44, %v1770_v12  ;;  %v6835_v44 = vld [vmem:[#allocation7_spill] sm:$0xff] }
 0xa8b   : > { %1866 = vmax.xlane.f32.xlu1 %v1865_v2  ;;  %v4746_v2 = vunpack.i.l.bf16 %v5721_v34  ;;  %v5994_v26 = vadd.f32 %v1802_v17, %v5376_v16  ;;  %v1690_v47 = vadd.f32 %v5820_v33, %v6835_v44 }
 0xa8d   : > { %v5991_v34 = vpack.c.bf16 %v4747_v59, %v4746_v2  ;;  %v1910_v30 = vsel %vm644_vm3, %v5994_v26, -inf  ;;  %v1774_v56 = vmul.f32 0.2, %v1690_v47  ;;  %vm1742_vm7 = vcmp.ge.f32.partialorder %v1690_v47, 0.0 }
 0xa8e   : > { %1878 = vmax.xlane.f32.xlu0 %v1877_v19 }
 0xa8f   : > { %v1806_v33 = vsel %vm1742_vm7, %v1690_v47, %v1774_v56 }
 0xa92   : > { %1902 = vmax.xlane.f32.xlu0 %v1901_v51  ;;  %v1750_v51 = vmul.f32 0.2, %v1546_v37 }
 0xa96   : > { %1926 = vmax.xlane.f32.xlu0 %v1925_v42  ;;  %v1758_v42 = vmul.f32 0.2, %v1594_v13 }
 0xa98   : > { %v1790_v16 = vsel %vm1726_vm5, %v1594_v13, %v1758_v42 }
 0xa99   : > { %v6017_v55 = vadd.f32 %v1790_v16, %v5395_v43 }
 0xa9a   : > { %1863 = vmax.xlane.f32.xlu0 %v1862_v58  ;;  %v1782_v58 = vsel %vm1718_vm4, %v1546_v37, %v1750_v51  ;;  %vm3045_vm4 = vcmask 1043456  }
 0xa9b   : > { %v6010_v53 = vadd.f32 %v1782_v58, %v5395_v43  ;;  %v1874_v32 = vsel %vm644_vm3, %v6017_v55, -inf }
 0xa9c   : > { %4815 = vrot.lane.b32.xlu1 %v5705_v11, %s5154_s23 }
 0xa9d   : > { %v1850_v12 = vsel %vm644_vm3, %v6010_v53, -inf }
 0xa9e   : > { %1887 = vmax.xlane.f32.xlu0 %v1886_v15  ;;  %v1766_v15 = vmul.f32 0.2, %v1642_v41 }
 0xaa0   : > { %v1798_v21 = vsel %vm1734_vm6, %v1642_v41, %v1766_v15 }
 0xaa1   : > { %v6022_v59 = vadd.f32 %v1798_v21, %v5395_v43 }
 0xaa3   : > { %v1898_v2 = vsel %vm644_vm3, %v6022_v59, -inf }
 0xab4   : > { %4810 = vrot.lane.b32.xlu0 %v5705_v11, %s5153_s16 }
 0xab5   : > { %v4806_v49 = vpop.permute.xlu1 %4805  ;;  %v4801_v4 = vpop.permute.xlu0 %4800 }
 0xab6   : > { %v4808_v61 = vunpack.i.h.bf16 %v4806_v49  ;;  %v4807_v54 = vunpack.i.l.bf16 %v4806_v49  ;;  %v4803_v18 = vunpack.i.h.bf16 %v4801_v4  ;;  %v4802_v19 = vunpack.i.l.bf16 %v4801_v4 }
 0xab7   : > { %v6027_v49 = vadd.f32 %v1806_v33, %v5395_v43 }
 0xab8   : > { %v4502_v11 = vpack.c.bf16 %v4803_v18, %v4802_v19  ;;  %v4518_v9 = vpack.c.bf16 %v4808_v61, %v4807_v54 }
 0xab9   : > { %v1922_v4 = vsel %vm644_vm3, %v6027_v49, -inf }
 0xaba   : > { %4503 = vmatprep.subr.bf16.mxu1 %v4502_v11  ;;  %4519 = vmatprep.subr.bf16.mxu0 %v4518_v9 }
 0xabb   : > { %4505 = vmatpush3.bf16.msra.mxu1 %v4502_v11  ;;  %4521 = vmatpush3.bf16.msra.mxu0 %v4518_v9 }
 0xabc   : > { %4523 = vmatprep.subr.bf16.mxu1 %v5989_v40  ;;  %4539 = vmatprep.subr.bf16.mxu0 %v5991_v34 }
 0xac0   : > { %1911 = vmax.xlane.f32.xlu1 %v1910_v30 }
 0xac4   : > { %1935 = vmax.xlane.f32.xlu1 %v1934_v38  ;;  %v5066_v38 = vld [vmem:[%s5299_s22 + $0x28] sm:$0xff] }
 0xac8   : > { %1851 = vmax.xlane.f32.xlu1 %v1850_v12 }
 0xacc   : > { %1875 = vmax.xlane.f32.xlu1 %v1874_v32 }
 0xad0   : > { %1899 = vmax.xlane.f32.xlu1 %v1898_v2 }
 0xad4   : > { %1923 = vmax.xlane.f32.xlu1 %v1922_v4 }
 0xaef   : > { %v1861_v61 = vpop.xlane.xlu0 %1860 }
 0xaf0   : > { %v1945_v54 = vsub.f32 %v5799_v31, %v1861_v61 }
 0xaf2   : > { %v1982_v18 = vmul.f32 1.442695, %v1945_v54 }
 0xaf3   : > { %v1909_v19 = vpop.xlane.xlu0 %1908 }
 0xaf4   : > { %4914 = vpow2.f32 %v1982_v18  ;;  %v1961_v37 = vsub.f32 %v5805_v8, %v1909_v19  ;;  %v1885_v11 = vpop.xlane.xlu1 %1884 }
 0xaf5   : > { %v1953_v9 = vsub.f32 %v5818_v63, %v1885_v11 }
 0xaf6   : > { %v2014_v17 = vmul.f32 1.442695, %v1961_v37 }
 0xaf7   : > { %v1998_v43 = vmul.f32 1.442695, %v1953_v9  ;;  %v1933_v35 = vpop.xlane.xlu0 %1932 }
 0xaf8   : > { %4916 = vpow2.f32 %v2014_v17  ;;  %v1969_v51 = vsub.f32 %v5825_v24, %v1933_v35  ;;  %v1858_v13 = vpop.xlane.xlu1 %1857 }
 0xaf9   : > { %4918 = vpow2.f32 %v1998_v43 }
 0xafa   : > { %v2030_v50 = vmul.f32 1.442695, %v1969_v51 }
 0xafb   : > { %v1849_v30 = vpop.xlane.xlu0 %1848 }
 0xafc   : > { %v1941_v31 = vsub.f32 %v5839_v45, %v1849_v30  ;;  %v1882_v42 = vpop.xlane.xlu1 %1881  ;;  %4920 = vpow2.f32 %v2030_v50  ;;  %v1944_v45 = vsub.f32 %v5834_v27, %v1858_v13  ;;  %v5067_v13 = vld [vmem:[%s5299_s22 + $0x8] sm:$0xff] }
 0xafd   : > { %v1952_v27 = vsub.f32 %v5846_v10, %v1882_v42 }
 0xafe   : > { %v4915_v41 = vpop.eup %4914  ;;  %v1974_v8 = vmul.f32 1.442695, %v1941_v31  ;;  %v1980_v54 = vmul.f32 1.442695, %v1944_v45 }
 0xaff   : > { %v1873_v58 = vpop.xlane.xlu0 %1872  ;;  %v6037_v63 = vmul.f32 %v5066_v38, %v4915_v41  ;;  %v1996_v10 = vmul.f32 1.442695, %v1952_v27 }
 0xb00   : > { %4922 = vpow2.f32 %v1974_v8  ;;  %v1949_v15 = vsub.f32 %v5853_v62, %v1873_v58  ;;  %v1906_v44 = vpop.xlane.xlu1 %1905 }
 0xb01   : > { %v2083_v24 = vsel %vm644_vm3, %v6037_v63, 0.0 }
 0xb02   : > { %v4917_v47 = vpop.eup %4916  ;;  %v1990_v16 = vmul.f32 1.442695, %v1949_v15  ;;  %2084 = vadd.xlane.f32.xlu0 %v2083_v24 }
 0xb03   : > { %v4919_v12 = vpop.eup %4918  ;;  %v1897_v56 = vpop.xlane.xlu0 %1896  ;;  %v6048_v4 = vmul.f32 %v5066_v38, %v4917_v47 }
 0xb04   : > { %4924 = vpow2.f32 %v1990_v16  ;;  %v1957_v21 = vsub.f32 %v5869_v0, %v1897_v56  ;;  %v1930_v32 = vpop.xlane.xlu1 %1929  ;;  %v6044_v33 = vmul.f32 %v5066_v38, %v4919_v12 }
 0xb05   : > { %v2131_v17 = vsel %vm644_vm3, %v6048_v4, 0.0  ;;  %v1968_v15 = vsub.f32 %v5872_v36, %v1930_v32 }
 0xb06   : > { %v2006_v2 = vmul.f32 1.442695, %v1957_v21  ;;  %v2107_v62 = vsel %vm644_vm3, %v6044_v33, 0.0  ;;  %v4921_v61 = vpop.eup %4920 }
 0xb07   : > { %2108 = vadd.xlane.f32.xlu0 %v2107_v62  ;;  %v1921_v18 = vpop.xlane.xlu0 %1920  ;;  %v6055_v43 = vmul.f32 %v5066_v38, %v4921_v61  ;;  %v2028_v21 = vmul.f32 1.442695, %v1968_v15 }
 0xb08   : > { %4926 = vpow2.f32 %v2006_v2  ;;  %v1965_v19 = vsub.f32 %v5883_v14, %v1921_v18  ;;  %v1846_v0 = vpop.xlane.xlu1 %1845  ;;  %v1960_v14 = vsub.f32 %v5856_v52, %v1906_v44 }
 0xb09   : > { %v1940_v37 = vsub.f32 %v5886_v28, %v1846_v0  ;;  %4928 = vpow2.f32 %v1980_v54  ;;  %v2155_v41 = vsel %vm644_vm3, %v6055_v43, 0.0 }
 0xb0a   : > { %v4923_v11 = vpop.eup %4922  ;;  %v2022_v9 = vmul.f32 1.442695, %v1965_v19  ;;  %v2012_v52 = vmul.f32 1.442695, %v1960_v14 }
 0xb0b   : > { %v1972_v35 = vmul.f32 1.442695, %v1940_v37  ;;  %2132 = vadd.xlane.f32.xlu0 %v2131_v17  ;;  %v1891_v51 = vpop.xlane.xlu0 %1890  ;;  %v6058_v50 = vmul.f32 %v5067_v13, %v4923_v11  ;;  %v5068_v37 = vld [vmem:[%s5299_s22] sm:$0xff] }
 0xb0c   : > { %4930 = vpow2.f32 %v2022_v9  ;;  %v1870_v30 = vpop.xlane.xlu1 %1869  ;;  %v1955_v16 = vsub.f32 %v5897_v57, %v1891_v51  ;;  %v5069_v9 = vld [vmem:[%s5299_s22 + $0x20] sm:$0xff] }
 0xb0d   : > { %4932 = vpow2.f32 %v1972_v35  ;;  %v1948_v28 = vsub.f32 %v5900_v25, %v1870_v30  ;;  %v2071_v31 = vsel %vm644_vm3, %v6058_v50, 0.0 }
 0xb0e   : > { %v4925_v42 = vpop.eup %4924  ;;  %2072 = vadd.xlane.f32.xlu1 %v2071_v31  ;;  %4934 = vpow2.f32 %v1996_v10  ;;  %v2002_v54 = vmul.f32 1.442695, %v1955_v16 }
 0xb0f   : > { %v1988_v8 = vmul.f32 1.442695, %v1948_v28  ;;  %2156 = vadd.xlane.f32.xlu0 %v2155_v41  ;;  %v1915_v58 = vpop.xlane.xlu0 %1914  ;;  %v6066_v38 = vmul.f32 %v5067_v13, %v4925_v42 }
 0xb10   : > { %v1894_v44 = vpop.xlane.xlu1 %1893 }
 0xb11   : > { %4936 = vpow2.f32 %v1988_v8  ;;  %v1956_v25 = vsub.f32 %v5914_v3, %v1894_v44  ;;  %v2095_v24 = vsel %vm644_vm3, %v6066_v38, 0.0 }
 0xb12   : > { %v4927_v47 = vpop.eup %4926  ;;  %4938 = vpow2.f32 %v2012_v52 }
 0xb13   : > { %v2004_v12 = vmul.f32 1.442695, %v1956_v25  ;;  %2096 = vadd.xlane.f32.xlu0 %v2095_v24  ;;  %v1939_v45 = vpop.xlane.xlu0 %1938  ;;  %v6073_v56 = vmul.f32 %v5067_v13, %v4927_v47  ;;  %v4929_v32 = vpop.eup %4928 }
 0xb14   : > { %v1971_v2 = vsub.f32 %v5921_v5, %v1939_v45  ;;  %v1918_v36 = vpop.xlane.xlu1 %1917  ;;  %v6085_v17 = vmul.f32 %v5069_v9, %v4929_v32 }
 0xb15   : > { %4940 = vpow2.f32 %v2004_v12  ;;  %v1964_v3 = vsub.f32 %v5924_v29, %v1918_v36  ;;  %v2119_v62 = vsel %vm644_vm3, %v6073_v56, 0.0  ;;  %v1963_v29 = vsub.f32 %v5911_v7, %v1915_v58 }
 0xb16   : > { %v4931_v57 = vpop.eup %4930  ;;  %2120 = vadd.xlane.f32.xlu1 %v2119_v62  ;;  %4942 = vpow2.f32 %v2028_v21  ;;  %v2034_v5 = vmul.f32 1.442695, %v1971_v2  ;;  %v2080_v7 = vsel %vm644_vm3, %v6085_v17, 0.0 }
 0xb17   : > { %v4933_v61 = vpop.eup %4932  ;;  %v2020_v18 = vmul.f32 1.442695, %v1964_v3  ;;  %v1855_v27 = vpop.xlane.xlu0 %1854  ;;  %v6079_v19 = vmul.f32 %v5067_v13, %v4931_v57  ;;  %v2018_v42 = vmul.f32 1.442695, %v1963_v29 }
 0xb18   : > { %v1867_v0 = vpop.xlane.xlu1 %1866  ;;  %v6082_v11 = vmul.f32 %v5068_v37, %v4933_v61  ;;  %v4935_v10 = vpop.eup %4934  ;;  %v1943_v41 = vsub.f32 %v5935_v60, %v1855_v27 }
 0xb19   : > { %4944 = vpow2.f32 %v2020_v18  ;;  %v1947_v35 = vsub.f32 %v5938_v6, %v1867_v0  ;;  %v2143_v51 = vsel %vm644_vm3, %v6079_v19, 0.0  ;;  %v6099_v8 = vmul.f32 %v5069_v9, %v4935_v10  ;;  %v5070_v0 = vld [vmem:[%s5299_s22 + $0x38] sm:$0xff] }
 0xb1a   : > { %2144 = vadd.xlane.f32.xlu1 %v2143_v51  ;;  %v2068_v13 = vsel %vm644_vm3, %v6082_v11, 0.0  ;;  %4946 = vpow2.f32 %v2002_v54  ;;  %v1978_v47 = vmul.f32 1.442695, %v1943_v41 }
 0xb1b   : > { %v4937_v14 = vpop.eup %4936  ;;  %v1986_v30 = vmul.f32 1.442695, %v1947_v35  ;;  %2069 = vadd.xlane.f32.xlu0 %v2068_v13  ;;  %v1879_v28 = vpop.xlane.xlu0 %1878  ;;  %4948 = vpow2.f32 %v2034_v5  ;;  %v2104_v60 = vsel %vm644_vm3, %v6099_v8, 0.0 }
 0xb1c   : > { %v1951_v31 = vsub.f32 %v5945_v1, %v1879_v28  ;;  %v6096_v6 = vmul.f32 %v5068_v37, %v4937_v14  ;;  %v4939_v58 = vpop.eup %4938 }
 0xb1d   : > { %4950 = vpow2.f32 %v1986_v30  ;;  %v6108_v16 = vmul.f32 %v5069_v9, %v4939_v58 }
 0xb1e   : > { %v1994_v52 = vmul.f32 1.442695, %v1951_v31  ;;  %2081 = vadd.xlane.f32.xlu1 %v2080_v7  ;;  %v2092_v15 = vsel %vm644_vm3, %v6096_v6, 0.0  ;;  %v5071_v31 = vld [vmem:[%s5299_s22 + $0x18] sm:$0xff] }
 0xb1f   : > { %v4941_v44 = vpop.eup %4940  ;;  %2093 = vadd.xlane.f32.xlu0 %v2092_v15  ;;  %v1903_v1 = vpop.xlane.xlu0 %1902  ;;  %v2128_v62 = vsel %vm644_vm3, %v6108_v16, 0.0 }
 0xb20   : > { %4952 = vpow2.f32 %v1994_v52  ;;  %v1959_v25 = vsub.f32 %v5954_v46, %v1903_v1  ;;  %v6104_v24 = vmul.f32 %v5068_v37, %v4941_v44  ;;  %v4943_v12 = vpop.eup %4942 }
 0xb21   : > { %4954 = vpow2.f32 %v2018_v42  ;;  %v6117_v57 = vmul.f32 %v5069_v9, %v4943_v12 }
 0xb22   : > { %v2010_v45 = vmul.f32 1.442695, %v1959_v25  ;;  %2105 = vadd.xlane.f32.xlu1 %v2104_v60  ;;  %v2116_v21 = vsel %vm644_vm3, %v6104_v24, 0.0 }
 0xb23   : > { %v4945_v2 = vpop.eup %4944  ;;  %2117 = vadd.xlane.f32.xlu0 %v2116_v21  ;;  %v1927_v36 = vpop.xlane.xlu0 %1926  ;;  %v2152_v9 = vsel %vm644_vm3, %v6117_v57, 0.0 }
 0xb24   : > { %4956 = vpow2.f32 %v2010_v45  ;;  %v1967_v46 = vsub.f32 %v5961_v22, %v1927_v36  ;;  %v6113_v32 = vmul.f32 %v5068_v37, %v4945_v2  ;;  %v4947_v3 = vpop.eup %4946  ;;  %v5072_v36 = vld [vmem:[%s5299_s22 + $0x30] sm:$0xff] }
 0xb25   : > { %4958 = vpow2.f32 %v1978_v47  ;;  %v4949_v61 = vpop.eup %4948  ;;  %v6131_v13 = vmul.f32 %v5070_v0, %v4947_v3 }
 0xb26   : > { %v2026_v54 = vmul.f32 1.442695, %v1967_v46  ;;  %2129 = vadd.xlane.f32.xlu1 %v2128_v62  ;;  %v2140_v18 = vsel %vm644_vm3, %v6113_v32, 0.0  ;;  %v6127_v29 = vmul.f32 %v5070_v0, %v4949_v61 }
 0xb27   : > { %v4951_v27 = vpop.eup %4950  ;;  %2141 = vadd.xlane.f32.xlu0 %v2140_v18  ;;  %v1864_v5 = vpop.xlane.xlu0 %1863  ;;  %v2113_v58 = vsel %vm644_vm3, %v6131_v13, 0.0 }
 0xb28   : > { %4960 = vpow2.f32 %v2026_v54  ;;  %v1946_v22 = vsub.f32 %v5966_v23, %v1864_v5  ;;  %v6123_v37 = vmul.f32 %v5070_v0, %v4951_v27  ;;  %v2161_v28 = vsel %vm644_vm3, %v6127_v29, 0.0  ;;  %v6168_v18 = vpop.permute.xlu1 %4815  ;;  %v6836_v5 = vld [vmem:[#allocation8_spill] sm:$0xff] }
 0xb2a   : > { %v4953_v35 = vpop.eup %4952  ;;  %v1984_v51 = vmul.f32 1.442695, %v1946_v22  ;;  %2153 = vadd.xlane.f32.xlu1 %v2152_v9  ;;  %v2089_v10 = vsel %vm644_vm3, %v6123_v37, 0.0 }
 0xb2b   : > { %v4955_v14 = vpop.eup %4954  ;;  %2090 = vadd.xlane.f32.xlu0 %v2089_v10  ;;  %v1888_v23 = vpop.xlane.xlu0 %1887  ;;  %v6137_v7 = vmul.f32 %v5071_v31, %v4953_v35 }
 0xb2c   : > { %4962 = vpow2.f32 %v1984_v51  ;;  %v1954_v30 = vsub.f32 %v5971_v48, %v1888_v23  ;;  %v6141_v52 = vmul.f32 %v5070_v0, %v4955_v14 }
 0xb2d   : > { %v2101_v48 = vsel %vm644_vm3, %v6137_v7, 0.0 }
 0xb2e   : > { %v4957_v42 = vpop.eup %4956  ;;  %v2000_v41 = vmul.f32 1.442695, %v1954_v30  ;;  %2162 = vadd.xlane.f32.xlu1 %v2161_v28  ;;  %v2137_v25 = vsel %vm644_vm3, %v6141_v52, 0.0 }
 0xb2f   : > { %v4959_v15 = vpop.eup %4958  ;;  %2114 = vadd.xlane.f32.xlu0 %v2113_v58  ;;  %v6145_v44 = vmul.f32 %v5071_v31, %v4957_v42 }
 0xb30   : > { %4964 = vpow2.f32 %v2000_v41  ;;  %v6149_v47 = vmul.f32 %v5071_v31, %v4959_v15 }
 0xb31   : > { %v2125_v60 = vsel %vm644_vm3, %v6145_v44, 0.0 }
 0xb32   : > { %v4961_v1 = vpop.eup %4960  ;;  %2102 = vadd.xlane.f32.xlu1 %v2101_v48  ;;  %v2077_v21 = vsel %vm644_vm3, %v6149_v47, 0.0 }
 0xb33   : > { %2138 = vadd.xlane.f32.xlu0 %v2137_v25  ;;  %v6153_v12 = vmul.f32 %v5071_v31, %v4961_v1 }
 0xb35   : > { %v2149_v2 = vsel %vm644_vm3, %v6153_v12, 0.0 }
 0xb36   : > { %v4963_v45 = vpop.eup %4962  ;;  %2126 = vadd.xlane.f32.xlu1 %v2125_v60 }
 0xb37   : > { %2078 = vadd.xlane.f32.xlu0 %v2077_v21  ;;  %v6160_v46 = vmul.f32 %v5072_v36, %v4963_v45 }
 0xb39   : > { %v2086_v62 = vsel %vm644_vm3, %v6160_v46, 0.0 }
 0xb3a   : > { %v4965_v3 = vpop.eup %4964  ;;  %2150 = vadd.xlane.f32.xlu1 %v2149_v2 }
 0xb3b   : > { %v6164_v61 = vmul.f32 %v5072_v36, %v4965_v3 }
 0xb3d   : > { %v2110_v54 = vsel %vm644_vm3, %v6164_v61, 0.0 }
 0xb3e   : > { %2087 = vadd.xlane.f32.xlu1 %v2086_v62 }
 0xb42   : > { %2111 = vadd.xlane.f32.xlu1 %v2110_v54 }
 0xb4d   : > { %v1912_v27 = vpop.xlane.xlu1 %1911  ;;  %4825 = vrot.lane.b32.xlu0 %v6836_v5, %s5154_s23  ;;  %s4113_s23 = sshll.u32 %s5237_s13, 9 }
 0xb4e   : > { %v1962_v22 = vsub.f32 %v5994_v26, %v1912_v27  ;;  %v6197_v27 = vpop.permute.xlu0 %4810 }
 0xb50   : > { %v2016_v0 = vmul.f32 1.442695, %v1962_v22 }
 0xb51   : > { %v1936_v9 = vpop.xlane.xlu1 %1935 }
 0xb52   : > { %4966 = vpow2.f32 %v2016_v0  ;;  %v1970_v35 = vsub.f32 %v6003_v39, %v1936_v9 }
 0xb54   : > { %v2032_v51 = vmul.f32 1.442695, %v1970_v35 }
 0xb55   : > { %v1852_v10 = vpop.xlane.xlu1 %1851 }
 0xb56   : > { %4968 = vpow2.f32 %v2032_v51 }
 0xb59   : > { %v1876_v14 = vpop.xlane.xlu1 %1875 }
 0xb5a   : > { %v1950_v62 = vsub.f32 %v6017_v55, %v1876_v14 }
 0xb5c   : > { %v4967_v23 = vpop.eup %4966  ;;  %v1992_v54 = vmul.f32 1.442695, %v1950_v62 }
 0xb5d   : > { %v1900_v30 = vpop.xlane.xlu1 %1899  ;;  %v6174_v28 = vmul.f32 %v5072_v36, %v4967_v23 }
 0xb5e   : > { %v1958_v31 = vsub.f32 %v6022_v59, %v1900_v30  ;;  %v5073_v59 = vld [vmem:[%s5299_s22 + $0x10] sm:$0xff]  ;;  %s5156_s22 = smov 3  }
 0xb5f   : > { %v2134_v42 = vsel %vm644_vm3, %v6174_v28, 0.0 }
 0xb60   : > { %v4969_v26 = vpop.eup %4968  ;;  %v2008_v41 = vmul.f32 1.442695, %v1958_v31  ;;  %2135 = vadd.xlane.f32.xlu1 %v2134_v42 }
 0xb61   : > { %v1924_v58 = vpop.xlane.xlu1 %1923  ;;  %v6179_v15 = vmul.f32 %v5072_v36, %v4969_v26  ;;  %v1942_v36 = vsub.f32 %v6010_v53, %v1852_v10 }
 0xb62   : > { %4970 = vpow2.f32 %v2008_v41  ;;  %v1966_v39 = vsub.f32 %v6027_v49, %v1924_v58 }
 0xb63   : > { %v2158_v48 = vsel %vm644_vm3, %v6179_v15, 0.0  ;;  %v1976_v3 = vmul.f32 1.442695, %v1942_v36 }
 0xb64   : > { %v2024_v1 = vmul.f32 1.442695, %v1966_v39  ;;  %2159 = vadd.xlane.f32.xlu1 %v2158_v48 }
 0xb66   : > { %4972 = vpow2.f32 %v2024_v1 }
 0xb67   : > { %4974 = vpow2.f32 %v1976_v3 }
 0xb68   : > { %4976 = vpow2.f32 %v1992_v54 }
 0xb6c   : > { %v4971_v25 = vpop.eup %4970 }
 0xb6d   : > { %v6185_v60 = vmul.f32 %v5073_v59, %v4971_v25 }
 0xb6f   : > { %v2122_v45 = vsel %vm644_vm3, %v6185_v60, 0.0 }
 0xb70   : > { %v4973_v21 = vpop.eup %4972  ;;  %2123 = vadd.xlane.f32.xlu0 %v2122_v45 }
 0xb71   : > { %v6189_v2 = vmul.f32 %v5073_v59, %v4973_v21  ;;  %v4975_v0 = vpop.eup %4974 }
 0xb72   : > { %v6199_v35 = vmul.f32 %v5073_v59, %v4975_v0  ;;  %v4977_v51 = vpop.eup %4976 }
 0xb73   : > { %v2146_v49 = vsel %vm644_vm3, %v6189_v2, 0.0  ;;  %v6203_v30 = vmul.f32 %v5073_v59, %v4977_v51 }
 0xb74   : > { %2147 = vadd.xlane.f32.xlu0 %v2146_v49 }
 0xb75   : > { %4820 = vrot.lane.b32.xlu1 %v6836_v5, %s5153_s16  ;;  %v2074_v5 = vsel %vm644_vm3, %v6199_v35, 0.0  ;;  %v2098_v55 = vsel %vm644_vm3, %v6203_v30, 0.0  ;;  %s3868_s16 = sshll.u32 %s5607_s27, 4  ;;  %s5163_s27 = smov [#allocation2]   ;;  %s6738_s16 = int_to_ptr.vmem [resolvable:$true] %s3868_s16 }
 0xb76   : > { %s5074_s28 = scalar_lea.vmem %s6738_s16, 512  ;;  %s5078_s29 = sshll.u32 %s5163_s27, 4  ;;  %s5079_s29 = int_to_ptr.vmem [resolvable:$false] %s5078_s29 }
 0xb77   : > { %p5075_p11 = scmp.ne.s32.totalorder %s6738_s16, %s5074_s28  ;;  %s5080_s26 = scalar_lea.vmem %s5079_s29, 1024 }
 0xb78   : > { %p5081_p0 = scmp.lt.s32.totalorder %s6738_s16, %s5079_s29  ;;  %p5082_p1 = scmp.lt.s32.totalorder %s5080_s26, %s5074_s28 }
 0xb79   : > { %p5076_p12 = pnand %p5075_p11, %p5254_p5 }
 0xb7a   : > { %p5083_p2 = por %p5082_p1, %p5081_p0 }
 0xb7b   : > { %p5077_p13 = pneg %p5076_p12 }
 0xb7d   : > { %p5084_p3 = pnand %p5083_p2, %p5077_p13 }
 0xb8f   : > { %v2085_v22 = vpop.xlane.xlu0 %2084 }
 0xb90   : > { %v2169_v53 = vmax.f32 %v2085_v22, 1e-30 }
 0xb92   : > { %4978 = vrcp.f32 %v2169_v53 }
 0xb94   : > { %v2109_v9 = vpop.xlane.xlu0 %2108 }
 0xb95   : > { %v2177_v14 = vmax.f32 %v2109_v9, 1e-30 }
 0xb97   : > { %4980 = vrcp.f32 %v2177_v14 }
 0xb98   : > { %v2133_v23 = vpop.xlane.xlu0 %2132 }
 0xb99   : > { %2075 = vadd.xlane.f32.xlu1 %v2074_v5  ;;  %v2185_v1 = vmax.f32 %v2133_v23, 1e-30 }
 0xb9b   : > { %v6209_v31 = vpop.xlane.xlu1 %2072 }
 0xb9c   : > { %v6207_v10 = vpop.xlane.xlu0 %2156  ;;  %v4979_v39 = vpop.eup %4978 }
 0xb9d   : > { %2099 = vadd.xlane.f32.xlu1 %v2098_v55  ;;  %v2233_v45 = vmul.f32 %v4979_v39, %v6037_v63 }
 0xba0   : > { %v6213_v26 = vpop.xlane.xlu0 %2096 }
 0xba1   : > { %v4981_v21 = vpop.eup %4980 }
 0xba2   : > { %v2241_v62 = vmul.f32 %v4981_v21, %v6044_v33 }
 0xba3   : > { %v6211_v42 = vpop.xlane.xlu1 %2120 }
 0xba7   : > { %v6215_v41 = vpop.xlane.xlu1 %2144 }
 0xba8   : > { %v6217_v58 = vpop.xlane.xlu0 %2069 }
 0xbab   : > { %v2082_v48 = vpop.xlane.xlu1 %2081 }
 0xbac   : > { %v2168_v25 = vmax.f32 %v2082_v48, 1e-30  ;;  %v6219_v59 = vpop.xlane.xlu0 %2093 }
 0xbae   : > { %4982 = vrcp.f32 %v2168_v25  ;;  %2274 = vrot.lane.b32.xlu1 %v2233_v45, %s5142_s24 }
 0xbaf   : > { %v2106_v49 = vpop.xlane.xlu1 %2105  ;;  %4984 = vrcp.f32 %v2185_v1 }
 0xbb0   : > { %v2176_v36 = vmax.f32 %v2106_v49, 1e-30  ;;  %v6223_v3 = vpop.xlane.xlu0 %2117 }
 0xbb2   : > { %4986 = vrcp.f32 %v2176_v36  ;;  %2415 = vrot.lane.b32.xlu1 %v2241_v62, %s5142_s24 }
 0xbb3   : > { %v2130_v54 = vpop.xlane.xlu1 %2129 }
 0xbb4   : > { %v2184_v22 = vmax.f32 %v2130_v54, 1e-30  ;;  %v6227_v0 = vpop.xlane.xlu0 %2141 }
 0xbb6   : > { %4988 = vrcp.f32 %v2184_v22 }
 0xbb7   : > { %v2154_v63 = vpop.xlane.xlu1 %2153 }
 0xbb8   : > { %v4983_v9 = vpop.eup %4982  ;;  %v2091_v51 = vpop.xlane.xlu0 %2090  ;;  %v2192_v22 = vmax.f32 %v2154_v63, 1e-30 }
 0xbb9   : > { %v2171_v23 = vmax.f32 %v2091_v51, 1e-30  ;;  %v2232_v5 = vmul.f32 %v4983_v9, %v6085_v17  ;;  %v4985_v53 = vpop.eup %4984  ;;  %v2193_v51 = vmax.f32 %v6207_v10, 1e-30 }
 0xbba   : > { %v2249_v1 = vmul.f32 %v4985_v53, %v6048_v4 }
 0xbbb   : > { %4990 = vrcp.f32 %v2171_v23  ;;  %v2163_v55 = vpop.xlane.xlu1 %2162  ;;  %2272 = vrot.lane.b32.xlu1 %v2232_v5, %s5142_s24 }
 0xbbc   : > { %v4987_v33 = vpop.eup %4986  ;;  %v2115_v14 = vpop.xlane.xlu0 %2114 }
 0xbbd   : > { %v2179_v39 = vmax.f32 %v2115_v14, 1e-30  ;;  %v2240_v48 = vmul.f32 %v4987_v33, %v6099_v8  ;;  %v2195_v33 = vmax.f32 %v2163_v55, 1e-30 }
 0xbbf   : > { %4992 = vrcp.f32 %v2179_v39  ;;  %2413 = vrot.lane.b32.xlu0 %v2240_v48, %s5142_s24  ;;  %v6234_v25 = vpop.xlane.xlu1 %2102  ;;  %2556 = vrot.lane.b32.xlu1 %v2249_v1, %s5142_s24 }
 0xbc0   : > { %v4989_v17 = vpop.eup %4988  ;;  %v2139_v5 = vpop.xlane.xlu0 %2138 }
 0xbc1   : > { %v2248_v45 = vmul.f32 %v4989_v17, %v6108_v16 }
 0xbc3   : > { %2554 = vrot.lane.b32.xlu0 %v2248_v45, %s5142_s24  ;;  %v6239_v21 = vpop.xlane.xlu1 %2126 }
 0xbc5   : > { %v4991_v49 = vpop.eup %4990 }
 0xbc6   : > { %v2235_v36 = vmul.f32 %v4991_v49, %v6123_v37  ;;  %v2187_v37 = vmax.f32 %v2139_v5, 1e-30 }
 0xbc7   : > { %v6242_v8 = vpop.xlane.xlu1 %2150 }
 0xbc8   : > { %2278 = vrot.lane.b32.xlu0 %v2235_v36, %s5142_s24 }
 0xbc9   : > { %v4993_v4 = vpop.eup %4992 }
 0xbca   : > { %v2243_v62 = vmul.f32 %v4993_v4, %v6131_v13 }
 0xbcb   : > { %v2088_v54 = vpop.xlane.xlu1 %2087 }
 0xbcc   : > { %v2170_v9 = vmax.f32 %v2088_v54, 1e-30  ;;  %2419 = vrot.lane.b32.xlu1 %v2243_v62, %s5142_s24  ;;  %v6264_v54 = vpop.xlane.xlu0 %2078 }
 0xbce   : > { %4994 = vrcp.f32 %v2170_v9 }
 0xbcf   : > { %v2112_v16 = vpop.xlane.xlu1 %2111  ;;  %4996 = vrcp.f32 %v2192_v22  ;;  %v2173_v22 = vmax.f32 %v6213_v26, 1e-30 }
 0xbd0   : > { %v2178_v23 = vmax.f32 %v2112_v16, 1e-30  ;;  %v4826_v16 = vpop.permute.xlu0 %4825 }
 0xbd2   : > { %4998 = vrcp.f32 %v2178_v23 }
 0xbd3   : > { %5000 = vrcp.f32 %v2193_v51  ;;  %v2165_v51 = vmax.f32 %v6209_v31, 1e-30 }
 0xbd4   : > { %5002 = vrcp.f32 %v2187_v37 }
 0xbd5   : > { %5004 = vrcp.f32 %v2195_v33  ;;  %v6837_v33 = vld [vmem:[#allocation10_spill] sm:$0xff] }
 0xbd8   : > { %v4995_v53 = vpop.eup %4994 }
 0xbd9   : > { %v2234_v13 = vmul.f32 %v4995_v53, %v6160_v46  ;;  %v4997_v14 = vpop.eup %4996 }
 0xbda   : > { %v2256_v39 = vmul.f32 %v4997_v14, %v6117_v57  ;;  %v4787_v14 = vunpack.i.l.bf16 %v6837_v33 }
 0xbdb   : > { %2276 = vrot.lane.b32.xlu0 %v2234_v13, %s5142_s24  ;;  %v4788_v13 = vunpack.i.h.bf16 %v6837_v33 }
 0xbdc   : > { %v4999_v63 = vpop.eup %4998 }
 0xbdd   : > { %v2242_v10 = vmul.f32 %v4999_v63, %v6164_v61  ;;  %v5001_v48 = vpop.eup %5000 }
 0xbde   : > { %v2257_v1 = vmul.f32 %v5001_v48, %v6055_v43  ;;  %v5003_v55 = vpop.eup %5002 }
 0xbdf   : > { %2695 = vrot.lane.b32.xlu0 %v2256_v39, %s5142_s24  ;;  %2417 = vrot.lane.b32.xlu1 %v2242_v10, %s5142_s24  ;;  %v2251_v46 = vmul.f32 %v5003_v55, %v6141_v52  ;;  %v5005_v17 = vpop.eup %5004 }
 0xbe0   : > { %v2259_v45 = vmul.f32 %v5005_v17, %v6127_v29  ;;  %v2172_v29 = vmax.f32 %v6219_v59, 1e-30  ;;  %v4817_v17 = vunpack.i.l.bf16 %v6168_v18 }
 0xbe3   : > { %2697 = vrot.lane.b32.xlu1 %v2257_v1, %s5142_s24 }
 0xbe7   : > { %2560 = vrot.lane.b32.xlu1 %v2251_v46, %s5142_s24  ;;  %v4818_v46 = vunpack.i.h.bf16 %v6168_v18 }
 0xbeb   : > { %2701 = vrot.lane.b32.xlu1 %v2259_v45, %s5142_s24  ;;  %v4542_v45 = vpack.c.bf16 %v4788_v13, %v4787_v14 }
 0xbed   : > { %v2136_v57 = vpop.xlane.xlu1 %2135 }
 0xbee   : > { %v2186_v61 = vmax.f32 %v2136_v57, 1e-30 }
 0xbf0   : > { %5006 = vrcp.f32 %v2186_v61 }
 0xbf1   : > { %v2160_v49 = vpop.xlane.xlu1 %2159 }
 0xbf2   : > { %v2194_v36 = vmax.f32 %v2160_v49, 1e-30 }
 0xbf4   : > { %5008 = vrcp.f32 %v2194_v36 }
 0xbf5   : > { %v6268_v9 = vpop.permute.xlu1 %4820  ;;  %5010 = vrcp.f32 %v2172_v29  ;;  %v4813_v29 = vunpack.i.h.bf16 %v6197_v27 }
 0xbf6   : > { %5012 = vrcp.f32 %v2173_v22  ;;  %v4812_v22 = vunpack.i.l.bf16 %v6197_v27 }
 0xbf8   : > { %v4530_v27 = vpack.c.bf16 %v4813_v29, %v4812_v22 }
 0xbfa   : > { %v5007_v4 = vpop.eup %5006 }
 0xbfb   : > { %v2250_v43 = vmul.f32 %v5007_v4, %v6174_v28  ;;  %v2164_v28 = vmax.f32 %v6217_v58, 1e-30 }
 0xbfd   : > { %2558 = vrot.lane.b32.xlu0 %v2250_v43, %s5142_s24  ;;  %v6272_v5 = vpop.xlane.xlu0 %2123  ;;  %5014 = vrcp.f32 %v2164_v28  ;;  %v4828_v43 = vunpack.i.h.bf16 %v4826_v16  ;;  %v2180_v28 = vmax.f32 %v6223_v3, 1e-30  ;;  %v2188_v3 = vmax.f32 %v6227_v0, 1e-30 }
 0xbfe   : > { %v5009_v62 = vpop.eup %5008  ;;  %5016 = vrcp.f32 %v2165_v51  ;;  %v4823_v51 = vunpack.i.h.bf16 %v6268_v9 }
 0xbff   : > { %v2258_v52 = vmul.f32 %v5009_v62, %v6179_v15  ;;  %v5011_v37 = vpop.eup %5010  ;;  %v4827_v62 = vunpack.i.l.bf16 %v4826_v16 }
 0xc00   : > { %v5013_v26 = vpop.eup %5012  ;;  %v2236_v58 = vmul.f32 %v5011_v37, %v6096_v6  ;;  %v6838_v6 = vld [vmem:[#allocation9_spill] sm:$0xff]  ;;  %v4822_v37 = vunpack.i.l.bf16 %v6268_v9  ;;  %v2189_v9 = vmax.f32 %v6215_v41, 1e-30 }
 0xc01   : > { %2699 = vrot.lane.b32.xlu0 %v2258_v52, %s5142_s24  ;;  %v6276_v59 = vpop.xlane.xlu0 %2147  ;;  %v2237_v31 = vmul.f32 %v5013_v26, %v6066_v38  ;;  %v4783_v57 = vunpack.i.h.bf16 %v6838_v6  ;;  %v4782_v38 = vunpack.i.l.bf16 %v6838_v6  ;;  %v4546_v52 = vpack.c.bf16 %v4818_v46, %v4817_v17  ;;  %s5157_s24 = smov 6  }
 0xc02   : > { %v4550_v16 = vpack.c.bf16 %v4828_v43, %v4827_v62  ;;  %v2181_v26 = vmax.f32 %v6211_v42, 1e-30  ;;  %v2190_v43 = vmax.f32 %v6276_v59, 1e-30  ;;  %v2191_v62 = vmax.f32 %v6242_v8, 1e-30 }
 0xc07   : > { %v5015_v39 = vpop.eup %5014 }
 0xc08   : > { %v5017_v1 = vpop.eup %5016  ;;  %v2228_v61 = vmul.f32 %v5015_v39, %v6082_v11  ;;  %v2167_v11 = vmax.f32 %v6264_v54, 1e-30  ;;  %v4534_v54 = vpack.c.bf16 %v4823_v51, %v4822_v37 }
 0xc09   : > { %v2229_v49 = vmul.f32 %v5017_v1, %v6058_v50 }
 0xc26   : > { %v2076_v23 = vpop.xlane.xlu1 %2075 }
 0xc27   : > { %v2166_v50 = vmax.f32 %v2076_v23, 1e-30  ;;  %v2175_v23 = vmax.f32 %v6234_v25, 1e-30 }
 0xc29   : > { %5018 = vrcp.f32 %v2166_v50 }
 0xc2a   : > { %v6274_v15 = vpop.xlane.xlu1 %2099  ;;  %5020 = vrcp.f32 %v2167_v11 }
 0xc2b   : > { %5022 = vrcp.f32 %v2180_v28 }
 0xc2c   : > { %5024 = vrcp.f32 %v2181_v26 }
 0xc2e   : > { %v2275_v53 = vpop.permute.xlu1 %2274 }
 0xc2f   : > { %v2285_v18 = vsel %vm644_vm3, %v2229_v49, %v2275_v53 }
 0xc31   : > { %v2414_v63 = vpop.permute.xlu0 %2413 }
 0xc32   : > { %v2425_v10 = vsel %vm644_vm3, %v2236_v58, %v2414_v63  ;;  %v2416_v48 = vpop.permute.xlu1 %2415 }
 0xc33   : > { %v2426_v55 = vsel %vm644_vm3, %v2237_v31, %v2416_v48  ;;  %4350 = vmatprep.mubr.msk.f32.mxu0 %vm808_vm10, %v2425_v10  ;;  %v5019_v53 = vpop.eup %5018 }
 0xc34   : > { %4351 = vmatmul.mubr.msk.f32.vlgmr.msra.gmra.mrb[12].mxu0 %vm808_vm10, %v2426_v55  ;;  %v5021_v33 = vpop.eup %5020  ;;  %v2230_v0 = vmul.f32 %v5019_v53, %v6199_v35 }
 0xc35   : > { %4541 = vmatpush3.bf16.msra.mxu0 %v5991_v34  ;;  %v4526_v34 = vpack.c.bf16 %v4783_v57, %v4782_v38  ;;  %v2555_v42 = vpop.permute.xlu0 %2554  ;;  %v5023_v13 = vpop.eup %5022  ;;  %v2231_v63 = vmul.f32 %v5021_v33, %v6149_v47 }
 0xc36   : > { %4543 = vmatprep.subr.bf16.mxu0 %v4542_v45  ;;  %v2273_v36 = vpop.permute.xlu1 %2272  ;;  %v5025_v14 = vpop.eup %5024  ;;  %v2244_v10 = vmul.f32 %v5023_v13, %v6104_v24 }
 0xc37   : > { %v2284_v4 = vsel %vm644_vm3, %v2228_v61, %v2273_v36  ;;  %v2245_v47 = vmul.f32 %v5025_v14, %v6073_v56  ;;  %v5159_v14 = vmov 0.0  }
 0xc38   : > { %4328 = vmatprep.mubr.msk.f32.mxu1 %vm808_vm10, %v2284_v4  ;;  %v2566_v46 = vsel %vm644_vm3, %v2244_v10, %v2555_v42  ;;  %v2183_v4 = vmax.f32 %v6239_v21, 1e-30 }
 0xc39   : > { %4545 = vmatpush3.bf16.msra.mxu0 %v4542_v45  ;;  %4329 = vmatmul.mubr.msk.f32.vlgmr.msra.gmra.mrb[8].mxu1 %vm808_vm10, %v2285_v18 }
 0xc3a   : > { %4525 = vmatpush3.bf16.msra.mxu1 %v5989_v40  ;;  %4547 = vmatprep.subr.bf16.mxu0 %v4546_v52  ;;  %v2174_v40 = vmax.f32 %v6274_v15, 1e-30  ;;  %v2557_v15 = vpop.permute.xlu1 %2556  ;;  %v2279_v25 = vpop.permute.xlu0 %2278 }
 0xc3b   : > { %4527 = vmatprep.subr.bf16.mxu1 %v4526_v34  ;;  %v2287_v55 = vsel %vm644_vm3, %v2231_v63, %v2279_v25  ;;  %v2567_v61 = vsel %vm644_vm3, %v2245_v47, %v2557_v15  ;;  %v6839_v15 = vlaneseq  ;;  %v3978_v25 = vadd.s32 4294967295, %v5294_v20 }
 0xc3c   : > { %5026 = vrcp.f32 %v2174_v40 }
 0xc3d   : > { %4549 = vmatpush3.bf16.msra.mxu0 %v4546_v52  ;;  %5028 = vrcp.f32 %v2175_v23  ;;  %v6350_v53 = vand.u32 127, %v6839_v15 }
 0xc3e   : > { %4529 = vmatpush3.bf16.msra.mxu1 %v4526_v34  ;;  %4551 = vmatprep.subr.bf16.mxu0 %v4550_v16  ;;  %5030 = vrcp.f32 %v2188_v3  ;;  %v2420_v31 = vpop.permute.xlu1 %2419 }
 0xc3f   : > { %4531 = vmatprep.subr.bf16.mxu1 %v4530_v27  ;;  %5032 = vrcp.f32 %v2189_v9 }
 0xc41   : > { %4553 = vmatpush3.bf16.msra.mxu0 %v4550_v16 }
 0xc42   : > { %4533 = vmatpush3.bf16.msra.mxu1 %v4530_v27 }
 0xc43   : > { %4535 = vmatprep.subr.bf16.mxu1 %v4534_v54 }
 0xc46   : > { %4537 = vmatpush3.bf16.msra.mxu1 %v4534_v54  ;;  %v5027_v58 = vpop.eup %5026 }
 0xc47   : > { %v5029_v39 = vpop.eup %5028  ;;  %v2238_v35 = vmul.f32 %v5027_v58, %v6203_v30 }
 0xc48   : > { %v5031_v1 = vpop.eup %5030  ;;  %v2239_v45 = vmul.f32 %v5029_v39, %v6137_v7 }
 0xc49   : > { %v5033_v17 = vpop.eup %5032  ;;  %v2252_v38 = vmul.f32 %v5031_v1, %v6113_v32  ;;  %v2182_v32 = vmax.f32 %v6272_v5, 1e-30 }
 0xc4a   : > { %v2428_v49 = vsel %vm644_vm3, %v2239_v45, %v2420_v31  ;;  %v2253_v56 = vmul.f32 %v5033_v17, %v6079_v19 }
 0xc4b   : > { %5034 = vrcp.f32 %v2182_v32 }
 0xc4c   : > { %5036 = vrcp.f32 %v2183_v4 }
 0xc4d   : > { %v2277_v41 = vpop.permute.xlu0 %2276  ;;  %5038 = vrcp.f32 %v2190_v43 }
 0xc4e   : > { %v2286_v48 = vsel %vm644_vm3, %v2230_v0, %v2277_v41  ;;  %5040 = vrcp.f32 %v2191_v62 }
 0xc4f   : > { %4331 = vmatprep.mubr.msk.f32.mxu1 %vm808_vm10, %v2286_v48 }
 0xc50   : > { %4332 = vmatmul.mubr.msk.f32.gmra.mrb[10].mxu1 %vm808_vm10, %v2287_v55 }
 0xc51   : > { %v2418_v6 = vpop.permute.xlu1 %2417  ;;  %v2696_v24 = vpop.permute.xlu0 %2695  ;;  %4372 = vmatprep.mubr.msk.f32.mxu1 %vm808_vm10, %v2566_v46  ;;  %v4040_v46 = vld [vmem:[%s6805_s7] ss:$0 sm:$0xff] }
 0xc52   : > { %v2427_v57 = vsel %vm644_vm3, %v2238_v35, %v2418_v6  ;;  %v2707_v30 = vsel %vm644_vm3, %v2252_v38, %v2696_v24 }
 0xc53   : > { %4353 = vmatprep.mubr.msk.f32.mxu0 %vm808_vm10, %v2427_v57 }
 0xc54   : > { %4354 = vmatmul.mubr.msk.f32.gmra.mrb[14].mxu0 %vm808_vm10, %v2428_v49  ;;  %4373 = vmatmul.mubr.msk.f32.vlgmr.msra.gmra.mrb[12].mxu1 %vm808_vm10, %v2567_v61 }
 0xc55   : > { %v2698_v7 = vpop.permute.xlu1 %2697  ;;  %4394 = vmatprep.mubr.msk.f32.mxu0 %vm808_vm10, %v2707_v30  ;;  %v5035_v19 = vpop.eup %5034 }
 0xc56   : > { %v2708_v36 = vsel %vm644_vm3, %v2253_v56, %v2698_v7  ;;  %v5037_v18 = vpop.eup %5036  ;;  %v2246_v29 = vmul.f32 %v5035_v19, %v6185_v60  ;;  %v6366_v7 = vadd.s32 8, %v5294_v20 }
 0xc57   : > { %v5039_v22 = vpop.eup %5038  ;;  %v2247_v34 = vmul.f32 %v5037_v18, %v6145_v44 }
 0xc58   : > { %4395 = vmatmul.mubr.msk.f32.vlgmr.msra.gmra.mrb[16].mxu0 %vm808_vm10, %v2708_v36  ;;  %v5041_v5 = vpop.eup %5040  ;;  %v2254_v8 = vmul.f32 %v5039_v22, %v6189_v2  ;;  %v6369_v36 = vadd.s32 16, %v5294_v20  ;;  %v6378_v22 = vadd.s32 24, %v5294_v20 }
 0xc59   : > { %v2561_v52 = vpop.permute.xlu1 %2560  ;;  %v2255_v16 = vmul.f32 %v5041_v5, %v6153_v12 }
 0xc5a   : > { %v2569_v11 = vsel %vm644_vm3, %v2247_v34, %v2561_v52  ;;  %v3980_v5 = vadd.s32 4294967295, %v6369_v36 }
 0xc5c   : > { %vm377_vm13 = vcmp.eq.s32.totalorder %v6350_v53, %v3980_v5 }
 0xc5d   : > { %v2702_v59 = vpop.permute.xlu1 %2701 }
 0xc5e   : > { %v2710_v44 = vsel %vm644_vm3, %v2255_v16, %v2702_v59  ;;  %v3981_v59 = vadd.s32 4294967295, %v6378_v22  ;;  %v3984_v16 = vsel %vm377_vm13, 1.0, %v5159_v14  ;;  %vm6822_vm13 = vcmask 97280  }
 0xc60   : > { %vm378_vm14 = vcmp.eq.s32.totalorder %v6350_v53, %v3981_v59 }
 0xc6f   : > { %v2559_v50 = vpop.permute.xlu0 %2558 }
 0xc70   : > { %v2568_v21 = vsel %vm644_vm3, %v2246_v29, %v2559_v50  ;;  %v3979_v29 = vadd.s32 4294967295, %v6366_v7 }
 0xc71   : > { %4375 = vmatprep.mubr.msk.f32.mxu1 %vm808_vm10, %v2568_v21 }
 0xc72   : > { %4376 = vmatmul.mubr.msk.f32.gmra.mrb[14].mxu1 %vm808_vm10, %v2569_v11  ;;  %vm376_vm12 = vcmp.eq.s32.totalorder %v6350_v53, %v3979_v29 }
 0xc73   : > { %v2700_v28 = vpop.permute.xlu0 %2699 }
 0xc74   : > { %v2709_v60 = vsel %vm644_vm3, %v2254_v8, %v2700_v28  ;;  %v3983_v8 = vsel %vm376_vm12, 1.0, %v5159_v14  ;;  %v3985_v28 = vsel %vm378_vm14, 1.0, %v5159_v14 }
 0xc75   : > { %4397 = vmatprep.mubr.msk.f32.mxu0 %vm808_vm10, %v2709_v60  ;;  %v3019_v60 = vmul.u32 3, %v6350_v53 }
 0xc76   : > { %4398 = vmatmul.mubr.msk.f32.gmra.mrb[18].mxu0 %vm808_vm10, %v2710_v44  ;;  %vm375_vm10 = vcmp.eq.s32.totalorder %v6350_v53, %v3978_v25  ;;  %v3022_v44 = vadd.s32 1, %v6350_v53 }
 0xc77   : > { %v3982_v0 = vsel %vm375_vm10, 1.0, %v5159_v14  ;;  %vm3020_vm15 = vcmp.ge.s32.totalorder %v5294_v20, %v3019_v60  ;;  %vm3021_vm0 = vcmp.ge.s32.totalorder %v6366_v7, %v3019_v60 }
 0xc78   : > { %4408 = vmatprep.mubr.msk.f32.mxu1 %vm644_vm3, %v3982_v0 }
 0xd07   : > { %v4352_v51 = vpop.f32.mrb[12].mxu0 }
 0xd08   : > { %2838 = vrot.lane.b32.xlu1 %v4352_v51, %s5156_s22  ;;  %v2531_v37 = vpop.f32.mrb[13].mxu0  ;;  %v3023_v51 = vmul.u32 3, %v3022_v44 }
 0xd09   : > { %2836 = vrot.lane.b32.xlu0 %v2531_v37, %s5156_s22 }
 0xd0a   : > { %vm3024_vm1 = vcmp.lt.s32.totalorder %v5294_v20, %v3023_v51  ;;  %vm3025_vm2 = vcmp.lt.s32.totalorder %v6366_v7, %v3023_v51 }
 0xd0b   : > { %vm3026_vm5 = vmand %vm3020_vm15, %vm3024_vm1 }
 0xd0c   : > { %v4330_v27 = vpop.f32.mrb[8].mxu1  ;;  %vm3027_vm6 = vmand %vm3021_vm0, %vm3025_vm2 }
 0xd0d   : > { %v2390_v26 = vpop.f32.mrb[9].mxu1  ;;  %v4046_v37 = vsel %vm3027_vm6, 1.0, %v5159_v14  ;;  %vm4563_vm7 = vmpackc.low %vm3045_vm4, %vm3026_vm5 }
 0xd23   : > { %v4333_v40 = vpop.f32.mrb[10].mxu1 }
 0xd24   : > { %v2400_v2 = vpop.f32.mrb[11].mxu1 }
 0xd27   : > { %v4355_v23 = vpop.f32.mrb[14].mxu0  ;;  %v4374_v12 = vpop.f32.mrb[12].mxu1 }
 0xd28   : > { %2842 = vrot.lane.b32.xlu1 %v4355_v23, %s5156_s22  ;;  %v2541_v3 = vpop.f32.mrb[15].mxu0  ;;  %v2672_v54 = vpop.f32.mrb[13].mxu1 }
 0xd29   : > { %2840 = vrot.lane.b32.xlu0 %v2541_v3, %s5156_s22 }
 0xd2b   : > { %v4396_v9 = vpop.f32.mrb[16].mxu0 }
 0xd2c   : > { %v2813_v42 = vpop.f32.mrb[17].mxu0  ;;  %2854 = vrot.lane.b32.xlu1 %v4374_v12, %s5157_s24 }
 0xd2d   : > { %2852 = vrot.lane.b32.xlu0 %v2672_v54, %s5157_s24 }
 0xd30   : > { %2870 = vrot.lane.b32.xlu1 %v4396_v9, %s5158_s21 }
 0xd31   : > { %2868 = vrot.lane.b32.xlu0 %v2813_v42, %s5158_s21 }
 0xd45   : > { %v4377_v33 = vpop.f32.mrb[14].mxu1 }
 0xd46   : > { %2858 = vrot.lane.b32.xlu1 %v4377_v33, %s5157_s24  ;;  %v2682_v13 = vpop.f32.mrb[15].mxu1 }
 0xd47   : > { %2856 = vrot.lane.b32.xlu0 %v2682_v13, %s5157_s24  ;;  %s6744_s24 = scalar_lea.hbm %s6807_s9, %s4113_s23 }
 0xd49   : > { %v4399_v58 = vpop.f32.mrb[18].mxu0 }
 0xd4a   : > { %v2823_v63 = vpop.f32.mrb[19].mxu0  ;;  %2874 = vrot.lane.b32.xlu1 %v4399_v58, %s5158_s21 }
 0xd4b   : > { %2872 = vrot.lane.b32.xlu0 %v2823_v63, %s5158_s21  ;;  %s6748_s21 = scalar_lea.sflag [#allocation3], %s346_s14 }
 0xd7a   : > { %v2839_v31 = vpop.permute.xlu1 %2838 }
 0xd7b   : > { %v2837_v41 = vpop.permute.xlu0 %2836  ;;  %v2882_v55 = vsel %vm6825_vm8, %v4330_v27, %v2839_v31  ;;  %v5160_v27 = vmov 1.0  }
 0xd7c   : > { %v2881_v35 = vsel %vm6825_vm8, %v2390_v26, %v2837_v41  ;;  %v4562_v26 = vpack.c.bf16 %v4046_v37, %v5160_v27  ;;  %v5161_v41 = vmov 1   ;;  %v6842_v27 = vld [vmem:[#allocation5_spill] sm:$0xff] }
 0xd7d   : > { %4830 = vset.pattern.permute.xlu0 %v5161_v41 }
 0xd7e   : > { %4564 = vmatprep.subr.msk.bf16.mxu0 %vm4563_vm7, %v4562_v26 }
 0xd7f   : > { %4567 = vmatpush3.bf16.msk.msra.mxu0 %vm4563_vm7, %v4562_v26 }
 0xd9a   : > { %v2843_v39 = vpop.permute.xlu1 %2842 }
 0xd9b   : > { %v2841_v10 = vpop.permute.xlu0 %2840  ;;  %v2884_v32 = vsel %vm6825_vm8, %v4333_v40, %v2843_v39  ;;  %v5162_v39 = vmov 0  }
 0xd9c   : > { %v2883_v4 = vsel %vm6825_vm8, %v2400_v2, %v2841_v10  ;;  %4829 = vset.pattern.permute.xlu1 %v5162_v39  ;;  %vm3550_vm8 = vcmask 23568  }
 0xd9e   : > { %v2855_v48 = vpop.permute.xlu1 %2854 }
 0xd9f   : > { %v2853_v1 = vpop.permute.xlu0 %2852  ;;  %v2887_v17 = vsel %vm6824_vm9, %v2882_v55, %v2855_v48 }
 0xda0   : > { %v2886_v45 = vsel %vm6824_vm9, %v2881_v35, %v2853_v1 }
 0xda2   : > { %v2871_v47 = vpop.permute.xlu1 %2870 }
 0xda3   : > { %v2892_v6 = vsel %vm6823_vm11, %v2887_v17, %v2871_v47  ;;  %v2869_v24 = vpop.permute.xlu0 %2868 }
 0xda4   : > { %v2903_v57 = vadd.f32 %v4040_v46, %v2892_v6  ;;  %v2891_v38 = vsel %vm6823_vm11, %v2886_v45, %v2869_v24 }
 0xda5   : > { %v2902_v61 = vadd.f32 %v4040_v46, %v2891_v38  ;;  %v6840_v38 = vmov 3  }
 0xda7   : > { %v4554_v49 = vpack.c.bf16 %v2903_v57, %v2902_v61 }
 0xda9   : > { %4555 = vmatprep.subr.bf16.mxu1 %v4554_v49 }
 0xdaa   : > { %4557 = vmatpush3.bf16.msra.mxu1 %v4554_v49 }
 0xdb8   : > { %v2859_v30 = vpop.permute.xlu1 %2858 }
 0xdb9   : > { %v2857_v56 = vpop.permute.xlu0 %2856  ;;  %v2889_v43 = vsel %vm6824_vm9, %v2884_v32, %v2859_v30 }
 0xdba   : > { %v2888_v19 = vsel %vm6824_vm9, %v2883_v4, %v2857_v56 }
 0xdbc   : > { %v2875_v62 = vpop.permute.xlu1 %2874 }
 0xdbd   : > { %v2894_v18 = vsel %vm6823_vm11, %v2889_v43, %v2875_v62  ;;  %v2873_v52 = vpop.permute.xlu0 %2872 }
 0xdbe   : > { %v2905_v34 = vadd.f32 %v4040_v46, %v2894_v18  ;;  %v2893_v50 = vsel %vm6823_vm11, %v2888_v19, %v2873_v52 }
 0xdbf   : > { %v2904_v21 = vadd.f32 %v4040_v46, %v2893_v50 }
 0xdc1   : > { %v4558_v11 = vpack.c.bf16 %v2905_v34, %v2904_v21 }
 0xdc3   : > { %4559 = vmatprep.subr.bf16.mxu1 %v4558_v11 }
 0xdc4   : > { %4561 = vmatpush3.bf16.msra.mxu1 %v4558_v11 }
 0xdc7   : > { %4409 = vmatmul.mubr.msk.f32.vlgmr.msra.gmra.mrb[16].mxu1 %vm644_vm3, %v3983_v8 }
 0xdc8   : > { %4411 = vmatprep.mubr.msk.f32.mxu1 %vm644_vm3, %v3984_v16 }
 0xdcb   : > { %4412 = vmatmul.mubr.msk.f32.gmra.mrb[18].mxu1 %vm644_vm3, %v3985_v28 }
 0xe9a   : > { %v4410_v40 = vpop.f32.mrb[16].mxu1 }
 0xe9b   : > { %v3004_v2 = vsub.f32 %v2903_v57, %v4410_v40  ;;  %v2984_v23 = vpop.f32.mrb[17].mxu1  ;;  %v6843_v40 = vld [vmem:[#allocation6_spill] sm:$0xff] }
 0xe9c   : > { %v3003_v12 = vsub.f32 %v2902_v61, %v2984_v23  ;;  %v6841_v61 = vmov 2   ;;  %v6844_v23 = vsub.s32 3, %v5294_v20 }
 0xe9d   : > { %vm3008_vm10 = vcmp.ne.f32.partialorder %v3004_v2, %v3004_v2 }
 0xe9e   : > { %v6399_v3 = vsel %vm3008_vm10, 0.0, %v3004_v2  ;;  %vm3007_vm12 = vcmp.ne.f32.partialorder %v3003_v12, %v3003_v12  ;;  %v4413_v54 = vpop.f32.mrb[18].mxu1 }
 0xe9f   : > { %v6401_v9 = vsel %vm3007_vm12, 0.0, %v3003_v12  ;;  %v3006_v42 = vsub.f32 %v2905_v34, %v4413_v54  ;;  %v2994_v15 = vpop.f32.mrb[19].mxu1  ;;  %v3016_v13 = vmul.f32 %v6399_v3, %v6399_v3 }
 0xea0   : > { %v3015_v25 = vmul.f32 %v6401_v9, %v6401_v9  ;;  %v3005_v33 = vsub.f32 %v2904_v21, %v2994_v15 }
 0xea1   : > { %vm3010_vm14 = vcmp.ne.f32.partialorder %v3006_v42, %v3006_v42 }
 0xea2   : > { %v6407_v0 = vsel %vm3010_vm14, 0.0, %v3006_v42  ;;  %vm3009_vm15 = vcmp.ne.f32.partialorder %v3005_v33, %v3005_v33  ;;  %4418 = vmatprep.mubr.msk.f32.mxu0 %vm6822_vm13, %v3015_v25 }
 0xea3   : > { %v6410_v58 = vsel %vm3009_vm15, 0.0, %v3005_v33  ;;  %4419 = vmatmul.mubr.msk.f32.vlgmr.msra.gmra.mrb[20].mxu0 %vm6822_vm13, %v3016_v13  ;;  %v3018_v31 = vmul.f32 %v6407_v0, %v6407_v0 }
 0xea4   : > { %v3017_v63 = vmul.f32 %v6410_v58, %v6410_v58 }
 0xea6   : > { %4421 = vmatprep.mubr.msk.f32.mxu0 %vm6822_vm13, %v3017_v63 }
 0xea7   : > { %4422 = vmatmul.mubr.msk.f32.gmra.mrb[22].mxu0 %vm6822_vm13, %v3018_v31  ;;  %v6845_v31 = vsub.s32 2, %v5294_v20 }
 0xf76   : > { %v4420_v10 = vpop.f32.mrb[20].mxu0 }
 0xf77   : > { %5042 = vrsqrt.f32 %v4420_v10  ;;  %v3115_v48 = vpop.f32.mrb[21].mxu0  ;;  %vm3143_vm0 = vcmp.eq.f32.partialorder %v4420_v10, inf  ;;  %v3146_v17 = vand.u32 2147483648, %v4420_v10  ;;  %vm3145_vm1 = vcmp.eq.f32.partialorder %v4420_v10, 0.0 }
 0xf78   : > { %5044 = vrsqrt.f32 %v3115_v48  ;;  %vm3136_vm2 = vcmp.eq.f32.partialorder %v3115_v48, inf  ;;  %v3139_v30 = vand.u32 2147483648, %v3115_v48  ;;  %vm3138_vm4 = vcmp.eq.f32.partialorder %v3115_v48, 0.0 }
 0xf7a   : > { %v4423_v1 = vpop.f32.mrb[22].mxu0 }
 0xf7b   : > { %v3125_v55 = vpop.f32.mrb[23].mxu0  ;;  %5046 = vrsqrt.f32 %v4423_v1  ;;  %vm3157_vm5 = vcmp.eq.f32.partialorder %v4423_v1, inf  ;;  %v3160_v43 = vand.u32 2147483648, %v4423_v1  ;;  %vm3159_vm6 = vcmp.eq.f32.partialorder %v4423_v1, 0.0 }
 0xf7c   : > { %5048 = vrsqrt.f32 %v3125_v55  ;;  %vm3150_vm7 = vcmp.eq.f32.partialorder %v3125_v55, inf  ;;  %v3153_v29 = vand.u32 2147483648, %v3125_v55  ;;  %vm3152_vm10 = vcmp.eq.f32.partialorder %v3125_v55, 0.0 }
 0xf81   : > { %v5043_v46 = vpop.eup %5042 }
 0xf82   : > { %v3142_v35 = vmul.f32 %v5043_v46, %v4420_v10  ;;  %v5045_v45 = vpop.eup %5044 }
 0xf83   : > { %v3135_v24 = vmul.f32 %v5045_v45, %v3115_v48 }
 0xf84   : > { %v3144_v47 = vsel %vm3143_vm0, %v4420_v10, %v3142_v35 }
 0xf85   : > { %v6421_v6 = vsel %vm3145_vm1, %v3146_v17, %v3144_v47  ;;  %v5047_v57 = vpop.eup %5046  ;;  %v3137_v49 = vsel %vm3136_vm2, %v3115_v48, %v3135_v24 }
 0xf86   : > { %3335 = vperm.xlu0 %4830, %v6421_v6   ;;  %3205 = vperm.xlu1 %4829, %v6421_v6   ;;  %v3156_v56 = vmul.f32 %v5047_v57, %v4423_v1  ;;  %v6429_v32 = vsel %vm3138_vm4, %v3139_v30, %v3137_v49  ;;  %v5049_v62 = vpop.eup %5048 }
 0xf87   : > { %v3149_v18 = vmul.f32 %v5049_v62, %v3125_v55 }
 0xf88   : > { %v3158_v4 = vsel %vm3157_vm5, %v4423_v1, %v3156_v56 }
 0xf89   : > { %v6435_v19 = vsel %vm3159_vm6, %v3160_v43, %v3158_v4  ;;  %v3151_v52 = vsel %vm3150_vm7, %v3125_v55, %v3149_v18 }
 0xf8a   : > { %4832 = vset.pattern.permute.xlu0 %v6840_v38  ;;  %4831 = vset.pattern.permute.xlu1 %v6841_v61  ;;  %v6445_v34 = vsel %vm3152_vm10, %v3153_v29, %v3151_v52 }
 0xf8b   : > { %3591 = vperm.xlu0 %4832, %v6421_v6   ;;  %3463 = vperm.xlu1 %4831, %v6421_v6  }
 0xf8f   : > { %4833 = vset.pattern.permute.xlu0 %v5162_v39  ;;  %4834 = vset.pattern.permute.xlu1 %v5161_v41 }
 0xf90   : > { %3331 = vperm.xlu1 %4834, %v6429_v32   ;;  %3200 = vperm.xlu0 %4833, %v6429_v32  }
 0xf94   : > { %4835 = vset.pattern.permute.xlu1 %v6841_v61  ;;  %4838 = vset.pattern.permute.xlu0 %v5161_v41 }
 0xf95   : > { %3459 = vperm.xlu1 %4835, %v6429_v32   ;;  %3343 = vperm.xlu0 %4838, %v6435_v19  }
 0xf99   : > { %4836 = vset.pattern.permute.xlu1 %v6840_v38  ;;  %4840 = vset.pattern.permute.xlu0 %v6840_v38 }
 0xf9a   : > { %3587 = vperm.xlu1 %4836, %v6429_v32   ;;  %3599 = vperm.xlu0 %4840, %v6435_v19  }
 0xf9e   : > { %4837 = vset.pattern.permute.xlu1 %v5162_v39  ;;  %4841 = vset.pattern.permute.xlu0 %v5162_v39 }
 0xf9f   : > { %3215 = vperm.xlu1 %4837, %v6435_v19   ;;  %3210 = vperm.xlu0 %4841, %v6445_v34  }
 0xfa3   : > { %4839 = vset.pattern.permute.xlu1 %v6841_v61  ;;  %4846 = vset.pattern.permute.xlu0 %v5161_v41 }
 0xfa4   : > { %3471 = vperm.xlu1 %4839, %v6435_v19  }
 0xfa8   : > { %4842 = vset.pattern.permute.xlu1 %v5161_v41 }
 0xfa9   : > { %3339 = vperm.xlu1 %4842, %v6445_v34  }
 0xfad   : > { %4843 = vset.pattern.permute.xlu1 %v6841_v61 }
 0xfae   : > { %3467 = vperm.xlu1 %4843, %v6445_v34  }
 0xfb2   : > { %4844 = vset.pattern.permute.xlu1 %v6840_v38 }
 0xfb3   : > { %3595 = vperm.xlu1 %4844, %v6445_v34  }
 0xfdc   : > { %3162 = vxpose.xlu1.b32.start [1/4] (short) (narrow) %v6429_v32, 8 }
 0xfe0   : > { %3163 = vxpose.xlu1.b32.cont [2/4] (short) (narrow) %v6421_v6, 8 }
 0xfe4   : > { %3164 = vxpose.xlu1.b32.cont [3/4] (short) (narrow) %v6445_v34, 8 }
 0xfe8   : > { %3165 = vxpose.xlu1.b32.end [4/4] (short) (narrow) %v6435_v19, 8 }
0x1005   : > { %v3206_v50 = vpop.permute.xlu1 %3205  ;;  %v3336_v44 = vpop.permute.xlu0 %3335 }
0x1006   : > { %4845 = vset.pattern.permute.xlu1 %v5162_v39 }
0x100a   : > { %v3464_v5 = vpop.permute.xlu1 %3463  ;;  %v3592_v54 = vpop.permute.xlu0 %3591 }
0x100f   : > { %v6465_v21 = vpop.permute.xlu1 %3331  ;;  %v3201_v39 = vpop.permute.xlu0 %3200 }
0x1014   : > { %v6467_v11 = vpop.permute.xlu1 %3459  ;;  %v6514_v17 = vpop.permute.xlu0 %3343 }
0x1019   : > { %v3588_v59 = vpop.permute.xlu1 %3587 }
0x101e   : > { %v6469_v8 = vpop.permute.xlu1 %3215 }
0x1023   : > { %v6471_v16 = vpop.permute.xlu1 %3471 }
0x1028   : > { %v6473_v28 = vpop.permute.xlu1 %3339 }
0x102d   : > { %v6475_v60 = vpop.permute.xlu1 %3467 }
0x1032   : > { %v6477_v51 = vpop.permute.xlu1 %3595 }
0x105c   : > { %v3178_v37 = vpop.trf.xlu1 }
0x105d   : > { %v6480_v26 = vrot.slane %v3178_v37, %v6842_v27  ;;  %v6483_v2 = vrot.slane %v3178_v37, %v6843_v40  ;;  %v6487_v12 = vrot.slane %v3178_v37, %v6844_v23  ;;  %v6501_v41 = vrot.slane %v3178_v37, %v6845_v31 }
0x105f   : > { %vm3347_vm12 = vcmp.lt.f32.partialorder %v6483_v2, %v3336_v44  ;;  %vm3219_vm14 = vcmp.lt.f32.partialorder %v6480_v26, %v3206_v50  ;;  %vm3602_vm15 = vcmp.lt.f32.partialorder %v6487_v12, %v3588_v59  ;;  %vm3231_vm0 = vcmp.eq.f32.partialorder %v6480_v26, %v3206_v50 }
0x1060   : > { %v4066_v42 = vsel %vm3347_vm12, 1.0, %v5159_v14  ;;  %v4054_v15 = vsel %vm3219_vm14, 1.0, %v5159_v14  ;;  %v4089_v13 = vsel %vm3602_vm15, 1.0, %v5159_v14  ;;  %v4058_v63 = vsel %vm3231_vm0, 1.0, %v5159_v14 }
0x1061   : > { %v3373_v25 = vsel %vm644_vm3, %v4066_v42, 0.0  ;;  %v3245_v33 = vsel %vm644_vm3, %v4054_v15, 0.0  ;;  %vm3614_vm1 = vcmp.eq.f32.partialorder %v6487_v12, %v3588_v59  ;;  %vm3359_vm2 = vcmp.eq.f32.partialorder %v6483_v2, %v3336_v44  ;;  %v6546_v44 = vpop.permute.xlu0 %3599 }
0x1062   : > { %3374 = vadd.xlane.f32.xlu1 %v3373_v25  ;;  %3246 = vadd.xlane.f32.xlu0 %v3245_v33  ;;  %v3626_v10 = vsel %vm644_vm3, %v4089_v13, 0.0  ;;  %v3257_v48 = vsel %vm644_vm3, %v4058_v63, 0.0  ;;  %v4093_v1 = vsel %vm3614_vm1, 1.0, %v5159_v14  ;;  %v4070_v55 = vsel %vm3359_vm2, 1.0, %v5159_v14 }
0x1063   : > { %vm3221_vm4 = vcmp.lt.f32.partialorder %v6480_v26, %v6469_v8  ;;  %vm3475_vm5 = vcmp.lt.f32.partialorder %v6501_v41, %v3464_v5  ;;  %v3638_v46 = vsel %vm644_vm3, %v4093_v1, 0.0  ;;  %v3385_v35 = vsel %vm644_vm3, %v4070_v55, 0.0 }
0x1064   : > { %v4056_v47 = vsel %vm3221_vm4, 1.0, %v5159_v14  ;;  %v4078_v45 = vsel %vm3475_vm5, 1.0, %v5159_v14  ;;  %vm3349_vm6 = vcmp.lt.f32.partialorder %v6483_v2, %v6514_v17  ;;  %vm3487_vm7 = vcmp.eq.f32.partialorder %v6501_v41, %v3464_v5 }
0x1065   : > { %v3251_v24 = vsel %vm644_vm3, %v4056_v47, 0.0  ;;  %v3501_v57 = vsel %vm644_vm3, %v4078_v45, 0.0  ;;  %v4068_v49 = vsel %vm3349_vm6, 1.0, %v5159_v14  ;;  %v4082_v30 = vsel %vm3487_vm7, 1.0, %v5159_v14  ;;  %v3211_v47 = vpop.permute.xlu0 %3210 }
0x1066   : > { %3627 = vadd.xlane.f32.xlu1 %v3626_v10  ;;  %3258 = vadd.xlane.f32.xlu0 %v3257_v48  ;;  %vm3477_vm10 = vcmp.lt.f32.partialorder %v6501_v41, %v6471_v16  ;;  %vm3603_vm12 = vcmp.lt.f32.partialorder %v6487_v12, %v3592_v54  ;;  %v3379_v56 = vsel %vm644_vm3, %v4068_v49, 0.0  ;;  %v3513_v4 = vsel %vm644_vm3, %v4082_v30, 0.0 }
0x1067   : > { %v4080_v43 = vsel %vm3477_vm10, 1.0, %v5159_v14  ;;  %v4090_v62 = vsel %vm3603_vm12, 1.0, %v5159_v14  ;;  %vm3476_vm14 = vcmp.lt.f32.partialorder %v6501_v41, %v6475_v60  ;;  %vm3615_vm15 = vcmp.eq.f32.partialorder %v6487_v12, %v3592_v54 }
0x1068   : > { %vm3616_vm0 = vcmp.eq.f32.partialorder %v6487_v12, %v6477_v51  ;;  %v3507_v18 = vsel %vm644_vm3, %v4080_v43, 0.0  ;;  %v3629_v52 = vsel %vm644_vm3, %v4090_v62, 0.0  ;;  %v4079_v29 = vsel %vm3476_vm14, 1.0, %v5159_v14 }
0x1069   : > { %v4094_v50 = vsel %vm3615_vm15, 1.0, %v5159_v14  ;;  %vm3604_vm1 = vcmp.lt.f32.partialorder %v6487_v12, %v6477_v51  ;;  %vm3218_vm2 = vcmp.lt.f32.partialorder %v6480_v26, %v3201_v39  ;;  %v3504_v5 = vsel %vm644_vm3, %v4079_v29, 0.0 }
0x106a   : > { %3639 = vadd.xlane.f32.xlu1 %v3638_v46  ;;  %3386 = vadd.xlane.f32.xlu0 %v3385_v35  ;;  %v3641_v59 = vsel %vm644_vm3, %v4094_v50, 0.0  ;;  %v4091_v37 = vsel %vm3604_vm1, 1.0, %v5159_v14  ;;  %v4053_v40 = vsel %vm3218_vm2, 1.0, %v5159_v14  ;;  %vm3605_vm4 = vcmp.lt.f32.partialorder %v6487_v12, %v6546_v44 }
0x106b   : > { %vm3230_vm5 = vcmp.eq.f32.partialorder %v6480_v26, %v3201_v39  ;;  %v3632_v23 = vsel %vm644_vm3, %v4091_v37, 0.0  ;;  %v3242_v54 = vsel %vm644_vm3, %v4053_v40, 0.0  ;;  %v4092_v42 = vsel %vm3605_vm4, 1.0, %v5159_v14 }
0x106c   : > { %v4057_v15 = vsel %vm3230_vm5, 1.0, %v5159_v14  ;;  %vm3346_vm6 = vcmp.lt.f32.partialorder %v6483_v2, %v6465_v21  ;;  %v3635_v25 = vsel %vm644_vm3, %v4092_v42, 0.0  ;;  %vm3358_vm7 = vcmp.eq.f32.partialorder %v6483_v2, %v6465_v21 }
0x106d   : > { %v3254_v33 = vsel %vm644_vm3, %v4057_v15, 0.0  ;;  %v4065_v13 = vsel %vm3346_vm6, 1.0, %v5159_v14  ;;  %v4069_v31 = vsel %vm3358_vm7, 1.0, %v5159_v14  ;;  %vm3474_vm10 = vcmp.lt.f32.partialorder %v6501_v41, %v6467_v11 }
0x106e   : > { %3252 = vadd.xlane.f32.xlu1 %v3251_v24  ;;  %3502 = vadd.xlane.f32.xlu0 %v3501_v57  ;;  %v3370_v63 = vsel %vm644_vm3, %v4065_v13, 0.0  ;;  %v3382_v39 = vsel %vm644_vm3, %v4069_v31, 0.0  ;;  %v4077_v10 = vsel %vm3474_vm10, 1.0, %v5159_v14  ;;  %vm3486_vm12 = vcmp.eq.f32.partialorder %v6501_v41, %v6467_v11 }
0x106f   : > { %v3498_v48 = vsel %vm644_vm3, %v4077_v10, 0.0  ;;  %v4081_v21 = vsel %vm3486_vm12, 1.0, %v5159_v14  ;;  %vm3233_vm14 = vcmp.eq.f32.partialorder %v6480_v26, %v6469_v8  ;;  %vm3361_vm15 = vcmp.eq.f32.partialorder %v6483_v2, %v6514_v17 }
0x1070   : > { %v3510_v1 = vsel %vm644_vm3, %v4081_v21, 0.0  ;;  %v4060_v55 = vsel %vm3233_vm14, 1.0, %v5159_v14  ;;  %v4072_v11 = vsel %vm3361_vm15, 1.0, %v5159_v14  ;;  %vm3489_vm1 = vcmp.eq.f32.partialorder %v6501_v41, %v6471_v16 }
0x1071   : > { %v3263_v46 = vsel %vm644_vm3, %v4060_v55, 0.0  ;;  %v3391_v35 = vsel %vm644_vm3, %v4072_v11, 0.0  ;;  %v4084_v8 = vsel %vm3489_vm1, 1.0, %v5159_v14  ;;  %vm3220_vm2 = vcmp.lt.f32.partialorder %v6480_v26, %v3211_v47 }
0x1072   : > { %3380 = vadd.xlane.f32.xlu1 %v3379_v56  ;;  %3514 = vadd.xlane.f32.xlu0 %v3513_v4  ;;  %v3519_v45 = vsel %vm644_vm3, %v4084_v8, 0.0  ;;  %v4055_v17 = vsel %vm3220_vm2, 1.0, %v5159_v14  ;;  %vm3232_vm4 = vcmp.eq.f32.partialorder %v6480_v26, %v3211_v47  ;;  %vm3348_vm5 = vcmp.lt.f32.partialorder %v6483_v2, %v6473_v28 }
0x1073   : > { %v3248_v24 = vsel %vm644_vm3, %v4055_v17, 0.0  ;;  %v4059_v16 = vsel %vm3232_vm4, 1.0, %v5159_v14  ;;  %v4067_v49 = vsel %vm3348_vm5, 1.0, %v5159_v14  ;;  %vm3360_vm6 = vcmp.eq.f32.partialorder %v6483_v2, %v6473_v28 }
0x1074   : > { %v3260_v57 = vsel %vm644_vm3, %v4059_v16, 0.0  ;;  %v3376_v30 = vsel %vm644_vm3, %v4067_v49, 0.0  ;;  %v4071_v26 = vsel %vm3360_vm6, 1.0, %v5159_v14  ;;  %vm3488_vm7 = vcmp.eq.f32.partialorder %v6501_v41, %v6475_v60 }
0x1075   : > { %v3388_v56 = vsel %vm644_vm3, %v4071_v26, 0.0  ;;  %v4083_v4 = vsel %vm3488_vm7, 1.0, %v5159_v14  ;;  %v4095_v28 = vsel %vm3616_vm0, 1.0, %v5159_v14  ;;  %vm3617_vm10 = vcmp.eq.f32.partialorder %v6487_v12, %v6546_v44 }
0x1076   : > { %3508 = vadd.xlane.f32.xlu1 %v3507_v18  ;;  %3630 = vadd.xlane.f32.xlu0 %v3629_v52  ;;  %v3516_v43 = vsel %vm644_vm3, %v4083_v4, 0.0  ;;  %v3644_v2 = vsel %vm644_vm3, %v4095_v28, 0.0  ;;  %v4096_v60 = vsel %vm3617_vm10, 1.0, %v5159_v14 }
0x1077   : > { %v3647_v41 = vsel %vm644_vm3, %v4096_v60, 0.0 }
0x107a   : > { %3505 = vadd.xlane.f32.xlu1 %v3504_v5  ;;  %3642 = vadd.xlane.f32.xlu0 %v3641_v59 }
0x107e   : > { %3633 = vadd.xlane.f32.xlu1 %v3632_v23  ;;  %3243 = vadd.xlane.f32.xlu0 %v3242_v54 }
0x1082   : > { %3636 = vadd.xlane.f32.xlu1 %v3635_v25  ;;  %3255 = vadd.xlane.f32.xlu0 %v3254_v33 }
0x1086   : > { %3371 = vadd.xlane.f32.xlu0 %v3370_v63 }
0x108a   : > { %3383 = vadd.xlane.f32.xlu0 %v3382_v39 }
0x108e   : > { %3499 = vadd.xlane.f32.xlu0 %v3498_v48 }
0x1092   : > { %3511 = vadd.xlane.f32.xlu0 %v3510_v1 }
0x1096   : > { %3264 = vadd.xlane.f32.xlu0 %v3263_v46 }
0x109a   : > { %3392 = vadd.xlane.f32.xlu0 %v3391_v35 }
0x109e   : > { %3520 = vadd.xlane.f32.xlu0 %v3519_v45 }
0x10a2   : > { %3249 = vadd.xlane.f32.xlu0 %v3248_v24 }
0x10a6   : > { %3261 = vadd.xlane.f32.xlu0 %v3260_v57 }
0x10aa   : > { %3377 = vadd.xlane.f32.xlu0 %v3376_v30 }
0x10ae   : > { %3389 = vadd.xlane.f32.xlu0 %v3388_v56 }
0x10b2   : > { %3517 = vadd.xlane.f32.xlu0 %v3516_v43 }
0x10b6   : > { %3645 = vadd.xlane.f32.xlu0 %v3644_v2 }
0x10ba   : > { %3648 = vadd.xlane.f32.xlu0 %v3647_v41 }
0x10ef   : > { %v3247_v62 = vpop.xlane.xlu0 %3246  ;;  %v3375_v40 = vpop.xlane.xlu1 %3374 }
0x10f0   : > { %vm3267_vm12 = vcmp.le.f32.partialorder %v3247_v62, 15.0  ;;  %vm3395_vm4 = vcmp.le.f32.partialorder %v3375_v40, 15.0 }
0x10f3   : > { %v3259_v18 = vpop.xlane.xlu0 %3258  ;;  %v3628_v23 = vpop.xlane.xlu1 %3627 }
0x10f4   : > { %v3271_v25 = vadd.f32 %v3259_v18, %v3247_v62  ;;  %vm3650_vm13 = vcmp.le.f32.partialorder %v3628_v23, 15.0 }
0x10f6   : > { %vm3275_vm0 = vcmp.gt.f32.partialorder %v3271_v25, 15.0 }
0x10f7   : > { %v3387_v52 = vpop.xlane.xlu0 %3386  ;;  %v3640_v42 = vpop.xlane.xlu1 %3639  ;;  %vm3279_vm14 = vmand %vm3267_vm12, %vm3275_vm0  ;;  %vm3294_vm12 = vcmask 7168  }
0x10f8   : > { %v3399_v31 = vadd.f32 %v3387_v52, %v3375_v40  ;;  %v3654_v10 = vadd.f32 %v3640_v42, %v3628_v23  ;;  %v4062_v46 = vsel %vm3279_vm14, 1.0, %v5159_v14 }
0x10f9   : > { %v3291_v35 = vmul.f32 %v4062_v46, %v6421_v6 }
0x10fa   : > { %vm3403_vm1 = vcmp.gt.f32.partialorder %v3399_v31, 15.0  ;;  %vm3658_vm5 = vcmp.gt.f32.partialorder %v3654_v10, 15.0 }
0x10fb   : > { %v3503_v29 = vpop.xlane.xlu0 %3502  ;;  %v3253_v13 = vpop.xlane.xlu1 %3252  ;;  %vm3407_vm7 = vmand %vm3395_vm4, %vm3403_vm1  ;;  %v3296_v49 = vsel %vm3294_vm12, %v3291_v35, 0.0 }
0x10fc   : > { %vm6618_vm11 = vmand %vm3650_vm13, %vm3658_vm5  ;;  %vm3523_vm9 = vcmp.le.f32.partialorder %v3503_v29, 15.0  ;;  %v6626_v16 = vsel %vm3407_vm7, 1.0, %v5159_v14  ;;  %vm3269_vm4 = vcmp.le.f32.partialorder %v3253_v13, 15.0 }
0x10fd   : > { %v6635_v4 = vsel %vm6618_vm11, 1.0, %v5159_v14  ;;  %v3419_v43 = vmul.f32 %v6626_v16, %v6421_v6 }
0x10ff   : > { %v3515_v50 = vpop.xlane.xlu0 %3514  ;;  %v3381_v48 = vpop.xlane.xlu1 %3380 }
0x1100   : > { %v3527_v21 = vadd.f32 %v3515_v50, %v3503_v29 }
0x1102   : > { %vm3531_vm10 = vcmp.gt.f32.partialorder %v3527_v21, 15.0 }
0x1103   : > { %v6614_v5 = vpop.xlane.xlu0 %3630  ;;  %v6622_v17 = vpop.xlane.xlu1 %3508 }
0x1107   : > { %v3643_v51 = vpop.xlane.xlu0 %3642  ;;  %v6641_v41 = vpop.xlane.xlu1 %3505 }
0x1108   : > { %v3655_v30 = vadd.f32 %v3643_v51, %v6614_v5 }
0x110b   : > { %v3244_v59 = vpop.xlane.xlu0 %3243 }
0x110c   : > { %vm3266_vm2 = vcmp.le.f32.partialorder %v3244_v59, 15.0 }
0x110f   : > { %v3256_v37 = vpop.xlane.xlu0 %3255 }
0x1110   : > { %v3270_v63 = vadd.f32 %v3256_v37, %v3244_v59  ;;  %v6653_v37 = vmul.f32 %v6635_v4, %v6429_v32 }
0x1112   : > { %vm3274_vm15 = vcmp.gt.f32.partialorder %v3270_v63, 15.0 }
0x1113   : > { %v3372_v12 = vpop.xlane.xlu0 %3371  ;;  %vm3278_vm6 = vmand %vm3266_vm2, %vm3274_vm15  ;;  %vm3422_vm2 = vcmask 15368  }
0x1114   : > { %v4061_v24 = vsel %vm3278_vm6, 1.0, %v5159_v14  ;;  %vm3535_vm15 = vmand %vm3523_vm9, %vm3531_vm10  ;;  %vm3394_vm1 = vcmp.le.f32.partialorder %v3372_v12, 15.0  ;;  %vm3397_vm9 = vcmp.le.f32.partialorder %v3381_v48, 15.0  ;;  %v3424_v40 = vsel %vm3422_vm2, %v3419_v43, 0.0 }
0x1115   : > { %v3290_v26 = vmul.f32 %v4061_v24, %v6429_v32  ;;  %v4086_v28 = vsel %vm3535_vm15, 1.0, %v5159_v14  ;;  %vm3659_vm15 = vcmp.gt.f32.partialorder %v3655_v30, 15.0  ;;  %v3308_v51 = vadd.f32 %v4062_v46, %v4061_v24 }
0x1116   : > { %v3547_v29 = vmul.f32 %v4086_v28, %v6421_v6 }
0x1117   : > { %v3384_v44 = vpop.xlane.xlu0 %3383  ;;  %v3295_v50 = vsel %vm3294_vm12, %v3290_v26, 0.0 }
0x1118   : > { %v3398_v1 = vadd.f32 %v3384_v44, %v3372_v12 }
0x111a   : > { %vm3402_vm0 = vcmp.gt.f32.partialorder %v3398_v1, 15.0 }
0x111b   : > { %v3500_v54 = vpop.xlane.xlu0 %3499  ;;  %vm3406_vm13 = vmand %vm3394_vm1, %vm3402_vm0 }
0x111c   : > { %v4073_v60 = vsel %vm3406_vm13, 1.0, %v5159_v14  ;;  %vm3522_vm7 = vcmp.le.f32.partialorder %v3500_v54, 15.0  ;;  %vm3651_vm13 = vcmp.le.f32.partialorder %v6614_v5, 15.0 }
0x111d   : > { %v3418_v12 = vmul.f32 %v4073_v60, %v6429_v32  ;;  %v3436_v45 = vadd.f32 %v6626_v16, %v4073_v60 }
0x111f   : > { %v3512_v15 = vpop.xlane.xlu0 %3511  ;;  %v3423_v10 = vsel %vm3422_vm2, %v3418_v12, 0.0 }
0x1120   : > { %v3526_v47 = vadd.f32 %v3512_v15, %v3500_v54  ;;  %v3297_v15 = vadd.f32 %v3296_v49, %v3295_v50 }
0x1122   : > { %vm3530_vm5 = vcmp.gt.f32.partialorder %v3526_v47, 15.0 }
0x1123   : > { %v3265_v33 = vpop.xlane.xlu0 %3264  ;;  %vm6643_vm0 = vmand %vm3522_vm7, %vm3530_vm5  ;;  %vm3525_vm5 = vcmp.le.f32.partialorder %v6622_v17, 15.0 }
0x1124   : > { %v3273_v11 = vadd.f32 %v3265_v33, %v3253_v13  ;;  %v4085_v25 = vsel %vm6643_vm0, 1.0, %v5159_v14  ;;  %v3552_v33 = vsel %vm3550_vm8, %v3547_v29, 0.0 }
0x1125   : > { %v3564_v26 = vadd.f32 %v4086_v28, %v4085_v25 }
0x1126   : > { %vm3277_vm14 = vcmp.gt.f32.partialorder %v3273_v11, 15.0 }
0x1127   : > { %v3393_v39 = vpop.xlane.xlu0 %3392  ;;  %vm3281_vm6 = vmand %vm3269_vm4, %vm3277_vm14 }
0x1128   : > { %v3401_v57 = vadd.f32 %v3393_v39, %v3381_v48  ;;  %v4064_v18 = vsel %vm3281_vm6, 1.0, %v5159_v14  ;;  %vm3663_vm6 = vmand %vm3651_vm13, %vm3659_vm15  ;;  %v3634_v39 = vpop.xlane.xlu1 %3633 }
0x1129   : > { %v3293_v23 = vmul.f32 %v4064_v18, %v6435_v19  ;;  %v6674_v1 = vsel %vm3663_vm6, 1.0, %v5159_v14 }
0x112a   : > { %vm3405_vm10 = vcmp.gt.f32.partialorder %v3401_v57, 15.0 }
0x112b   : > { %v3521_v55 = vpop.xlane.xlu0 %3520  ;;  %vm3409_vm4 = vmand %vm3397_vm9, %vm3405_vm10  ;;  %vm3524_vm9 = vcmp.le.f32.partialorder %v6641_v41, 15.0  ;;  %v3300_v46 = vsel %vm3294_vm12, %v3293_v23, 0.0 }
0x112c   : > { %v3529_v52 = vadd.f32 %v3521_v55, %v6622_v17  ;;  %v4076_v13 = vsel %vm3409_vm4, 1.0, %v5159_v14  ;;  %v3546_v55 = vmul.f32 %v4085_v25, %v6429_v32 }
0x112d   : > { %v3421_v35 = vmul.f32 %v4076_v13, %v6435_v19 }
0x112e   : > { %vm3533_vm7 = vcmp.gt.f32.partialorder %v3529_v52, 15.0  ;;  %v3551_v62 = vsel %vm3550_vm8, %v3546_v55, 0.0 }
0x112f   : > { %v3250_v8 = vpop.xlane.xlu0 %3249  ;;  %vm3537_vm10 = vmand %vm3525_vm5, %vm3533_vm7  ;;  %v3428_v16 = vsel %vm3422_vm2, %v3421_v35, 0.0  ;;  %v3553_v25 = vadd.f32 %v3552_v33, %v3551_v62  ;;  %vm387_vm7 = vcmp.le.s32.totalorder %v6350_v53, %v5294_v20 }
0x1130   : > { %vm3268_vm11 = vcmp.le.f32.partialorder %v3250_v8, 15.0  ;;  %v4088_v32 = vsel %vm3537_vm10, 1.0, %v5159_v14  ;;  %vm6851_vm10 = vcmask 48128  }
0x1133   : > { %v3262_v56 = vpop.xlane.xlu0 %3261 }
0x1134   : > { %v3272_v2 = vadd.f32 %v3262_v56, %v3250_v8  ;;  %v3425_v8 = vadd.f32 %v3424_v40, %v3423_v10 }
0x1136   : > { %vm3276_vm14 = vcmp.gt.f32.partialorder %v3272_v2, 15.0 }
0x1137   : > { %vm3280_vm1 = vmand %vm3268_vm11, %vm3276_vm14  ;;  %v3378_v59 = vpop.xlane.xlu0 %3377  ;;  %vm3652_vm14 = vcmp.le.f32.partialorder %v3634_v39, 15.0 }
0x1138   : > { %v4063_v44 = vsel %vm3280_vm1, 1.0, %v5159_v14  ;;  %vm3396_vm0 = vcmp.le.f32.partialorder %v3378_v59, 15.0  ;;  %vm3678_vm1 = vcmask 31768  }
0x1139   : > { %v3292_v54 = vmul.f32 %v4063_v44, %v6445_v34  ;;  %v3309_v42 = vadd.f32 %v4063_v44, %v3308_v51 }
0x113b   : > { %v3298_v5 = vsel %vm3294_vm12, %v3292_v54, 0.0  ;;  %v3310_v63 = vadd.f32 %v4064_v18, %v3309_v42  ;;  %v3390_v31 = vpop.xlane.xlu0 %3389  ;;  %v3549_v18 = vmul.f32 %v4088_v32, %v6435_v19 }
0x113c   : > { %v3299_v48 = vadd.f32 %v3298_v5, %v3297_v15  ;;  %v3400_v21 = vadd.f32 %v3390_v31, %v3378_v59  ;;  %v3675_v15 = vmul.f32 %v6674_v1, %v6421_v6 }
0x113d   : > { %v3311_v11 = vrot.slane %v3310_v63, 4  ;;  %v3556_v10 = vsel %vm3550_vm8, %v3549_v18, 0.0 }
0x113e   : > { %v3301_v47 = vadd.f32 %v3300_v46, %v3299_v48  ;;  %vm3404_vm11 = vcmp.gt.f32.partialorder %v3400_v21, 15.0 }
0x113f   : > { %v3312_v24 = vadd.f32 %v3311_v11, %v3310_v63  ;;  %vm3408_vm15 = vmand %vm3396_vm0, %vm3404_vm11  ;;  %v3518_v57 = vpop.xlane.xlu0 %3517  ;;  %v3637_v11 = vpop.xlane.xlu1 %3636  ;;  %vm6852_vm0 = vcmask 72704   ;;  %vm388_vm11 = vcmp.le.s32.totalorder %v6350_v53, %v6366_v7 }
0x1140   : > { %v3302_v49 = vrot.slane %v3301_v47, 4  ;;  %v4075_v17 = vsel %vm3408_vm15, 1.0, %v5159_v14  ;;  %v3528_v30 = vadd.f32 %v3518_v57, %v6641_v41  ;;  %vm390_vm15 = vcmp.le.s32.totalorder %v6350_v53, %v6378_v22 }
0x1141   : > { %v3313_v56 = vrot.slane %v3312_v24, 2  ;;  %v3420_v43 = vmul.f32 %v4075_v17, %v6445_v34  ;;  %v3437_v2 = vadd.f32 %v4075_v17, %v3436_v45  ;;  %v3692_v17 = vadd.f32 %v6674_v1, %v6635_v4 }
0x1142   : > { %v3303_v60 = vadd.f32 %v3302_v49, %v3301_v47  ;;  %vm3532_vm12 = vcmp.gt.f32.partialorder %v3528_v30, 15.0  ;;  %v3680_v49 = vsel %vm3678_vm1, %v3675_v15, 0.0 }
0x1143   : > { %v3314_v52 = vadd.f32 %v3313_v56, %v3312_v24  ;;  %v3426_v29 = vsel %vm3422_vm2, %v3420_v43, 0.0  ;;  %v3438_v50 = vadd.f32 %v4076_v13, %v3437_v2  ;;  %vm3536_vm4 = vmand %vm3524_vm9, %vm3532_vm12  ;;  %v3646_v28 = vpop.xlane.xlu0 %3645  ;;  %vm6850_vm9 = vcmask 23552  }
0x1144   : > { %v3304_v51 = vrot.slane %v3303_v60, 2  ;;  %v3427_v59 = vadd.f32 %v3426_v29, %v3425_v8  ;;  %v4087_v40 = vsel %vm3536_vm4, 1.0, %v5159_v14  ;;  %v3656_v12 = vadd.f32 %v3646_v28, %v3634_v39 }
0x1145   : > { %v3315_v44 = vrot.slane %v3314_v52, 1  ;;  %v3439_v23 = vrot.slane %v3438_v50, 4  ;;  %v3548_v54 = vmul.f32 %v4087_v40, %v6445_v34  ;;  %v3565_v42 = vadd.f32 %v4087_v40, %v3564_v26 }
0x1146   : > { %v3429_v5 = vadd.f32 %v3428_v16, %v3427_v59  ;;  %vm3660_vm2 = vcmp.gt.f32.partialorder %v3656_v12, 15.0  ;;  %v3305_v35 = vadd.f32 %v3304_v51, %v3303_v60  ;;  %v3679_v39 = vsel %vm3678_vm1, %v6653_v37, 0.0 }
0x1147   : > { %v3316_v13 = vadd.f32 %v3315_v44, %v3314_v52  ;;  %v3440_v41 = vadd.f32 %v3439_v23, %v3438_v50  ;;  %v3554_v63 = vsel %vm3550_vm8, %v3548_v54, 0.0  ;;  %v3566_v31 = vadd.f32 %v4088_v32, %v3565_v42  ;;  %vm3664_vm13 = vmand %vm3652_vm14, %vm3660_vm2  ;;  %v3649_v46 = vpop.xlane.xlu0 %3648 }
0x1148   : > { %v3430_v48 = vrot.slane %v3429_v5, 4  ;;  %v3555_v21 = vadd.f32 %v3554_v63, %v3553_v25  ;;  %v4099_v55 = vsel %vm3664_vm13, 1.0, %v5159_v14  ;;  %v3657_v32 = vadd.f32 %v3649_v46, %v3637_v11 }
0x1149   : > { %5050 = vrcp.f32 %v3316_v13  ;;  %v3441_v6 = vrot.slane %v3440_v41, 2  ;;  %v3567_v33 = vrot.slane %v3566_v31, 4  ;;  %v3676_v45 = vmul.f32 %v4099_v55, %v6445_v34 }
0x114a   : > { %v3431_v47 = vadd.f32 %v3430_v48, %v3429_v5  ;;  %v3557_v8 = vadd.f32 %v3556_v10, %v3555_v21  ;;  %vm3653_vm8 = vcmp.le.f32.partialorder %v3637_v11, 15.0  ;;  %v3306_v26 = vrot.slane %v3305_v35, 1 }
0x114b   : > { %v3442_v24 = vadd.f32 %v3441_v6, %v3440_v41  ;;  %v3568_v57 = vadd.f32 %v3567_v33, %v3566_v31  ;;  %vm3661_vm5 = vcmp.gt.f32.partialorder %v3657_v32, 15.0  ;;  %v3682_v34 = vsel %vm3678_vm1, %v3676_v45, 0.0 }
0x114c   : > { %v3558_v30 = vrot.slane %v3557_v8, 4  ;;  %v3432_v2 = vrot.slane %v3431_v47, 2  ;;  %v3693_v16 = vadd.f32 %v4099_v55, %v3692_v17  ;;  %vm3665_vm6 = vmand %vm3653_vm8, %vm3661_vm5  ;;  %v3681_v37 = vadd.f32 %v3680_v49, %v3679_v39 }
0x114d   : > { %v3443_v56 = vrot.slane %v3442_v24, 1  ;;  %v3569_v43 = vrot.slane %v3568_v57, 2  ;;  %v4100_v52 = vsel %vm3665_vm6, 1.0, %v5159_v14  ;;  %v3307_v1 = vadd.f32 %v3306_v26, %v3305_v35 }
0x114e   : > { %v3559_v62 = vadd.f32 %v3558_v30, %v3557_v8  ;;  %v3677_v29 = vmul.f32 %v4100_v52, %v6435_v19  ;;  %v3694_v4 = vadd.f32 %v4100_v52, %v3693_v16  ;;  %v3683_v28 = vadd.f32 %v3682_v34, %v3681_v37 }
0x114f   : > { %v3444_v60 = vadd.f32 %v3443_v56, %v3442_v24  ;;  %v3570_v18 = vadd.f32 %v3569_v43, %v3568_v57  ;;  %v3433_v51 = vadd.f32 %v3432_v2, %v3431_v47  ;;  %v3986_v2 = vsel %vm387_vm7, 1.0, %v5159_v14 }
0x1150   : > { %v3560_v59 = vrot.slane %v3559_v62, 2  ;;  %v3684_v40 = vsel %vm3678_vm1, %v3677_v29, 0.0  ;;  %v3695_v12 = vrot.slane %v3694_v4, 4  ;;  %4432 = vmatprep.mubr.msk.f32.mxu1 %vm644_vm3, %v3986_v2  ;;  %vm389_vm14 = vcmp.le.s32.totalorder %v6350_v53, %v6369_v36 }
0x1151   : > { %5052 = vrcp.f32 %v3444_v60  ;;  %v3571_v50 = vrot.slane %v3570_v18, 1  ;;  %v3685_v54 = vadd.f32 %v3684_v40, %v3683_v28  ;;  %v3434_v13 = vrot.slane %v3433_v51, 1 }
0x1152   : > { %v3696_v15 = vadd.f32 %v3695_v12, %v3694_v4  ;;  %v3561_v19 = vadd.f32 %v3560_v59, %v3559_v62 }
0x1153   : > { %v5051_v44 = vpop.eup %5050  ;;  %v3572_v23 = vadd.f32 %v3571_v50, %v3570_v18  ;;  %v3686_v25 = vrot.slane %v3685_v54, 4  ;;  %v3435_v10 = vadd.f32 %v3434_v13, %v3433_v51 }
0x1154   : > { %v3318_v42 = vmul.f32 %v5051_v44, %v3307_v1  ;;  %v3697_v41 = vrot.slane %v3696_v15, 2  ;;  %v3562_v48 = vrot.slane %v3561_v19, 1 }
0x1155   : > { %5054 = vrcp.f32 %v3572_v23  ;;  %v3687_v63 = vadd.f32 %v3686_v25, %v3685_v54 }
0x1156   : > { %v3319_v5 = vadd.f32 0.0001, %v3318_v42  ;;  %v3698_v31 = vadd.f32 %v3697_v41, %v3696_v15  ;;  %v3563_v33 = vadd.f32 %v3562_v48, %v3561_v19 }
0x1157   : > { %v3688_v46 = vrot.slane %v3687_v63, 2 }
0x1158   : > { %5056 = vrcp.f32 %v3319_v5  ;;  %v3699_v21 = vrot.slane %v3698_v31, 1 }
0x1159   : > { %v3689_v8 = vadd.f32 %v3688_v46, %v3687_v63 }
0x115a   : > { %v3700_v35 = vadd.f32 %v3699_v21, %v3698_v31 }
0x115b   : > { %v5053_v55 = vpop.eup %5052  ;;  %v3690_v57 = vrot.slane %v3689_v8, 1 }
0x115c   : > { %v3446_v11 = vmul.f32 %v5053_v55, %v3435_v10  ;;  %5058 = vrcp.f32 %v3700_v35 }
0x115d   : > { %v3691_v32 = vadd.f32 %v3690_v57, %v3689_v8 }
0x115e   : > { %v3447_v6 = vadd.f32 0.0001, %v3446_v11 }
0x115f   : > { %v5055_v47 = vpop.eup %5054 }
0x1160   : > { %5060 = vrcp.f32 %v3447_v6  ;;  %v3574_v45 = vmul.f32 %v5055_v47, %v3563_v33 }
0x1162   : > { %v5057_v39 = vpop.eup %5056  ;;  %v3575_v24 = vadd.f32 0.0001, %v3574_v45 }
0x1163   : > { %3323 = vperm.xlu1 %4845, %v5057_v39  }
0x1164   : > { %5062 = vrcp.f32 %v3575_v24 }
0x1166   : > { %v5059_v49 = vpop.eup %5058 }
0x1167   : > { %4847 = vset.pattern.permute.xlu1 %v6841_v61  ;;  %v3702_v17 = vmul.f32 %v5059_v49, %v3691_v32 }
0x1169   : > { %v3703_v26 = vadd.f32 0.0001, %v3702_v17 }
0x116a   : > { %v5061_v30 = vpop.eup %5060 }
0x116b   : > { %3451 = vperm.xlu0 %4846, %v5061_v30   ;;  %5064 = vrcp.f32 %v3703_v26 }
0x116e   : > { %v5063_v56 = vpop.eup %5062 }
0x116f   : > { %3579 = vperm.xlu1 %4847, %v5063_v56   ;;  %4849 = vset.pattern.permute.xlu0 %v6840_v38 }
0x1173   : > { %4848 = vset.pattern.permute.xlu1 %v6840_v38 }
0x1175   : > { %v5065_v43 = vpop.eup %5064 }
0x1176   : > { %3707 = vperm.xlu1 %4848, %v5065_v43  }
0x11e2   : > { %v3324_v61 = vpop.permute.xlu1 %3323 }
0x11ea   : > { %v3452_v62 = vpop.permute.xlu0 %3451 }
0x11eb   : > { %v3710_v16 = vsel %vm6850_vm9, %v3324_v61, %v3452_v62 }
0x11ee   : > { %v3580_v34 = vpop.permute.xlu1 %3579 }
0x11ef   : > { %v3711_v37 = vsel %vm6851_vm10, %v3710_v16, %v3580_v34 }
0x11f5   : > { %v3708_v60 = vpop.permute.xlu1 %3707 }
0x11f6   : > { %v3712_v18 = vsel %vm6852_vm0, %v3711_v37, %v3708_v60 }
0x11f7   : > { %v3716_v38 = vrot.slane %v3712_v18, %v6842_v27 }
0x11f9   : > { %v3717_v52 = vmul.f32 %v3716_v38, %v6401_v9  ;;  %v3718_v20 = vmul.f32 %v3716_v38, %v6399_v3  ;;  %v3719_v29 = vmul.f32 %v3716_v38, %v6410_v58  ;;  %v3720_v4 = vmul.f32 %v3716_v38, %v6407_v0 }
0x11fa   : > { %v3987_v3 = vsel %vm388_vm11, 1.0, %v5159_v14  ;;  %v3988_v9 = vsel %vm389_vm14, 1.0, %v5159_v14  ;;  %v3989_v0 = vsel %vm390_vm15, 1.0, %v5159_v14 }
0x11fb   : > { %v4568_v1 = vpack.c.bf16 %v3718_v20, %v3717_v52  ;;  %v4572_v50 = vpack.c.bf16 %v3720_v4, %v3719_v29 }
0x11fd   : > { %4569 = vmatprep.subr.bf16.mxu1 %v4568_v1 }
0x11fe   : > { %4571 = vmatpush3.bf16.msra.mxu1 %v4568_v1 }
0x11ff   : > { %4573 = vmatprep.subr.bf16.mxu1 %v4572_v50 }
0x1202   : > { %4575 = vmatpush3.bf16.msra.mxu1 %v4572_v50 }
0x1205   : > { %4433 = vmatmul.mubr.msk.f32.vlgmr.msra.gmra.mrb[20].mxu1 %vm644_vm3, %v3987_v3 }
0x1206   : > { %4435 = vmatprep.mubr.msk.f32.mxu1 %vm644_vm3, %v3988_v9 }
0x1209   : > { %4436 = vmatmul.mubr.msk.f32.gmra.mrb[22].mxu1 %vm644_vm3, %v3989_v0 }
0x120a   : > { %5087 = shalt.err (!%p5084_p3)
}
0x120b   : > { %s5088_s13 = scalar_lea.hbm %s6744_s24, 512  ;;  %s5092_s17 = scalar_lea.hbm %s6807_s9, 1024 }
0x120c   : > { %p5089_p4 = scmp.ne.s32.totalorder %s6744_s24, %s5088_s13  ;;  %p5093_p9 = scmp.lt.u32.totalorder %s6744_s24, %s6807_s9 }
0x120d   : > { %p5094_p10 = scmp.lt.u32.totalorder %s5092_s17, %s5088_s13  ;;  %p5096_p12 = scmp.lt.u32.totalorder %s5088_s13, %s6744_s24 }
0x120e   : > { %p5090_p7 = pnand %p5089_p4, %p5254_p5 }
0x120f   : > { %p5095_p11 = por %p5094_p10, %p5093_p9 }
0x1210   : > { %p5091_p8 = pneg %p5090_p7 }
0x1211   : > { %p5097_p13 = por %p5096_p12, %p5095_p11 }
0x1213   : > { %p5098_p0 = pnand %p5097_p13, %p5091_p8 }
0x1215   : > { %5101 = shalt.err (!%p5098_p0)
}
0x1216   : > { %s5164_s26 = smov 128   ;;  %s5165_s28 = smov 8   ;;  %vm6854_vm8 = vcmask 97280  }
0x1217   : > { %4576 = dma.vmem_to_hbm [thread:$0]  (%p5254_p5), %s6738_s16, 512, %s6744_s24, %s6748_s21, %s5164_s26, %s5164_s26, %s5165_s28   ;;  %vm6855_vm7 = vmmov %vm6854_vm8 }
0x1218   : > { %s6853_s29 = sshll.u32 %s5274_s25, 5  ;;  %vm6856_vm14 = vmmov %vm6855_vm7 }
0x1219   : > { %s363_s13 = scalar_lea.vmem %s6806_s8, %s6853_s29  ;;  %vm6857_vm15 = vmmov %vm6855_vm7 }
0x12d8   : > { %v4434_v53 = vpop.f32.mrb[20].mxu1 }
0x12d9   : > { %vm3819_vm3 = vcmp.ne.f32.partialorder %v4434_v53, %v4434_v53  ;;  %vm3827_vm1 = vcmp.eq.f32.partialorder %v4434_v53, inf  ;;  %v3799_v14 = vpop.f32.mrb[21].mxu1  ;;  %vm3835_vm2 = vcmp.eq.f32.partialorder %v4434_v53, -inf }
0x12da   : > { %v3823_v7 = vsel %vm3819_vm3, 0.0, %v4434_v53  ;;  %vm3818_vm12 = vcmp.ne.f32.partialorder %v3799_v14, %v3799_v14  ;;  %vm3826_vm4 = vcmp.eq.f32.partialorder %v3799_v14, inf  ;;  %vm3834_vm13 = vcmp.eq.f32.partialorder %v3799_v14, -inf }
0x12db   : > { %v3831_v36 = vsel %vm3827_vm1, 100.0, %v3823_v7  ;;  %v3822_v22 = vsel %vm3818_vm12, 0.0, %v3799_v14 }
0x12dc   : > { %v3839_v58 = vsel %vm3835_vm2, -100.0, %v3831_v36  ;;  %v3830_v27 = vsel %vm3826_vm4, 100.0, %v3822_v22  ;;  %v4437_v28 = vpop.f32.mrb[22].mxu1 }
0x12dd   : > { %3843 = vst.msk [vmem:[%s363_s13 + $0x8] sm:$0xff] %vm6854_vm8, %v3839_v58  ;;  %v3838_v51 = vsel %vm3834_vm13, -100.0, %v3830_v27  ;;  %vm3821_vm5 = vcmp.ne.f32.partialorder %v4437_v28, %v4437_v28  ;;  %vm3829_vm6 = vcmp.eq.f32.partialorder %v4437_v28, inf  ;;  %v3809_v59 = vpop.f32.mrb[23].mxu1  ;;  %vm3837_vm0 = vcmp.eq.f32.partialorder %v4437_v28, -inf }
0x12de   : > { %3842 = vst.msk [vmem:[%s363_s13] sm:$0xff] %vm6855_vm7, %v3838_v51  ;;  %v3825_v40 = vsel %vm3821_vm5, 0.0, %v4437_v28  ;;  %vm3820_vm9 = vcmp.ne.f32.partialorder %v3809_v59, %v3809_v59  ;;  %vm3828_vm10 = vcmp.eq.f32.partialorder %v3809_v59, inf  ;;  %vm3836_vm11 = vcmp.eq.f32.partialorder %v3809_v59, -inf }
0x12df   : > { %v3833_v12 = vsel %vm3829_vm6, 100.0, %v3825_v40  ;;  %v3824_v44 = vsel %vm3820_vm9, 0.0, %v3809_v59 }
0x12e0   : > { %v3841_v23 = vsel %vm3837_vm0, -100.0, %v3833_v12  ;;  %v3832_v54 = vsel %vm3828_vm10, 100.0, %v3824_v44 }
0x12e1   : > { %3845 = vst.msk [vmem:[%s363_s13 + $0x18] sm:$0xff] %vm6856_vm14, %v3841_v23  ;;  %v3840_v42 = vsel %vm3836_vm11, -100.0, %v3832_v54 }
0x12e2   : > { %3844 = vst.msk [vmem:[%s363_s13 + $0x10] sm:$0xff] %vm6857_vm15, %v3840_v42 }
0x12e3 PF: > { %p4582_p5 = scmp.ge.s32.totalorder %s5136_s12, 2  ;;  %s3891_s19 = sand.u32 1, %s5124_s30  }
0x12e4   : > { %s3892_s25 = scalar_lea.sflag [#allocation3], %s3891_s19 }
0x12e5   : > { %p4579_p1 = pnand %p4582_p5, %p5258_p6 }
0x12e7   : > { %5119 = dma.done.wait (!%p4579_p1), %s3892_s25, 512  }
0x12e8   : > { %5121 = vsyncadd (!%p4579_p1), %s3892_s25, 4294966784  ;;  %p20_p2 = scmp.ge.s32.totalorder %s5241_s15, 4   ;;  %s6858_s30 = smov %s5128_s10 }
0x12e9   : > { %s6859_s10 = smov %s5132_s11  ;;  %s6860_s11 = smov %s5252_s18 }
0x12ea   : > { %s6861_s12 = smov %s5241_s15  ;;  %22 = sbr.rel (!%p20_p2) target bundleno = 3 (0x3), region = 103 }
0x12f1   :  { %3897 = vsyncpa [#allocation3], 1 }
0x12f2   :  { %3899 = vsyncpa [#allocation3 + $0x1], 1 }

</bundles_post_ra>
